<compile_context>
chip_gen: v7x
topology: tpu7x:2x2x1
jax: 0.10.0
libtpu: 0.0.40
codegen_flags: <defaults>
</compile_context>

<pallas_src>
import functools

import numpy as np
import jax
import jax.numpy as jnp
from jax import lax
from jax.experimental import pallas as pl
from jax.experimental.pallas import tpu as pltpu

# ---- problem sizes (small, consistent with the module) ----------------------
DIM = 32            # dim (channels)
NUM_HEADS = 4
PROJ = 16           # proj_size
D1 = 8              # "W" of the conv view (2nd input axis)
D2 = 8              # "H" of the conv view (3rd input axis)
N = D1 * D2         # == input_size for the E/F linear projections
BATCH = 2


def _gelu_exact(x):
    # nn.GELU() default: exact erf-based GELU
    return 0.5 * x * (1.0 + lax.erf(x * 0.7071067811865476))


# =============================================================================
# Fused DSFE kernel (one batch element per grid step)
# =============================================================================
def _dsfe_kernel(x_ref,
                 w1_ref, b1_ref, wdw_ref, bdw_ref, w2_ref, b2_ref, shift_ref,
                 wqkvv_ref, ew_ref, eb_ref, fw_ref, fb_ref,
                 rep1_ref, rep2_ref, wsa2_ref, bsa_ref, wca_ref, bca_ref,
                 maskca_ref, maskk_ref, gmask_ref, rep16_ref,
                 o_ref, *, num_heads):
    n, c = x_ref.shape[1], x_ref.shape[2]        # 64, 32
    hh, ww = o_ref.shape[1], o_ref.shape[2]      # 8 (H), 8 (W)
    cm = w1_ref.shape[1]                         # 128
    proj = ew_ref.shape[1]                       # 16
    half = wca_ref.shape[1]                      # 16
    d = c // num_heads                           # 8

    x = x_ref[0]                                 # (n, c), sequence layout n = h*W + w

    # -------- LFE: fc1 (1x1) -> depthwise 3x3 -> GELU -> fc2 (1x1) ----------
    h1 = jnp.dot(x, w1_ref[...], preferred_element_type=jnp.float32) + b1_ref[0]
    # depthwise 3x3, padding=1: 9 taps via constant 0/1 shift matrices
    acc = jnp.zeros((n, cm), jnp.float32)
    for k in range(9):
        shifted = jnp.dot(shift_ref[k], h1, preferred_element_type=jnp.float32)
        acc = acc + shifted * wdw_ref[k]
    acc = acc + bdw_ref[0]
    x1 = jnp.dot(_gelu_exact(acc), w2_ref[...],
                 preferred_element_type=jnp.float32) + b2_ref[0]        # (n, c)

    # -------- qkvv projection (one wide matmul for all heads / all 4 parts) -
    qkvv = jnp.dot(x, wqkvv_ref[...], preferred_element_type=jnp.float32)
    q = qkvv[:, 0 * c:1 * c]
    ks = qkvv[:, 1 * c:2 * c]
    v_ca = qkvv[:, 2 * c:3 * c]
    v_sa = qkvv[:, 3 * c:4 * c]

    # F.normalize(dim=-1) on q_shared / k_shared == per-column L2 norm over
    # the sequence axis (head independent -> done once for all heads).
    eps = 1e-12
    qn = q / jnp.maximum(jnp.sqrt(jnp.sum(q * q, axis=0, keepdims=True)), eps)
    kn = ks / jnp.maximum(jnp.sqrt(jnp.sum(ks * ks, axis=0, keepdims=True)), eps)

    # E / F applied to the *unnormalized* k_shared / v_SA over the seq axis,
    # all heads in one (c, n)@(n, proj) matmul each.
    k_proj = lax.dot_general(ks, ew_ref[...], (((0,), (0,)), ((), ())),
                             preferred_element_type=jnp.float32) + eb_ref[0]
    v_proj = lax.dot_general(v_sa, fw_ref[...], (((0,), (0,)), ((), ())),
                             preferred_element_type=jnp.float32) + fb_ref[0]

    # -------- channel attention (block-diagonal over heads) -----------------
    s_ca = lax.dot_general(qn, kn, (((0,), (0,)), ((), ())),
                           preferred_element_type=jnp.float32)          # (c, c)
    s_ca = s_ca * rep1_ref[...]                  # temperature (per row's head)
    s_ca = jnp.where(maskca_ref[...] > 0.5, s_ca, -1e30)
    e_ca = jnp.exp(s_ca - jnp.max(s_ca, axis=-1, keepdims=True))
    attn_ca = e_ca / jnp.sum(e_ca, axis=-1, keepdims=True)   # exact 0 off-block
    x_ca = lax.dot_general(v_ca, attn_ca, (((1,), (1,)), ((), ())),
                           preferred_element_type=jnp.float32)          # (n, c)
    ca_out = jnp.dot(x_ca, wca_ref[...],
                     preferred_element_type=jnp.float32) + bca_ref[0]   # (n, c/2)

    # -------- spatial attention (block-diagonal over heads) -----------------
    # kbd[ch, h*proj+p] = k_proj[ch, p] if channel ch belongs to head h else 0
    kbd = jnp.dot(k_proj, rep16_ref[...],
                  preferred_element_type=jnp.float32) * maskk_ref[...]  # (c, nh*proj)
    s_sa = jnp.dot(qn, kbd, preferred_element_type=jnp.float32) * rep2_ref[...]
    # per-head softmax; subtracting the global row max is a valid shift, the
    # per-head denominators come from one matmul with a block-diag ones matrix
    e_sa = jnp.exp(s_sa - jnp.max(s_sa, axis=-1, keepdims=True))
    denom = jnp.dot(e_sa, gmask_ref[...], preferred_element_type=jnp.float32)
    attn_sa = e_sa / denom                                              # (n, nh*proj)

    # out_proj folded through the reference (B,nh,N,d)->(B,N,C) permute/reshape
    # (which interleaves sequence and channel); wsa2 is the 2x block-stacked
    # out_proj weight prepared on the host.
    u_all = lax.dot_general(attn_sa, wsa2_ref[...], (((0,), (0,)), ((), ())),
                            preferred_element_type=jnp.float32)   # (nh*proj, c)
    bsa = bsa_ref[0]

    # -------- stores (output block is (hh, ww, c) with seq row n = hh*W + ww)
    # right half of the channel concat: out_proj2(x_CA)
    o_ref[0, :, :, half:c] = ca_out.reshape(hh, ww, half)
    # left half: out_proj(x_SA) -- the reference's permute/reshape lands head h
    # / sequence-half `sub` at output column ww = 2*h + sub, row hh = d-index.
    for h in range(num_heads):
        p_h = jnp.dot(v_proj[h * d:(h + 1) * d, :],
                      u_all[h * proj:(h + 1) * proj, :],
                      preferred_element_type=jnp.float32)         # (d, c)
        for sub in range(2):
            col = 2 * h + sub
            o_ref[0, :, col, 0:half] = (p_h[:, sub * half:(sub + 1) * half]
                                        + bsa)
    # residual: + LFE output (same (hh, ww, c) layout)
    o_ref[0] = o_ref[0] + x1.reshape(hh, ww, c)


# =============================================================================
# Host-side derived constants (layout plumbing, built once)
# =============================================================================
def _build_shift_mats(hh, ww):
    """0/1 matrices for the 9 taps of a 3x3 'same' conv on flattened n=h*W+w."""
    nn = hh * ww
    mats = np.zeros((9, nn, nn), np.float32)
    for kh in range(3):
        for kw in range(3):
            k = kh * 3 + kw
            for ih in range(hh):
                for iw in range(ww):
                    sh, sw = ih + kh - 1, iw + kw - 1
                    if 0 <= sh < hh and 0 <= sw < ww:
                        mats[k, ih * ww + iw, sh * ww + sw] = 1.0
    return jnp.asarray(mats)


def _build_masks(c, nh, proj):
    d = c // nh
    g = nh * proj
    rc = np.arange(c)
    rg = np.arange(g)
    maskca = (rc[:, None] // d == rc[None, :] // d).astype(np.float32)     # (c, c)
    maskk = (rc[:, None] // d == rg[None, :] // proj).astype(np.float32)   # (c, g)
    gmask = (rg[:, None] // proj == rg[None, :] // proj).astype(np.float32)  # (g, g)
    rep16 = (rg[None, :] % proj == np.arange(proj)[:, None]).astype(np.float32)  # (proj, g)
    return (jnp.asarray(maskca), jnp.asarray(maskk),
            jnp.asarray(gmask), jnp.asarray(rep16))


# =============================================================================
# Full DSFE forward
# =============================================================================
@jax.jit
def dsfe_forward(x, params):
    b, d1, d2, c = x.shape                    # (B, W, H, C)
    n = d1 * d2
    nh, proj = NUM_HEADS, PROJ
    d = c // nh
    half = c // 2
    cm = params["lfe"]["w1"].shape[1]

    # The in-kernel fold of the reference's (B,nh,N,d)->(B,N,C) reshape relies
    # on these ratios (they hold for the module defaults: 8x8, dim=32, 4 heads)
    assert n == 2 * c and d2 == d and d1 == 2 * nh

    lfe = params["lfe"]

    shift = _build_shift_mats(d2, d1)
    maskca, maskk, gmask, rep16 = _build_masks(c, nh, proj)
    wdw9 = lfe["wdw"].reshape(9, cm)
    rep1 = jnp.repeat(params["temp1"], d).reshape(c, 1)          # temp per channel
    rep2 = jnp.repeat(params["temp2"], proj).reshape(1, nh * proj)
    zpad = jnp.zeros((c, half), jnp.float32)
    wsa2 = jnp.concatenate(
        [jnp.concatenate([params["wsa"], zpad], axis=1),
         jnp.concatenate([zpad, params["wsa"]], axis=1)], axis=0)  # (n, c)

    # sequence layout: n = h*W + w (matches the reference reshape chain)
    x_seq = jnp.transpose(x, (0, 2, 1, 3)).reshape(b, n, c)

    def _full(shape):
        nd = len(shape)
        return pl.BlockSpec(shape, lambda i, _nd=nd: (0,) * _nd)

    out4 = pl.pallas_call(
        functools.partial(_dsfe_kernel, num_heads=nh),
        out_shape=jax.ShapeDtypeStruct((b, d2, d1, c), jnp.float32),
        grid_spec=pltpu.PrefetchScalarGridSpec(
            num_scalar_prefetch=0,
            grid=(b,),
            in_specs=[
                pl.BlockSpec((1, n, c), lambda i: (i, 0, 0)),     # x (seq)
                _full((c, cm)), _full((1, cm)),                   # fc1
                _full((9, cm)), _full((1, cm)),                   # dwconv
                _full((cm, c)), _full((1, c)),                    # fc2
                _full((9, n, n)),                                 # shift mats
                _full((c, 4 * c)),                                # qkvv
                _full((n, proj)), _full((1, proj)),               # E
                _full((n, proj)), _full((1, proj)),               # F
                _full((c, 1)), _full((1, nh * proj)),             # temperatures
                _full((n, c)), _full((1, half)),                  # out_proj (folded)
                _full((c, half)), _full((1, half)),               # out_proj2
                _full((c, c)), _full((c, nh * proj)),             # masks
                _full((nh * proj, nh * proj)), _full((proj, nh * proj)),
            ],
            out_specs=pl.BlockSpec((1, d2, d1, c), lambda i: (i, 0, 0, 0)),
        ),
        compiler_params=pltpu.CompilerParams(
            dimension_semantics=("parallel",)),
    )(x_seq,
      lfe["w1"], lfe["b1"], wdw9, lfe["bdw"], lfe["w2"], lfe["b2"], shift,
      params["wqkvv"], params["ew"], params["eb"], params["fw"], params["fb"],
      rep1, rep2, wsa2, params["bsa"], params["wca"], params["bca"],
      maskca, maskk, gmask, rep16)

    # (B, h, w, C) -> (B, W, H, C): back to the input layout
    return jnp.transpose(out4, (0, 2, 1, 3))


# =============================================================================
# Deterministic parameter init (shapes per the module __init__)
# =============================================================================
def init_params(key):
    c, cm, nh, proj, n = DIM, 4 * DIM, NUM_HEADS, PROJ, N
    ks = jax.random.split(key, 15)

    def w(k, shape, scale=0.05):
        return (scale * jax.random.normal(k, shape)).astype(jnp.float32)

    lfe = dict(
        w1=w(ks[0], (c, cm)),  b1=w(ks[1], (1, cm)),      # fc1 (1x1 conv)
        wdw=w(ks[2], (3, 3, cm)), bdw=w(ks[3], (1, cm)),  # depthwise 3x3
        w2=w(ks[4], (cm, c)),  b2=w(ks[5], (1, c)),       # fc2 (1x1 conv)
    )
    return dict(
        lfe=lfe,
        wqkvv=w(ks[6], (c, 4 * c)),                       # qkv_bias=False
        ew=w(ks[7], (n, proj)), eb=w(ks[8], (1, proj)),   # E: Linear(input_size, proj)
        fw=w(ks[9], (n, proj)), fb=w(ks[10], (1, proj)),  # F: Linear(input_size, proj)
        temp1=jnp.ones((nh,), jnp.float32),               # temperature  (init ones)
        temp2=jnp.ones((nh,), jnp.float32),               # temperature2 (init ones)
        wsa=w(ks[11], (c, c // 2)), bsa=w(ks[12], (1, c // 2)),  # out_proj
        wca=w(ks[13], (c, c // 2)), bca=w(ks[14], (1, c // 2)),  # out_proj2
    )


if __name__ == "__main__":
    key = jax.random.PRNGKey(0)
    pkey, xkey = jax.random.split(key)
    params = init_params(pkey)
    # input: (B, W, H, C) channels-last, input_size == W*H == 64
    x = jax.random.normal(xkey, (BATCH, D1, D2, DIM), dtype=jnp.float32)

    out = dsfe_forward(x, params)
    out = jax.block_until_ready(out)
    assert out.shape == (BATCH, D1, D2, DIM)
    assert bool(jnp.all(jnp.isfinite(out)))
    print("KERNEL_OK")
</pallas_src>

<mosaic_0001>
module attributes {stable_mosaic.version = 11 : i64} {
  func.func @_dsfe_kernel(%arg0: i32, %arg1: memref<1x64x32xf32, #tpu.memory_space<vmem>>, %arg2: memref<32x128xf32, #tpu.memory_space<vmem>>, %arg3: memref<1x128xf32, #tpu.memory_space<vmem>>, %arg4: memref<9x128xf32, #tpu.memory_space<vmem>>, %arg5: memref<1x128xf32, #tpu.memory_space<vmem>>, %arg6: memref<128x32xf32, #tpu.memory_space<vmem>>, %arg7: memref<1x32xf32, #tpu.memory_space<vmem>>, %arg8: memref<9x64x64xf32, #tpu.memory_space<vmem>>, %arg9: memref<32x128xf32, #tpu.memory_space<vmem>>, %arg10: memref<64x16xf32, #tpu.memory_space<vmem>>, %arg11: memref<1x16xf32, #tpu.memory_space<vmem>>, %arg12: memref<64x16xf32, #tpu.memory_space<vmem>>, %arg13: memref<1x16xf32, #tpu.memory_space<vmem>>, %arg14: memref<32x1xf32, #tpu.memory_space<vmem>>, %arg15: memref<1x64xf32, #tpu.memory_space<vmem>>, %arg16: memref<64x32xf32, #tpu.memory_space<vmem>>, %arg17: memref<1x16xf32, #tpu.memory_space<vmem>>, %arg18: memref<32x16xf32, #tpu.memory_space<vmem>>, %arg19: memref<1x16xf32, #tpu.memory_space<vmem>>, %arg20: memref<32x32xf32, #tpu.memory_space<vmem>>, %arg21: memref<32x64xf32, #tpu.memory_space<vmem>>, %arg22: memref<64x64xf32, #tpu.memory_space<vmem>>, %arg23: memref<16x64xf32, #tpu.memory_space<vmem>>, %arg24: memref<1x8x8x32xf32, #tpu.memory_space<vmem>>) attributes {dimension_semantics = [#tpu.dimension_semantics<parallel>], iteration_bounds = array<i64: 2>, scalar_prefetch = 0 : i64, scratch_operands = 0 : i64, tpu.core_type = #tpu.core_type<tc>, window_params = [{transform_indices = @transform_0, window_bounds = array<i64: 1, 64, 32>}, {pipeline_mode = #tpu.pipeline_mode<synchronous>, transform_indices = @transform_1, window_bounds = array<i64: 32, 128>}, {pipeline_mode = #tpu.pipeline_mode<synchronous>, transform_indices = @transform_2, window_bounds = array<i64: 1, 128>}, {pipeline_mode = #tpu.pipeline_mode<synchronous>, transform_indices = @transform_3, window_bounds = array<i64: 9, 128>}, {pipeline_mode = #tpu.pipeline_mode<synchronous>, transform_indices = @transform_4, window_bounds = array<i64: 1, 128>}, {pipeline_mode = #tpu.pipeline_mode<synchronous>, transform_indices = @transform_5, window_bounds = array<i64: 128, 32>}, {pipeline_mode = #tpu.pipeline_mode<synchronous>, transform_indices = @transform_6, window_bounds = array<i64: 1, 32>}, {pipeline_mode = #tpu.pipeline_mode<synchronous>, transform_indices = @transform_7, window_bounds = array<i64: 9, 64, 64>}, {pipeline_mode = #tpu.pipeline_mode<synchronous>, transform_indices = @transform_8, window_bounds = array<i64: 32, 128>}, {pipeline_mode = #tpu.pipeline_mode<synchronous>, transform_indices = @transform_9, window_bounds = array<i64: 64, 16>}, {pipeline_mode = #tpu.pipeline_mode<synchronous>, transform_indices = @transform_10, window_bounds = array<i64: 1, 16>}, {pipeline_mode = #tpu.pipeline_mode<synchronous>, transform_indices = @transform_11, window_bounds = array<i64: 64, 16>}, {pipeline_mode = #tpu.pipeline_mode<synchronous>, transform_indices = @transform_12, window_bounds = array<i64: 1, 16>}, {pipeline_mode = #tpu.pipeline_mode<synchronous>, transform_indices = @transform_13, window_bounds = array<i64: 32, 1>}, {pipeline_mode = #tpu.pipeline_mode<synchronous>, transform_indices = @transform_14, window_bounds = array<i64: 1, 64>}, {pipeline_mode = #tpu.pipeline_mode<synchronous>, transform_indices = @transform_15, window_bounds = array<i64: 64, 32>}, {pipeline_mode = #tpu.pipeline_mode<synchronous>, transform_indices = @transform_16, window_bounds = array<i64: 1, 16>}, {pipeline_mode = #tpu.pipeline_mode<synchronous>, transform_indices = @transform_17, window_bounds = array<i64: 32, 16>}, {pipeline_mode = #tpu.pipeline_mode<synchronous>, transform_indices = @transform_18, window_bounds = array<i64: 1, 16>}, {pipeline_mode = #tpu.pipeline_mode<synchronous>, transform_indices = @transform_19, window_bounds = array<i64: 32, 32>}, {pipeline_mode = #tpu.pipeline_mode<synchronous>, transform_indices = @transform_20, window_bounds = array<i64: 32, 64>}, {pipeline_mode = #tpu.pipeline_mode<synchronous>, transform_indices = @transform_21, window_bounds = array<i64: 64, 64>}, {pipeline_mode = #tpu.pipeline_mode<synchronous>, transform_indices = @transform_22, window_bounds = array<i64: 16, 64>}, {transform_indices = @transform_23, window_bounds = array<i64: 1, 8, 8, 32>}]} {
    %c0 = arith.constant 0 : index
    %c0_0 = arith.constant 0 : index
    %c0_1 = arith.constant 0 : index
    %0 = vector.load %arg1[%c0, %c0_0, %c0_1] : memref<1x64x32xf32, #tpu.memory_space<vmem>>, vector<1x64x32xf32>
    %1 = vector.shape_cast %0 : vector<1x64x32xf32> to vector<64x32xf32>
    %c0_2 = arith.constant 0 : index
    %c0_3 = arith.constant 0 : index
    %2 = vector.load %arg2[%c0_2, %c0_3] : memref<32x128xf32, #tpu.memory_space<vmem>>, vector<32x128xf32>
    %cst = arith.constant dense<0.000000e+00> : vector<64x128xf32>
    %3 = tpu.matmul %1, %2, %cst {dimension_numbers = #tpu.dot_dimension_numbers<[1], [0], [0], [1], [0, 0, 1, 1], [], []>} : vector<64x32xf32>, vector<32x128xf32>, vector<64x128xf32> -> vector<64x128xf32>
    %c0_4 = arith.constant 0 : index
    %c0_5 = arith.constant 0 : index
    %4 = vector.load %arg3[%c0_4, %c0_5] : memref<1x128xf32, #tpu.memory_space<vmem>>, vector<1x128xf32>
    %5 = vector.shape_cast %4 : vector<1x128xf32> to vector<128xf32>
    %6 = vector.shape_cast %5 : vector<128xf32> to vector<1x128xf32>
    %7 = vector.broadcast %6 : vector<1x128xf32> to vector<64x128xf32>
    %8 = arith.addf %3, %7 : vector<64x128xf32>
    %cst_6 = arith.constant 0.000000e+00 : f32
    %9 = vector.broadcast %cst_6 : f32 to vector<64x128xf32>
    %c0_7 = arith.constant 0 : index
    %c0_8 = arith.constant 0 : index
    %c0_9 = arith.constant 0 : index
    %10 = vector.load %arg8[%c0_7, %c0_8, %c0_9] : memref<9x64x64xf32, #tpu.memory_space<vmem>>, vector<1x64x64xf32>
    %11 = vector.shape_cast %10 : vector<1x64x64xf32> to vector<64x64xf32>
    %cst_10 = arith.constant dense<0.000000e+00> : vector<64x128xf32>
    %12 = tpu.matmul %11, %8, %cst_10 {dimension_numbers = #tpu.dot_dimension_numbers<[1], [0], [0], [1], [0, 0, 1, 1], [], []>} : vector<64x64xf32>, vector<64x128xf32>, vector<64x128xf32> -> vector<64x128xf32>
    %c0_11 = arith.constant 0 : index
    %c0_12 = arith.constant 0 : index
    %13 = vector.load %arg4[%c0_11, %c0_12] : memref<9x128xf32, #tpu.memory_space<vmem>>, vector<1x128xf32>
    %14 = vector.shape_cast %13 : vector<1x128xf32> to vector<128xf32>
    %15 = vector.shape_cast %14 : vector<128xf32> to vector<1x128xf32>
    %16 = vector.broadcast %15 : vector<1x128xf32> to vector<64x128xf32>
    %17 = arith.mulf %12, %16 : vector<64x128xf32>
    %18 = arith.addf %9, %17 : vector<64x128xf32>
    %c1 = arith.constant 1 : index
    %c0_13 = arith.constant 0 : index
    %c0_14 = arith.constant 0 : index
    %19 = vector.load %arg8[%c1, %c0_13, %c0_14] : memref<9x64x64xf32, #tpu.memory_space<vmem>>, vector<1x64x64xf32>
    %20 = vector.shape_cast %19 : vector<1x64x64xf32> to vector<64x64xf32>
    %cst_15 = arith.constant dense<0.000000e+00> : vector<64x128xf32>
    %21 = tpu.matmul %20, %8, %cst_15 {dimension_numbers = #tpu.dot_dimension_numbers<[1], [0], [0], [1], [0, 0, 1, 1], [], []>} : vector<64x64xf32>, vector<64x128xf32>, vector<64x128xf32> -> vector<64x128xf32>
    %c1_16 = arith.constant 1 : index
    %c0_17 = arith.constant 0 : index
    %22 = vector.load %arg4[%c1_16, %c0_17] : memref<9x128xf32, #tpu.memory_space<vmem>>, vector<1x128xf32>
    %23 = vector.shape_cast %22 : vector<1x128xf32> to vector<128xf32>
    %24 = vector.shape_cast %23 : vector<128xf32> to vector<1x128xf32>
    %25 = vector.broadcast %24 : vector<1x128xf32> to vector<64x128xf32>
    %26 = arith.mulf %21, %25 : vector<64x128xf32>
    %27 = arith.addf %18, %26 : vector<64x128xf32>
    %c2 = arith.constant 2 : index
    %c0_18 = arith.constant 0 : index
    %c0_19 = arith.constant 0 : index
    %28 = vector.load %arg8[%c2, %c0_18, %c0_19] : memref<9x64x64xf32, #tpu.memory_space<vmem>>, vector<1x64x64xf32>
    %29 = vector.shape_cast %28 : vector<1x64x64xf32> to vector<64x64xf32>
    %cst_20 = arith.constant dense<0.000000e+00> : vector<64x128xf32>
    %30 = tpu.matmul %29, %8, %cst_20 {dimension_numbers = #tpu.dot_dimension_numbers<[1], [0], [0], [1], [0, 0, 1, 1], [], []>} : vector<64x64xf32>, vector<64x128xf32>, vector<64x128xf32> -> vector<64x128xf32>
    %c2_21 = arith.constant 2 : index
    %c0_22 = arith.constant 0 : index
    %31 = vector.load %arg4[%c2_21, %c0_22] : memref<9x128xf32, #tpu.memory_space<vmem>>, vector<1x128xf32>
    %32 = vector.shape_cast %31 : vector<1x128xf32> to vector<128xf32>
    %33 = vector.shape_cast %32 : vector<128xf32> to vector<1x128xf32>
    %34 = vector.broadcast %33 : vector<1x128xf32> to vector<64x128xf32>
    %35 = arith.mulf %30, %34 : vector<64x128xf32>
    %36 = arith.addf %27, %35 : vector<64x128xf32>
    %c3 = arith.constant 3 : index
    %c0_23 = arith.constant 0 : index
    %c0_24 = arith.constant 0 : index
    %37 = vector.load %arg8[%c3, %c0_23, %c0_24] : memref<9x64x64xf32, #tpu.memory_space<vmem>>, vector<1x64x64xf32>
    %38 = vector.shape_cast %37 : vector<1x64x64xf32> to vector<64x64xf32>
    %cst_25 = arith.constant dense<0.000000e+00> : vector<64x128xf32>
    %39 = tpu.matmul %38, %8, %cst_25 {dimension_numbers = #tpu.dot_dimension_numbers<[1], [0], [0], [1], [0, 0, 1, 1], [], []>} : vector<64x64xf32>, vector<64x128xf32>, vector<64x128xf32> -> vector<64x128xf32>
    %c3_26 = arith.constant 3 : index
    %c0_27 = arith.constant 0 : index
    %40 = vector.load %arg4[%c3_26, %c0_27] : memref<9x128xf32, #tpu.memory_space<vmem>>, vector<1x128xf32>
    %41 = vector.shape_cast %40 : vector<1x128xf32> to vector<128xf32>
    %42 = vector.shape_cast %41 : vector<128xf32> to vector<1x128xf32>
    %43 = vector.broadcast %42 : vector<1x128xf32> to vector<64x128xf32>
    %44 = arith.mulf %39, %43 : vector<64x128xf32>
    %45 = arith.addf %36, %44 : vector<64x128xf32>
    %c4 = arith.constant 4 : index
    %c0_28 = arith.constant 0 : index
    %c0_29 = arith.constant 0 : index
    %46 = vector.load %arg8[%c4, %c0_28, %c0_29] : memref<9x64x64xf32, #tpu.memory_space<vmem>>, vector<1x64x64xf32>
    %47 = vector.shape_cast %46 : vector<1x64x64xf32> to vector<64x64xf32>
    %cst_30 = arith.constant dense<0.000000e+00> : vector<64x128xf32>
    %48 = tpu.matmul %47, %8, %cst_30 {dimension_numbers = #tpu.dot_dimension_numbers<[1], [0], [0], [1], [0, 0, 1, 1], [], []>} : vector<64x64xf32>, vector<64x128xf32>, vector<64x128xf32> -> vector<64x128xf32>
    %c4_31 = arith.constant 4 : index
    %c0_32 = arith.constant 0 : index
    %49 = vector.load %arg4[%c4_31, %c0_32] : memref<9x128xf32, #tpu.memory_space<vmem>>, vector<1x128xf32>
    %50 = vector.shape_cast %49 : vector<1x128xf32> to vector<128xf32>
    %51 = vector.shape_cast %50 : vector<128xf32> to vector<1x128xf32>
    %52 = vector.broadcast %51 : vector<1x128xf32> to vector<64x128xf32>
    %53 = arith.mulf %48, %52 : vector<64x128xf32>
    %54 = arith.addf %45, %53 : vector<64x128xf32>
    %c5 = arith.constant 5 : index
    %c0_33 = arith.constant 0 : index
    %c0_34 = arith.constant 0 : index
    %55 = vector.load %arg8[%c5, %c0_33, %c0_34] : memref<9x64x64xf32, #tpu.memory_space<vmem>>, vector<1x64x64xf32>
    %56 = vector.shape_cast %55 : vector<1x64x64xf32> to vector<64x64xf32>
    %cst_35 = arith.constant dense<0.000000e+00> : vector<64x128xf32>
    %57 = tpu.matmul %56, %8, %cst_35 {dimension_numbers = #tpu.dot_dimension_numbers<[1], [0], [0], [1], [0, 0, 1, 1], [], []>} : vector<64x64xf32>, vector<64x128xf32>, vector<64x128xf32> -> vector<64x128xf32>
    %c5_36 = arith.constant 5 : index
    %c0_37 = arith.constant 0 : index
    %58 = vector.load %arg4[%c5_36, %c0_37] : memref<9x128xf32, #tpu.memory_space<vmem>>, vector<1x128xf32>
    %59 = vector.shape_cast %58 : vector<1x128xf32> to vector<128xf32>
    %60 = vector.shape_cast %59 : vector<128xf32> to vector<1x128xf32>
    %61 = vector.broadcast %60 : vector<1x128xf32> to vector<64x128xf32>
    %62 = arith.mulf %57, %61 : vector<64x128xf32>
    %63 = arith.addf %54, %62 : vector<64x128xf32>
    %c6 = arith.constant 6 : index
    %c0_38 = arith.constant 0 : index
    %c0_39 = arith.constant 0 : index
    %64 = vector.load %arg8[%c6, %c0_38, %c0_39] : memref<9x64x64xf32, #tpu.memory_space<vmem>>, vector<1x64x64xf32>
    %65 = vector.shape_cast %64 : vector<1x64x64xf32> to vector<64x64xf32>
    %cst_40 = arith.constant dense<0.000000e+00> : vector<64x128xf32>
    %66 = tpu.matmul %65, %8, %cst_40 {dimension_numbers = #tpu.dot_dimension_numbers<[1], [0], [0], [1], [0, 0, 1, 1], [], []>} : vector<64x64xf32>, vector<64x128xf32>, vector<64x128xf32> -> vector<64x128xf32>
    %c6_41 = arith.constant 6 : index
    %c0_42 = arith.constant 0 : index
    %67 = vector.load %arg4[%c6_41, %c0_42] : memref<9x128xf32, #tpu.memory_space<vmem>>, vector<1x128xf32>
    %68 = vector.shape_cast %67 : vector<1x128xf32> to vector<128xf32>
    %69 = vector.shape_cast %68 : vector<128xf32> to vector<1x128xf32>
    %70 = vector.broadcast %69 : vector<1x128xf32> to vector<64x128xf32>
    %71 = arith.mulf %66, %70 : vector<64x128xf32>
    %72 = arith.addf %63, %71 : vector<64x128xf32>
    %c7 = arith.constant 7 : index
    %c0_43 = arith.constant 0 : index
    %c0_44 = arith.constant 0 : index
    %73 = vector.load %arg8[%c7, %c0_43, %c0_44] : memref<9x64x64xf32, #tpu.memory_space<vmem>>, vector<1x64x64xf32>
    %74 = vector.shape_cast %73 : vector<1x64x64xf32> to vector<64x64xf32>
    %cst_45 = arith.constant dense<0.000000e+00> : vector<64x128xf32>
    %75 = tpu.matmul %74, %8, %cst_45 {dimension_numbers = #tpu.dot_dimension_numbers<[1], [0], [0], [1], [0, 0, 1, 1], [], []>} : vector<64x64xf32>, vector<64x128xf32>, vector<64x128xf32> -> vector<64x128xf32>
    %c7_46 = arith.constant 7 : index
    %c0_47 = arith.constant 0 : index
    %76 = vector.load %arg4[%c7_46, %c0_47] : memref<9x128xf32, #tpu.memory_space<vmem>>, vector<1x128xf32>
    %77 = vector.shape_cast %76 : vector<1x128xf32> to vector<128xf32>
    %78 = vector.shape_cast %77 : vector<128xf32> to vector<1x128xf32>
    %79 = vector.broadcast %78 : vector<1x128xf32> to vector<64x128xf32>
    %80 = arith.mulf %75, %79 : vector<64x128xf32>
    %81 = arith.addf %72, %80 : vector<64x128xf32>
    %c8 = arith.constant 8 : index
    %c0_48 = arith.constant 0 : index
    %c0_49 = arith.constant 0 : index
    %82 = vector.load %arg8[%c8, %c0_48, %c0_49] : memref<9x64x64xf32, #tpu.memory_space<vmem>>, vector<1x64x64xf32>
    %83 = vector.shape_cast %82 : vector<1x64x64xf32> to vector<64x64xf32>
    %cst_50 = arith.constant dense<0.000000e+00> : vector<64x128xf32>
    %84 = tpu.matmul %83, %8, %cst_50 {dimension_numbers = #tpu.dot_dimension_numbers<[1], [0], [0], [1], [0, 0, 1, 1], [], []>} : vector<64x64xf32>, vector<64x128xf32>, vector<64x128xf32> -> vector<64x128xf32>
    %c8_51 = arith.constant 8 : index
    %c0_52 = arith.constant 0 : index
    %85 = vector.load %arg4[%c8_51, %c0_52] : memref<9x128xf32, #tpu.memory_space<vmem>>, vector<1x128xf32>
    %86 = vector.shape_cast %85 : vector<1x128xf32> to vector<128xf32>
    %87 = vector.shape_cast %86 : vector<128xf32> to vector<1x128xf32>
    %88 = vector.broadcast %87 : vector<1x128xf32> to vector<64x128xf32>
    %89 = arith.mulf %84, %88 : vector<64x128xf32>
    %90 = arith.addf %81, %89 : vector<64x128xf32>
    %c0_53 = arith.constant 0 : index
    %c0_54 = arith.constant 0 : index
    %91 = vector.load %arg5[%c0_53, %c0_54] : memref<1x128xf32, #tpu.memory_space<vmem>>, vector<1x128xf32>
    %92 = vector.shape_cast %91 : vector<1x128xf32> to vector<128xf32>
    %93 = vector.shape_cast %92 : vector<128xf32> to vector<1x128xf32>
    %94 = vector.broadcast %93 : vector<1x128xf32> to vector<64x128xf32>
    %95 = arith.addf %90, %94 : vector<64x128xf32>
    %cst_55 = arith.constant 5.000000e-01 : f32
    %96 = vector.broadcast %cst_55 : f32 to vector<64x128xf32>
    %97 = arith.mulf %96, %95 : vector<64x128xf32>
    %cst_56 = arith.constant 0.707106769 : f32
    %98 = vector.broadcast %cst_56 : f32 to vector<64x128xf32>
    %99 = arith.mulf %95, %98 : vector<64x128xf32>
    %100 = math.erf %99 : vector<64x128xf32>
    %cst_57 = arith.constant 1.000000e+00 : f32
    %101 = vector.broadcast %cst_57 : f32 to vector<64x128xf32>
    %102 = arith.addf %101, %100 : vector<64x128xf32>
    %103 = arith.mulf %97, %102 : vector<64x128xf32>
    %c0_58 = arith.constant 0 : index
    %c0_59 = arith.constant 0 : index
    %104 = vector.load %arg6[%c0_58, %c0_59] : memref<128x32xf32, #tpu.memory_space<vmem>>, vector<128x32xf32>
    %cst_60 = arith.constant dense<0.000000e+00> : vector<64x32xf32>
    %105 = tpu.matmul %103, %104, %cst_60 {dimension_numbers = #tpu.dot_dimension_numbers<[1], [0], [0], [1], [0, 0, 1, 1], [], []>} : vector<64x128xf32>, vector<128x32xf32>, vector<64x32xf32> -> vector<64x32xf32>
    %c0_61 = arith.constant 0 : index
    %c0_62 = arith.constant 0 : index
    %106 = vector.load %arg7[%c0_61, %c0_62] : memref<1x32xf32, #tpu.memory_space<vmem>>, vector<1x32xf32>
    %107 = vector.shape_cast %106 : vector<1x32xf32> to vector<32xf32>
    %108 = vector.shape_cast %107 : vector<32xf32> to vector<1x32xf32>
    %109 = vector.broadcast %108 : vector<1x32xf32> to vector<64x32xf32>
    %110 = arith.addf %105, %109 : vector<64x32xf32>
    %c0_63 = arith.constant 0 : index
    %c0_64 = arith.constant 0 : index
    %111 = vector.load %arg9[%c0_63, %c0_64] : memref<32x128xf32, #tpu.memory_space<vmem>>, vector<32x128xf32>
    %cst_65 = arith.constant dense<0.000000e+00> : vector<64x128xf32>
    %112 = tpu.matmul %1, %111, %cst_65 {dimension_numbers = #tpu.dot_dimension_numbers<[1], [0], [0], [1], [0, 0, 1, 1], [], []>} : vector<64x32xf32>, vector<32x128xf32>, vector<64x128xf32> -> vector<64x128xf32>
    %113 = vector.extract_strided_slice %112 {offsets = [0, 0], sizes = [64, 32], strides = [1, 1]} : vector<64x128xf32> to vector<64x32xf32>
    %114 = vector.extract_strided_slice %112 {offsets = [0, 32], sizes = [64, 32], strides = [1, 1]} : vector<64x128xf32> to vector<64x32xf32>
    %115 = vector.extract_strided_slice %112 {offsets = [0, 64], sizes = [64, 32], strides = [1, 1]} : vector<64x128xf32> to vector<64x32xf32>
    %116 = vector.extract_strided_slice %112 {offsets = [0, 96], sizes = [64, 32], strides = [1, 1]} : vector<64x128xf32> to vector<64x32xf32>
    %117 = arith.mulf %113, %113 : vector<64x32xf32>
    %cst_66 = arith.constant dense<0.000000e+00> : vector<32xf32>
    %118 = vector.multi_reduction <add>, %117, %cst_66 [0] : vector<64x32xf32> to vector<32xf32>
    %119 = vector.shape_cast %118 : vector<32xf32> to vector<1x32xf32>
    %120 = math.sqrt %119 : vector<1x32xf32>
    %cst_67 = arith.constant 9.99999996E-13 : f32
    %121 = vector.broadcast %cst_67 : f32 to vector<1x32xf32>
    %122 = arith.maximumf %120, %121 : vector<1x32xf32>
    %123 = vector.broadcast %122 : vector<1x32xf32> to vector<64x32xf32>
    %124 = arith.divf %113, %123 : vector<64x32xf32>
    %125 = arith.mulf %114, %114 : vector<64x32xf32>
    %cst_68 = arith.constant dense<0.000000e+00> : vector<32xf32>
    %126 = vector.multi_reduction <add>, %125, %cst_68 [0] : vector<64x32xf32> to vector<32xf32>
    %127 = vector.shape_cast %126 : vector<32xf32> to vector<1x32xf32>
    %128 = math.sqrt %127 : vector<1x32xf32>
    %cst_69 = arith.constant 9.99999996E-13 : f32
    %129 = vector.broadcast %cst_69 : f32 to vector<1x32xf32>
    %130 = arith.maximumf %128, %129 : vector<1x32xf32>
    %131 = vector.broadcast %130 : vector<1x32xf32> to vector<64x32xf32>
    %132 = arith.divf %114, %131 : vector<64x32xf32>
    %c0_70 = arith.constant 0 : index
    %c0_71 = arith.constant 0 : index
    %133 = vector.load %arg10[%c0_70, %c0_71] : memref<64x16xf32, #tpu.memory_space<vmem>>, vector<64x16xf32>
    %cst_72 = arith.constant dense<0.000000e+00> : vector<32x16xf32>
    %134 = tpu.matmul %114, %133, %cst_72 {dimension_numbers = #tpu.dot_dimension_numbers<[0], [0], [1], [1], [0, 1, 1, 1], [], []>} : vector<64x32xf32>, vector<64x16xf32>, vector<32x16xf32> -> vector<32x16xf32>
    %c0_73 = arith.constant 0 : index
    %c0_74 = arith.constant 0 : index
    %135 = vector.load %arg11[%c0_73, %c0_74] : memref<1x16xf32, #tpu.memory_space<vmem>>, vector<1x16xf32>
    %136 = vector.shape_cast %135 : vector<1x16xf32> to vector<16xf32>
    %137 = vector.shape_cast %136 : vector<16xf32> to vector<1x16xf32>
    %138 = vector.broadcast %137 : vector<1x16xf32> to vector<32x16xf32>
    %139 = arith.addf %134, %138 : vector<32x16xf32>
    %c0_75 = arith.constant 0 : index
    %c0_76 = arith.constant 0 : index
    %140 = vector.load %arg12[%c0_75, %c0_76] : memref<64x16xf32, #tpu.memory_space<vmem>>, vector<64x16xf32>
    %cst_77 = arith.constant dense<0.000000e+00> : vector<32x16xf32>
    %141 = tpu.matmul %116, %140, %cst_77 {dimension_numbers = #tpu.dot_dimension_numbers<[0], [0], [1], [1], [0, 1, 1, 1], [], []>} : vector<64x32xf32>, vector<64x16xf32>, vector<32x16xf32> -> vector<32x16xf32>
    %c0_78 = arith.constant 0 : index
    %c0_79 = arith.constant 0 : index
    %142 = vector.load %arg13[%c0_78, %c0_79] : memref<1x16xf32, #tpu.memory_space<vmem>>, vector<1x16xf32>
    %143 = vector.shape_cast %142 : vector<1x16xf32> to vector<16xf32>
    %144 = vector.shape_cast %143 : vector<16xf32> to vector<1x16xf32>
    %145 = vector.broadcast %144 : vector<1x16xf32> to vector<32x16xf32>
    %146 = arith.addf %141, %145 : vector<32x16xf32>
    %cst_80 = arith.constant dense<0.000000e+00> : vector<32x32xf32>
    %147 = tpu.matmul %124, %132, %cst_80 {dimension_numbers = #tpu.dot_dimension_numbers<[0], [0], [1], [1], [0, 1, 1, 1], [], []>} : vector<64x32xf32>, vector<64x32xf32>, vector<32x32xf32> -> vector<32x32xf32>
    %c0_81 = arith.constant 0 : index
    %c0_82 = arith.constant 0 : index
    %148 = vector.load %arg14[%c0_81, %c0_82] : memref<32x1xf32, #tpu.memory_space<vmem>>, vector<32x1xf32>
    %149 = vector.broadcast %148 : vector<32x1xf32> to vector<32x32xf32>
    %150 = arith.mulf %147, %149 : vector<32x32xf32>
    %c0_83 = arith.constant 0 : index
    %c0_84 = arith.constant 0 : index
    %151 = vector.load %arg20[%c0_83, %c0_84] : memref<32x32xf32, #tpu.memory_space<vmem>>, vector<32x32xf32>
    %cst_85 = arith.constant 5.000000e-01 : f32
    %152 = vector.broadcast %cst_85 : f32 to vector<32x32xf32>
    %153 = arith.cmpf ogt, %151, %152 : vector<32x32xf32>
    %cst_86 = arith.constant -1.000000e+30 : f32
    %154 = vector.broadcast %cst_86 : f32 to vector<32x32xf32>
    %155 = arith.select %153, %150, %154 : vector<32x32xi1>, vector<32x32xf32>
    %cst_87 = arith.constant dense<0xFF800000> : vector<32xf32>
    %156 = vector.multi_reduction <maximumf>, %155, %cst_87 [1] : vector<32x32xf32> to vector<32xf32>
    %157 = vector.shape_cast %156 : vector<32xf32> to vector<32x1xf32>
    %158 = vector.broadcast %157 : vector<32x1xf32> to vector<32x32xf32>
    %159 = arith.subf %155, %158 : vector<32x32xf32>
    %160 = math.exp %159 : vector<32x32xf32>
    %cst_88 = arith.constant dense<0.000000e+00> : vector<32xf32>
    %161 = vector.multi_reduction <add>, %160, %cst_88 [1] : vector<32x32xf32> to vector<32xf32>
    %162 = vector.shape_cast %161 : vector<32xf32> to vector<32x1xf32>
    %163 = vector.broadcast %162 : vector<32x1xf32> to vector<32x32xf32>
    %164 = arith.divf %160, %163 : vector<32x32xf32>
    %cst_89 = arith.constant dense<0.000000e+00> : vector<64x32xf32>
    %165 = tpu.matmul %115, %164, %cst_89 {dimension_numbers = #tpu.dot_dimension_numbers<[1], [1], [0], [0], [0, 0, 1, 0], [], []>} : vector<64x32xf32>, vector<32x32xf32>, vector<64x32xf32> -> vector<64x32xf32>
    %c0_90 = arith.constant 0 : index
    %c0_91 = arith.constant 0 : index
    %166 = vector.load %arg18[%c0_90, %c0_91] : memref<32x16xf32, #tpu.memory_space<vmem>>, vector<32x16xf32>
    %cst_92 = arith.constant dense<0.000000e+00> : vector<64x16xf32>
    %167 = tpu.matmul %165, %166, %cst_92 {dimension_numbers = #tpu.dot_dimension_numbers<[1], [0], [0], [1], [0, 0, 1, 1], [], []>} : vector<64x32xf32>, vector<32x16xf32>, vector<64x16xf32> -> vector<64x16xf32>
    %c0_93 = arith.constant 0 : index
    %c0_94 = arith.constant 0 : index
    %168 = vector.load %arg19[%c0_93, %c0_94] : memref<1x16xf32, #tpu.memory_space<vmem>>, vector<1x16xf32>
    %169 = vector.shape_cast %168 : vector<1x16xf32> to vector<16xf32>
    %170 = vector.shape_cast %169 : vector<16xf32> to vector<1x16xf32>
    %171 = vector.broadcast %170 : vector<1x16xf32> to vector<64x16xf32>
    %172 = arith.addf %167, %171 : vector<64x16xf32>
    %c0_95 = arith.constant 0 : index
    %c0_96 = arith.constant 0 : index
    %173 = vector.load %arg23[%c0_95, %c0_96] : memref<16x64xf32, #tpu.memory_space<vmem>>, vector<16x64xf32>
    %cst_97 = arith.constant dense<0.000000e+00> : vector<32x64xf32>
    %174 = tpu.matmul %139, %173, %cst_97 {dimension_numbers = #tpu.dot_dimension_numbers<[1], [0], [0], [1], [0, 0, 1, 1], [], []>} : vector<32x16xf32>, vector<16x64xf32>, vector<32x64xf32> -> vector<32x64xf32>
    %c0_98 = arith.constant 0 : index
    %c0_99 = arith.constant 0 : index
    %175 = vector.load %arg21[%c0_98, %c0_99] : memref<32x64xf32, #tpu.memory_space<vmem>>, vector<32x64xf32>
    %176 = arith.mulf %174, %175 : vector<32x64xf32>
    %cst_100 = arith.constant dense<0.000000e+00> : vector<64x64xf32>
    %177 = tpu.matmul %124, %176, %cst_100 {dimension_numbers = #tpu.dot_dimension_numbers<[1], [0], [0], [1], [0, 0, 1, 1], [], []>} : vector<64x32xf32>, vector<32x64xf32>, vector<64x64xf32> -> vector<64x64xf32>
    %c0_101 = arith.constant 0 : index
    %c0_102 = arith.constant 0 : index
    %178 = vector.load %arg15[%c0_101, %c0_102] : memref<1x64xf32, #tpu.memory_space<vmem>>, vector<1x64xf32>
    %179 = vector.broadcast %178 : vector<1x64xf32> to vector<64x64xf32>
    %180 = arith.mulf %177, %179 : vector<64x64xf32>
    %cst_103 = arith.constant dense<0xFF800000> : vector<64xf32>
    %181 = vector.multi_reduction <maximumf>, %180, %cst_103 [1] : vector<64x64xf32> to vector<64xf32>
    %182 = vector.shape_cast %181 : vector<64xf32> to vector<64x1xf32>
    %183 = vector.broadcast %182 : vector<64x1xf32> to vector<64x64xf32>
    %184 = arith.subf %180, %183 : vector<64x64xf32>
    %185 = math.exp %184 : vector<64x64xf32>
    %c0_104 = arith.constant 0 : index
    %c0_105 = arith.constant 0 : index
    %186 = vector.load %arg22[%c0_104, %c0_105] : memref<64x64xf32, #tpu.memory_space<vmem>>, vector<64x64xf32>
    %cst_106 = arith.constant dense<0.000000e+00> : vector<64x64xf32>
    %187 = tpu.matmul %185, %186, %cst_106 {dimension_numbers = #tpu.dot_dimension_numbers<[1], [0], [0], [1], [0, 0, 1, 1], [], []>} : vector<64x64xf32>, vector<64x64xf32>, vector<64x64xf32> -> vector<64x64xf32>
    %188 = arith.divf %185, %187 : vector<64x64xf32>
    %c0_107 = arith.constant 0 : index
    %c0_108 = arith.constant 0 : index
    %189 = vector.load %arg16[%c0_107, %c0_108] : memref<64x32xf32, #tpu.memory_space<vmem>>, vector<64x32xf32>
    %cst_109 = arith.constant dense<0.000000e+00> : vector<64x32xf32>
    %190 = tpu.matmul %188, %189, %cst_109 {dimension_numbers = #tpu.dot_dimension_numbers<[0], [0], [1], [1], [0, 1, 1, 1], [], []>} : vector<64x64xf32>, vector<64x32xf32>, vector<64x32xf32> -> vector<64x32xf32>
    %c0_110 = arith.constant 0 : index
    %c0_111 = arith.constant 0 : index
    %191 = vector.load %arg17[%c0_110, %c0_111] : memref<1x16xf32, #tpu.memory_space<vmem>>, vector<1x16xf32>
    %192 = vector.shape_cast %191 : vector<1x16xf32> to vector<16xf32>
    %193 = vector.shape_cast %172 : vector<64x16xf32> to vector<8x8x16xf32>
    %c0_112 = arith.constant 0 : index
    %c0_113 = arith.constant 0 : index
    %c0_114 = arith.constant 0 : index
    %c16 = arith.constant 16 : index
    %194 = vector.load %arg24[%c0_112, %c0_113, %c0_114, %c16] : memref<1x8x8x32xf32, #tpu.memory_space<vmem>>, vector<1x8x8x16xf32>
    %195 = vector.shape_cast %194 : vector<1x8x8x16xf32> to vector<8x8x16xf32>
    %196 = vector.shape_cast %193 : vector<8x8x16xf32> to vector<1x8x8x16xf32>
    tpu.vector_store %arg24[%c0_112, %c0_113, %c0_114, %c16], %196 {strides = array<i32>} : memref<1x8x8x32xf32, #tpu.memory_space<vmem>>, vector<1x8x8x16xf32>,
    %197 = vector.extract_strided_slice %146 {offsets = [0, 0], sizes = [8, 16], strides = [1, 1]} : vector<32x16xf32> to vector<8x16xf32>
    %198 = vector.extract_strided_slice %190 {offsets = [0, 0], sizes = [16, 32], strides = [1, 1]} : vector<64x32xf32> to vector<16x32xf32>
    %cst_115 = arith.constant dense<0.000000e+00> : vector<8x32xf32>
    %199 = tpu.matmul %197, %198, %cst_115 {dimension_numbers = #tpu.dot_dimension_numbers<[1], [0], [0], [1], [0, 0, 1, 1], [], []>} : vector<8x16xf32>, vector<16x32xf32>, vector<8x32xf32> -> vector<8x32xf32>
    %200 = vector.extract_strided_slice %199 {offsets = [0, 0], sizes = [8, 16], strides = [1, 1]} : vector<8x32xf32> to vector<8x16xf32>
    %201 = vector.shape_cast %192 : vector<16xf32> to vector<1x16xf32>
    %202 = vector.broadcast %201 : vector<1x16xf32> to vector<8x16xf32>
    %203 = arith.addf %200, %202 : vector<8x16xf32>
    %c0_116 = arith.constant 0 : index
    %c0_117 = arith.constant 0 : index
    %c0_118 = arith.constant 0 : index
    %c0_119 = arith.constant 0 : index
    %204 = vector.load %arg24[%c0_116, %c0_117, %c0_118, %c0_119] : memref<1x8x8x32xf32, #tpu.memory_space<vmem>>, vector<1x8x1x16xf32>
    %205 = vector.shape_cast %204 : vector<1x8x1x16xf32> to vector<8x16xf32>
    %206 = vector.shape_cast %203 : vector<8x16xf32> to vector<1x8x1x16xf32>
    tpu.vector_store %arg24[%c0_116, %c0_117, %c0_118, %c0_119], %206 {strides = array<i32>} : memref<1x8x8x32xf32, #tpu.memory_space<vmem>>, vector<1x8x1x16xf32>,
    %207 = vector.extract_strided_slice %199 {offsets = [0, 16], sizes = [8, 16], strides = [1, 1]} : vector<8x32xf32> to vector<8x16xf32>
    %208 = vector.shape_cast %192 : vector<16xf32> to vector<1x16xf32>
    %209 = vector.broadcast %208 : vector<1x16xf32> to vector<8x16xf32>
    %210 = arith.addf %207, %209 : vector<8x16xf32>
    %c0_120 = arith.constant 0 : index
    %c0_121 = arith.constant 0 : index
    %c1_122 = arith.constant 1 : index
    %c0_123 = arith.constant 0 : index
    %211 = vector.load %arg24[%c0_120, %c0_121, %c1_122, %c0_123] : memref<1x8x8x32xf32, #tpu.memory_space<vmem>>, vector<1x8x1x16xf32>
    %212 = vector.shape_cast %211 : vector<1x8x1x16xf32> to vector<8x16xf32>
    %213 = vector.shape_cast %210 : vector<8x16xf32> to vector<1x8x1x16xf32>
    tpu.vector_store %arg24[%c0_120, %c0_121, %c1_122, %c0_123], %213 {strides = array<i32>} : memref<1x8x8x32xf32, #tpu.memory_space<vmem>>, vector<1x8x1x16xf32>,
    %214 = vector.extract_strided_slice %146 {offsets = [8, 0], sizes = [8, 16], strides = [1, 1]} : vector<32x16xf32> to vector<8x16xf32>
    %215 = vector.extract_strided_slice %190 {offsets = [16, 0], sizes = [16, 32], strides = [1, 1]} : vector<64x32xf32> to vector<16x32xf32>
    %cst_124 = arith.constant dense<0.000000e+00> : vector<8x32xf32>
    %216 = tpu.matmul %214, %215, %cst_124 {dimension_numbers = #tpu.dot_dimension_numbers<[1], [0], [0], [1], [0, 0, 1, 1], [], []>} : vector<8x16xf32>, vector<16x32xf32>, vector<8x32xf32> -> vector<8x32xf32>
    %217 = vector.extract_strided_slice %216 {offsets = [0, 0], sizes = [8, 16], strides = [1, 1]} : vector<8x32xf32> to vector<8x16xf32>
    %218 = vector.shape_cast %192 : vector<16xf32> to vector<1x16xf32>
    %219 = vector.broadcast %218 : vector<1x16xf32> to vector<8x16xf32>
    %220 = arith.addf %217, %219 : vector<8x16xf32>
    %c0_125 = arith.constant 0 : index
    %c0_126 = arith.constant 0 : index
    %c2_127 = arith.constant 2 : index
    %c0_128 = arith.constant 0 : index
    %221 = vector.load %arg24[%c0_125, %c0_126, %c2_127, %c0_128] : memref<1x8x8x32xf32, #tpu.memory_space<vmem>>, vector<1x8x1x16xf32>
    %222 = vector.shape_cast %221 : vector<1x8x1x16xf32> to vector<8x16xf32>
    %223 = vector.shape_cast %220 : vector<8x16xf32> to vector<1x8x1x16xf32>
    tpu.vector_store %arg24[%c0_125, %c0_126, %c2_127, %c0_128], %223 {strides = array<i32>} : memref<1x8x8x32xf32, #tpu.memory_space<vmem>>, vector<1x8x1x16xf32>,
    %224 = vector.extract_strided_slice %216 {offsets = [0, 16], sizes = [8, 16], strides = [1, 1]} : vector<8x32xf32> to vector<8x16xf32>
    %225 = vector.shape_cast %192 : vector<16xf32> to vector<1x16xf32>
    %226 = vector.broadcast %225 : vector<1x16xf32> to vector<8x16xf32>
    %227 = arith.addf %224, %226 : vector<8x16xf32>
    %c0_129 = arith.constant 0 : index
    %c0_130 = arith.constant 0 : index
    %c3_131 = arith.constant 3 : index
    %c0_132 = arith.constant 0 : index
    %228 = vector.load %arg24[%c0_129, %c0_130, %c3_131, %c0_132] : memref<1x8x8x32xf32, #tpu.memory_space<vmem>>, vector<1x8x1x16xf32>
    %229 = vector.shape_cast %228 : vector<1x8x1x16xf32> to vector<8x16xf32>
    %230 = vector.shape_cast %227 : vector<8x16xf32> to vector<1x8x1x16xf32>
    tpu.vector_store %arg24[%c0_129, %c0_130, %c3_131, %c0_132], %230 {strides = array<i32>} : memref<1x8x8x32xf32, #tpu.memory_space<vmem>>, vector<1x8x1x16xf32>,
    %231 = vector.extract_strided_slice %146 {offsets = [16, 0], sizes = [8, 16], strides = [1, 1]} : vector<32x16xf32> to vector<8x16xf32>
    %232 = vector.extract_strided_slice %190 {offsets = [32, 0], sizes = [16, 32], strides = [1, 1]} : vector<64x32xf32> to vector<16x32xf32>
    %cst_133 = arith.constant dense<0.000000e+00> : vector<8x32xf32>
    %233 = tpu.matmul %231, %232, %cst_133 {dimension_numbers = #tpu.dot_dimension_numbers<[1], [0], [0], [1], [0, 0, 1, 1], [], []>} : vector<8x16xf32>, vector<16x32xf32>, vector<8x32xf32> -> vector<8x32xf32>
    %234 = vector.extract_strided_slice %233 {offsets = [0, 0], sizes = [8, 16], strides = [1, 1]} : vector<8x32xf32> to vector<8x16xf32>
    %235 = vector.shape_cast %192 : vector<16xf32> to vector<1x16xf32>
    %236 = vector.broadcast %235 : vector<1x16xf32> to vector<8x16xf32>
    %237 = arith.addf %234, %236 : vector<8x16xf32>
    %c0_134 = arith.constant 0 : index
    %c0_135 = arith.constant 0 : index
    %c4_136 = arith.constant 4 : index
    %c0_137 = arith.constant 0 : index
    %238 = vector.load %arg24[%c0_134, %c0_135, %c4_136, %c0_137] : memref<1x8x8x32xf32, #tpu.memory_space<vmem>>, vector<1x8x1x16xf32>
    %239 = vector.shape_cast %238 : vector<1x8x1x16xf32> to vector<8x16xf32>
    %240 = vector.shape_cast %237 : vector<8x16xf32> to vector<1x8x1x16xf32>
    tpu.vector_store %arg24[%c0_134, %c0_135, %c4_136, %c0_137], %240 {strides = array<i32>} : memref<1x8x8x32xf32, #tpu.memory_space<vmem>>, vector<1x8x1x16xf32>,
    %241 = vector.extract_strided_slice %233 {offsets = [0, 16], sizes = [8, 16], strides = [1, 1]} : vector<8x32xf32> to vector<8x16xf32>
    %242 = vector.shape_cast %192 : vector<16xf32> to vector<1x16xf32>
    %243 = vector.broadcast %242 : vector<1x16xf32> to vector<8x16xf32>
    %244 = arith.addf %241, %243 : vector<8x16xf32>
    %c0_138 = arith.constant 0 : index
    %c0_139 = arith.constant 0 : index
    %c5_140 = arith.constant 5 : index
    %c0_141 = arith.constant 0 : index
    %245 = vector.load %arg24[%c0_138, %c0_139, %c5_140, %c0_141] : memref<1x8x8x32xf32, #tpu.memory_space<vmem>>, vector<1x8x1x16xf32>
    %246 = vector.shape_cast %245 : vector<1x8x1x16xf32> to vector<8x16xf32>
    %247 = vector.shape_cast %244 : vector<8x16xf32> to vector<1x8x1x16xf32>
    tpu.vector_store %arg24[%c0_138, %c0_139, %c5_140, %c0_141], %247 {strides = array<i32>} : memref<1x8x8x32xf32, #tpu.memory_space<vmem>>, vector<1x8x1x16xf32>,
    %248 = vector.extract_strided_slice %146 {offsets = [24, 0], sizes = [8, 16], strides = [1, 1]} : vector<32x16xf32> to vector<8x16xf32>
    %249 = vector.extract_strided_slice %190 {offsets = [48, 0], sizes = [16, 32], strides = [1, 1]} : vector<64x32xf32> to vector<16x32xf32>
    %cst_142 = arith.constant dense<0.000000e+00> : vector<8x32xf32>
    %250 = tpu.matmul %248, %249, %cst_142 {dimension_numbers = #tpu.dot_dimension_numbers<[1], [0], [0], [1], [0, 0, 1, 1], [], []>} : vector<8x16xf32>, vector<16x32xf32>, vector<8x32xf32> -> vector<8x32xf32>
    %251 = vector.extract_strided_slice %250 {offsets = [0, 0], sizes = [8, 16], strides = [1, 1]} : vector<8x32xf32> to vector<8x16xf32>
    %252 = vector.shape_cast %192 : vector<16xf32> to vector<1x16xf32>
    %253 = vector.broadcast %252 : vector<1x16xf32> to vector<8x16xf32>
    %254 = arith.addf %251, %253 : vector<8x16xf32>
    %c0_143 = arith.constant 0 : index
    %c0_144 = arith.constant 0 : index
    %c6_145 = arith.constant 6 : index
    %c0_146 = arith.constant 0 : index
    %255 = vector.load %arg24[%c0_143, %c0_144, %c6_145, %c0_146] : memref<1x8x8x32xf32, #tpu.memory_space<vmem>>, vector<1x8x1x16xf32>
    %256 = vector.shape_cast %255 : vector<1x8x1x16xf32> to vector<8x16xf32>
    %257 = vector.shape_cast %254 : vector<8x16xf32> to vector<1x8x1x16xf32>
    tpu.vector_store %arg24[%c0_143, %c0_144, %c6_145, %c0_146], %257 {strides = array<i32>} : memref<1x8x8x32xf32, #tpu.memory_space<vmem>>, vector<1x8x1x16xf32>,
    %258 = vector.extract_strided_slice %250 {offsets = [0, 16], sizes = [8, 16], strides = [1, 1]} : vector<8x32xf32> to vector<8x16xf32>
    %259 = vector.shape_cast %192 : vector<16xf32> to vector<1x16xf32>
    %260 = vector.broadcast %259 : vector<1x16xf32> to vector<8x16xf32>
    %261 = arith.addf %258, %260 : vector<8x16xf32>
    %c0_147 = arith.constant 0 : index
    %c0_148 = arith.constant 0 : index
    %c7_149 = arith.constant 7 : index
    %c0_150 = arith.constant 0 : index
    %262 = vector.load %arg24[%c0_147, %c0_148, %c7_149, %c0_150] : memref<1x8x8x32xf32, #tpu.memory_space<vmem>>, vector<1x8x1x16xf32>
    %263 = vector.shape_cast %262 : vector<1x8x1x16xf32> to vector<8x16xf32>
    %264 = vector.shape_cast %261 : vector<8x16xf32> to vector<1x8x1x16xf32>
    tpu.vector_store %arg24[%c0_147, %c0_148, %c7_149, %c0_150], %264 {strides = array<i32>} : memref<1x8x8x32xf32, #tpu.memory_space<vmem>>, vector<1x8x1x16xf32>,
    %c0_151 = arith.constant 0 : index
    %c0_152 = arith.constant 0 : index
    %c0_153 = arith.constant 0 : index
    %c0_154 = arith.constant 0 : index
    %265 = vector.load %arg24[%c0_151, %c0_152, %c0_153, %c0_154] : memref<1x8x8x32xf32, #tpu.memory_space<vmem>>, vector<1x8x8x32xf32>
    %266 = vector.shape_cast %265 : vector<1x8x8x32xf32> to vector<8x8x32xf32>
    %267 = vector.shape_cast %110 : vector<64x32xf32> to vector<8x8x32xf32>
    %268 = arith.addf %266, %267 : vector<8x8x32xf32>
    %c0_155 = arith.constant 0 : index
    %c0_156 = arith.constant 0 : index
    %c0_157 = arith.constant 0 : index
    %c0_158 = arith.constant 0 : index
    %269 = vector.load %arg24[%c0_155, %c0_156, %c0_157, %c0_158] : memref<1x8x8x32xf32, #tpu.memory_space<vmem>>, vector<1x8x8x32xf32>
    %270 = vector.shape_cast %269 : vector<1x8x8x32xf32> to vector<8x8x32xf32>
    %271 = vector.shape_cast %268 : vector<8x8x32xf32> to vector<1x8x8x32xf32>
    tpu.vector_store %arg24[%c0_155, %c0_156, %c0_157, %c0_158], %271 {strides = array<i32>} : memref<1x8x8x32xf32, #tpu.memory_space<vmem>>, vector<1x8x8x32xf32>,
    return
  }
  func.func @transform_0(%arg0: i32) -> (i32, i32, i32) {
    %c0_i32 = arith.constant 0 : i32
    %c0_i32_0 = arith.constant 0 : i32
    %c0_i32_1 = arith.constant 0 : i32
    return %arg0, %c0_i32, %c0_i32_0 : i32, i32, i32
  }
  func.func @transform_1(%arg0: i32) -> (i32, i32) {
    %c0_i32 = arith.constant 0 : i32
    %c0_i32_0 = arith.constant 0 : i32
    %c0_i32_1 = arith.constant 0 : i32
    return %c0_i32, %c0_i32_0 : i32, i32
  }
  func.func @transform_2(%arg0: i32) -> (i32, i32) {
    %c0_i32 = arith.constant 0 : i32
    %c0_i32_0 = arith.constant 0 : i32
    %c0_i32_1 = arith.constant 0 : i32
    return %c0_i32, %c0_i32_0 : i32, i32
  }
  func.func @transform_3(%arg0: i32) -> (i32, i32) {
    %c0_i32 = arith.constant 0 : i32
    %c0_i32_0 = arith.constant 0 : i32
    %c0_i32_1 = arith.constant 0 : i32
    return %c0_i32, %c0_i32_0 : i32, i32
  }
  func.func @transform_4(%arg0: i32) -> (i32, i32) {
    %c0_i32 = arith.constant 0 : i32
    %c0_i32_0 = arith.constant 0 : i32
    %c0_i32_1 = arith.constant 0 : i32
    return %c0_i32, %c0_i32_0 : i32, i32
  }
  func.func @transform_5(%arg0: i32) -> (i32, i32) {
    %c0_i32 = arith.constant 0 : i32
    %c0_i32_0 = arith.constant 0 : i32
    %c0_i32_1 = arith.constant 0 : i32
    return %c0_i32, %c0_i32_0 : i32, i32
  }
  func.func @transform_6(%arg0: i32) -> (i32, i32) {
    %c0_i32 = arith.constant 0 : i32
    %c0_i32_0 = arith.constant 0 : i32
    %c0_i32_1 = arith.constant 0 : i32
    return %c0_i32, %c0_i32_0 : i32, i32
  }
  func.func @transform_7(%arg0: i32) -> (i32, i32, i32) {
    %c0_i32 = arith.constant 0 : i32
    %c0_i32_0 = arith.constant 0 : i32
    %c0_i32_1 = arith.constant 0 : i32
    %c0_i32_2 = arith.constant 0 : i32
    return %c0_i32, %c0_i32_0, %c0_i32_1 : i32, i32, i32
  }
  func.func @transform_8(%arg0: i32) -> (i32, i32) {
    %c0_i32 = arith.constant 0 : i32
    %c0_i32_0 = arith.constant 0 : i32
    %c0_i32_1 = arith.constant 0 : i32
    return %c0_i32, %c0_i32_0 : i32, i32
  }
  func.func @transform_9(%arg0: i32) -> (i32, i32) {
    %c0_i32 = arith.constant 0 : i32
    %c0_i32_0 = arith.constant 0 : i32
    %c0_i32_1 = arith.constant 0 : i32
    return %c0_i32, %c0_i32_0 : i32, i32
  }
  func.func @transform_10(%arg0: i32) -> (i32, i32) {
    %c0_i32 = arith.constant 0 : i32
    %c0_i32_0 = arith.constant 0 : i32
    %c0_i32_1 = arith.constant 0 : i32
    return %c0_i32, %c0_i32_0 : i32, i32
  }
  func.func @transform_11(%arg0: i32) -> (i32, i32) {
    %c0_i32 = arith.constant 0 : i32
    %c0_i32_0 = arith.constant 0 : i32
    %c0_i32_1 = arith.constant 0 : i32
    return %c0_i32, %c0_i32_0 : i32, i32
  }
  func.func @transform_12(%arg0: i32) -> (i32, i32) {
    %c0_i32 = arith.constant 0 : i32
    %c0_i32_0 = arith.constant 0 : i32
    %c0_i32_1 = arith.constant 0 : i32
    return %c0_i32, %c0_i32_0 : i32, i32
  }
  func.func @transform_13(%arg0: i32) -> (i32, i32) {
    %c0_i32 = arith.constant 0 : i32
    %c0_i32_0 = arith.constant 0 : i32
    %c0_i32_1 = arith.constant 0 : i32
    return %c0_i32, %c0_i32_0 : i32, i32
  }
  func.func @transform_14(%arg0: i32) -> (i32, i32) {
    %c0_i32 = arith.constant 0 : i32
    %c0_i32_0 = arith.constant 0 : i32
    %c0_i32_1 = arith.constant 0 : i32
    return %c0_i32, %c0_i32_0 : i32, i32
  }
  func.func @transform_15(%arg0: i32) -> (i32, i32) {
    %c0_i32 = arith.constant 0 : i32
    %c0_i32_0 = arith.constant 0 : i32
    %c0_i32_1 = arith.constant 0 : i32
    return %c0_i32, %c0_i32_0 : i32, i32
  }
  func.func @transform_16(%arg0: i32) -> (i32, i32) {
    %c0_i32 = arith.constant 0 : i32
    %c0_i32_0 = arith.constant 0 : i32
    %c0_i32_1 = arith.constant 0 : i32
    return %c0_i32, %c0_i32_0 : i32, i32
  }
  func.func @transform_17(%arg0: i32) -> (i32, i32) {
    %c0_i32 = arith.constant 0 : i32
    %c0_i32_0 = arith.constant 0 : i32
    %c0_i32_1 = arith.constant 0 : i32
    return %c0_i32, %c0_i32_0 : i32, i32
  }
  func.func @transform_18(%arg0: i32) -> (i32, i32) {
    %c0_i32 = arith.constant 0 : i32
    %c0_i32_0 = arith.constant 0 : i32
    %c0_i32_1 = arith.constant 0 : i32
    return %c0_i32, %c0_i32_0 : i32, i32
  }
  func.func @transform_19(%arg0: i32) -> (i32, i32) {
    %c0_i32 = arith.constant 0 : i32
    %c0_i32_0 = arith.constant 0 : i32
    %c0_i32_1 = arith.constant 0 : i32
    return %c0_i32, %c0_i32_0 : i32, i32
  }
  func.func @transform_20(%arg0: i32) -> (i32, i32) {
    %c0_i32 = arith.constant 0 : i32
    %c0_i32_0 = arith.constant 0 : i32
    %c0_i32_1 = arith.constant 0 : i32
    return %c0_i32, %c0_i32_0 : i32, i32
  }
  func.func @transform_21(%arg0: i32) -> (i32, i32) {
    %c0_i32 = arith.constant 0 : i32
    %c0_i32_0 = arith.constant 0 : i32
    %c0_i32_1 = arith.constant 0 : i32
    return %c0_i32, %c0_i32_0 : i32, i32
  }
  func.func @transform_22(%arg0: i32) -> (i32, i32) {
    %c0_i32 = arith.constant 0 : i32
    %c0_i32_0 = arith.constant 0 : i32
    %c0_i32_1 = arith.constant 0 : i32
    return %c0_i32, %c0_i32_0 : i32, i32
  }
  func.func @transform_23(%arg0: i32) -> (i32, i32, i32, i32) {
    %c0_i32 = arith.constant 0 : i32
    %c0_i32_0 = arith.constant 0 : i32
    %c0_i32_1 = arith.constant 0 : i32
    %c0_i32_2 = arith.constant 0 : i32
    return %arg0, %c0_i32, %c0_i32_0, %c0_i32_1 : i32, i32, i32, i32
  }
}

</mosaic_0001>

<bundles_post_ra>
// kernel: dsfe_forward.1
= control target key start
LH: loop header
LB: loop body
LE: loop exit
PB: predicated region body
PF: predicated region fallthrough
CT: control target
= control target key end

     0   :  { %s8473_s0 = inlined_call_operand.vmem [shape: f32[2,64,32], index: 0, kind: input, shape index: {}]   ;;  %s8474_s1 = inlined_call_operand.vmem [shape: f32[32,128], index: 1, kind: input, shape index: {}]   ;;  %s8475_s2 = inlined_call_operand.vmem [shape: f32[1,128], index: 2, kind: input, shape index: {}]   ;;  %s8476_s3 = inlined_call_operand.vmem [shape: f32[9,128], index: 3, kind: input, shape index: {}]   ;;  %s8477_s4 = inlined_call_operand.vmem [shape: f32[1,128], index: 4, kind: input, shape index: {}]   ;;  %s8478_s5 = inlined_call_operand.vmem [shape: f32[128,32], index: 5, kind: input, shape index: {}]   ;;  %s8479_s6 = inlined_call_operand.vmem [shape: f32[1,32], index: 6, kind: input, shape index: {}]   ;;  %s8480_s7 = inlined_call_operand.vmem [shape: f32[9,64,64], index: 7, kind: input, shape index: {}]   ;;  %s8481_s8 = inlined_call_operand.vmem [shape: f32[32,128], index: 8, kind: input, shape index: {}]   ;;  %s8482_s9 = inlined_call_operand.vmem [shape: f32[64,16], index: 9, kind: input, shape index: {}]   ;;  %s8483_s10 = inlined_call_operand.vmem [shape: f32[1,16], index: 10, kind: input, shape index: {}]   ;;  %s8484_s11 = inlined_call_operand.vmem [shape: f32[64,16], index: 11, kind: input, shape index: {}]   ;;  %s8485_s12 = inlined_call_operand.vmem [shape: f32[1,16], index: 12, kind: input, shape index: {}]   ;;  %s8486_s13 = inlined_call_operand.vmem [shape: f32[32,1], index: 13, kind: input, shape index: {}]   ;;  %s8487_s14 = inlined_call_operand.vmem [shape: f32[1,64], index: 14, kind: input, shape index: {}]   ;;  %s8488_s15 = inlined_call_operand.vmem [shape: f32[64,32], index: 15, kind: input, shape index: {}]   ;;  %s8489_s16 = inlined_call_operand.vmem [shape: f32[1,16], index: 16, kind: input, shape index: {}]   ;;  %s8490_s17 = inlined_call_operand.vmem [shape: f32[32,16], index: 17, kind: input, shape index: {}]   ;;  %s8491_s18 = inlined_call_operand.vmem [shape: f32[1,16], index: 18, kind: input, shape index: {}]   ;;  %s8492_s19 = inlined_call_operand.vmem [shape: f32[32,32], index: 19, kind: input, shape index: {}]   ;;  %s8493_s20 = inlined_call_operand.vmem [shape: f32[32,64], index: 20, kind: input, shape index: {}]   ;;  %s8494_s21 = inlined_call_operand.vmem [shape: f32[64,64], index: 21, kind: input, shape index: {}]   ;;  %s8495_s22 = inlined_call_operand.vmem [shape: f32[16,64], index: 22, kind: input, shape index: {}]   ;;  %s8496_s23 = inlined_call_operand.vmem [shape: f32[2,8,8,32], index: 23, kind: output, shape index: {}]  }
   0x1   :  { %8503 = sst [smem:[#allocation2_spill]] %s8473_s0 }
   0x2   :  { %8504 = sst [smem:[#allocation3_spill]] %s8474_s1 }
   0x3   :  { %8505 = sst [smem:[#allocation4_spill]] %s8475_s2 }
   0x4   :  { %8506 = sst [smem:[#allocation5_spill]] %s8476_s3 }
   0x5   :  { %8507 = sst [smem:[#allocation6_spill]] %s8477_s4  ;;  %s7001_s4 = smov 0  }
   0x6   :  { %8508 = sst [smem:[#allocation7_spill]] %s8478_s5 }
   0x7   :  { %8509 = sst [smem:[#allocation8_spill]] %s8479_s6 }
   0x8   :  { %8510 = sst [smem:[#allocation9_spill]] %s8480_s7 }
   0x9 LB: > { %s5319_s30 = sadd.s32 4294967295, %s6869_s4   ;;  %p5323_p0 = scmp.ge.s32.totalorder %s6869_s4, 1  ;;  %s6869_s4 = sphi %s7001_s4, %s33_s4  }
   0xa   : > { %p637_p1 = scmp.lt.s32.totalorder %s6869_s4, 3 }
   0xc   : > { %p638_p2 = pnand %p5323_p0, %p637_p1 }
   0xd   : > { %s8511_s5 = sld [smem:[#allocation3_spill]] (!%p638_p2)  ;;  %p701_p3 = scmp.lt.s32.totalorder (!%p638_p2), %s5319_s30, 1  ;;  %vm730_vm0 = vcmask (!%p638_p2), 261120   ;;  %vm868_vm1 = vcmask (!%p638_p2), 523264   ;;  %vm2629_vm2 = vcmask (!%p638_p2), 523520   ;;  %vm3548_vm12 = vcmask (!%p638_p2), 130048  }
   0xe   : > { %641 = sbr.rel (%p638_p2) target bundleno = 3017 (0xbc9), region = 112  ;;  %s8512_s0 = sld [smem:[#allocation2_spill]] (!%p638_p2)  ;;  %vm7824_vm11 = vmpackc.low (!%p638_p2), %vm730_vm0, %vm730_vm0  ;;  %vm4201_vm13 = vcmask (!%p638_p2), 261248   ;;  %vm6877_vm14 = vmmov (!%p638_p2), 0   ;;  %vm4348_vm15 = vcmask (!%p638_p2), 122880  }
   0xf   : > { %s8513_s26 = sld [smem:[#allocation9_spill]] (!%p638_p2)  ;;  %s8514_s29 = sld [smem:[#allocation4_spill]] (!%p638_p2) }
  0x10   : > { %s8515_s3 = sld [smem:[#allocation7_spill]] (!%p638_p2)  ;;  %s8516_s6 = sld [smem:[#allocation5_spill]] (!%p638_p2) }
  0x11   : > { %s6873_s2 = smov (!%p638_p2), 32   ;;  %s6875_s1 = smov (!%p638_p2), 16  }
  0x13   : > { %v719_v0 = vld [vmem:[%s8511_s5] sm:$0xff] (!%p638_p2)  ;;  %v720_v1 = vld [vmem:[%s8511_s5 + $0x8] sm:$0xff] (!%p638_p2)  ;;  %v721_v2 = vld [vmem:[%s8511_s5 + $0x10] sm:$0xff] (!%p638_p2) }
  0x14   : > { %v6435_v3 = vpack.c.bf16 (!%p638_p2), %v720_v1, %v719_v0  ;;  %v722_v4 = vld [vmem:[%s8511_s5 + $0x18] sm:$0xff] (!%p638_p2) }
  0x15   : > { %v6439_v5 = vpack.c.bf16 %v722_v4, %v721_v2  ;;  %s8523_s30 = smov (!%p701_p3, %s5319_s30), 1  ;;  %v860_v14 = vld [vmem:[%s8513_s26] sm:$0xff]  ;;  %v861_v37 = vld [vmem:[%s8513_s26 + $0x8] sm:$0xff]  ;;  %v862_v39 = vld [vmem:[%s8513_s26 + $0x10] sm:$0xff] }
  0x16   : > { %6436 = vmatprep.subr.bf16.mxu0 %v6435_v3  ;;  %s8501_s28 = sshll.u32 %s8523_s30, 6  ;;  %v5346_v15 = vld [vmem:[%s8513_s26 + $0x40] sm:$0xff]  ;;  %5915 = vmatprep.mubr.msk.f32.mxu1 %vm868_vm1, %v860_v14  ;;  %v5347_v38 = vld [vmem:[%s8513_s26 + $0x48] sm:$0xff]  ;;  %v5348_v40 = vld [vmem:[%s8513_s26 + $0x50] sm:$0xff] }
  0x17   : > { %6438 = vmatpush3.bf16.msra.mxu0 %v6435_v3  ;;  %s705_s24 = scalar_lea.vmem %s8512_s0, %s8501_s28  ;;  %v5328_v16 = vld [vmem:[%s8514_s29] ss:$0 sm:$0xff]  ;;  %v863_v41 = vld [vmem:[%s8513_s26 + $0x18] sm:$0xff]  ;;  %v865_v45 = vld [vmem:[%s8513_s26 + $0x28] sm:$0xff]  ;;  %s8517_s29 = sld [smem:[#allocation6_spill]] }
  0x18   : > { %6440 = vmatprep.subr.bf16.mxu0 %v6439_v5  ;;  %v7029_v6 = vld [vmem:[%s705_s24] sm:$0xff]  ;;  %v7033_v7 = vld [vmem:[%s705_s24 + $0x8] sm:$0xff]  ;;  %v7035_v8 = vld [vmem:[%s705_s24 + $0x10] sm:$0xff]  ;;  %s6871_s0 = smov 96  }
  0x19   : > { %5887 = vmatprep.mubr.msk.f32.mxu0 %vm730_vm0, %v7029_v6  ;;  %v7041_v9 = vld [vmem:[%s705_s24 + $0x18] sm:$0xff]  ;;  %v7043_v10 = vld [vmem:[%s705_s24 + $0x20] sm:$0xff]  ;;  %v7049_v11 = vld [vmem:[%s705_s24 + $0x28] sm:$0xff] }
  0x1a   : > { %v7051_v12 = vld [vmem:[%s705_s24 + $0x30] sm:$0xff]  ;;  %v7057_v13 = vld [vmem:[%s705_s24 + $0x38] sm:$0xff]  ;;  %v864_v43 = vld [vmem:[%s8513_s26 + $0x20] sm:$0xff] }
  0x1b   : > { %6442 = vmatpush3.bf16.msra.mxu0 %v6439_v5  ;;  %v5349_v42 = vld [vmem:[%s8513_s26 + $0x58] sm:$0xff]  ;;  %v5350_v44 = vld [vmem:[%s8513_s26 + $0x60] sm:$0xff]  ;;  %v5351_v46 = vld [vmem:[%s8513_s26 + $0x68] sm:$0xff] }
  0x1c   : > { %v866_v47 = vld [vmem:[%s8513_s26 + $0x30] sm:$0xff]  ;;  %v867_v49 = vld [vmem:[%s8513_s26 + $0x38] sm:$0xff]  ;;  %v5363_v51 = vld [vmem:[%s8513_s26 + $0x80] sm:$0xff] }
  0x1d   : > { %v5352_v48 = vld [vmem:[%s8513_s26 + $0x70] sm:$0xff]  ;;  %v5353_v50 = vld [vmem:[%s8513_s26 + $0x78] sm:$0xff]  ;;  %v5380_v52 = vld [vmem:[%s8513_s26 + $0xc0] sm:$0xff] }
  0x1e   : > { %5888 = vmatmul.mubr.msk.f32.vlgmr.msra.gmra.mrb[0].mxu0 %vm730_vm0, %v7033_v7  ;;  %v5364_v53 = vld [vmem:[%s8513_s26 + $0x88] sm:$0xff]  ;;  %v5365_v55 = vld [vmem:[%s8513_s26 + $0x90] sm:$0xff]  ;;  %v5366_v57 = vld [vmem:[%s8513_s26 + $0x98] sm:$0xff] }
  0x1f   : > { %5890 = vmatprep.mubr.msk.f32.mxu0 %vm730_vm0, %v7035_v8  ;;  %v5381_v54 = vld [vmem:[%s8513_s26 + $0xc8] sm:$0xff]  ;;  %v5382_v56 = vld [vmem:[%s8513_s26 + $0xd0] sm:$0xff]  ;;  %v5383_v58 = vld [vmem:[%s8513_s26 + $0xd8] sm:$0xff] }
  0x20   : > { %v5367_v59 = vld [vmem:[%s8513_s26 + $0xa0] sm:$0xff]  ;;  %v5368_v61 = vld [vmem:[%s8513_s26 + $0xa8] sm:$0xff]  ;;  %v5369_v63 = vld [vmem:[%s8513_s26 + $0xb0] sm:$0xff] }
  0x21   : > { %v5384_v60 = vld [vmem:[%s8513_s26 + $0xe0] sm:$0xff]  ;;  %v5385_v62 = vld [vmem:[%s8513_s26 + $0xe8] sm:$0xff]  ;;  %v5386_v0 = vld [vmem:[%s8513_s26 + $0xf0] sm:$0xff] }
  0x22   : > { %5891 = vmatmul.mubr.msk.f32.gmra.mrb[2].mxu0 %vm730_vm0, %v7041_v9  ;;  %v5370_v1 = vld [vmem:[%s8513_s26 + $0xb8] sm:$0xff]  ;;  %v5397_v3 = vld [vmem:[%s8513_s26 + $0x100] sm:$0xff]  ;;  %v5398_v5 = vld [vmem:[%s8513_s26 + $0x108] sm:$0xff] }
  0x23   : > { %5893 = vmatprep.mubr.msk.f32.mxu0 %vm730_vm0, %v7043_v10  ;;  %v5387_v2 = vld [vmem:[%s8513_s26 + $0xf8] sm:$0xff]  ;;  %v5414_v4 = vld [vmem:[%s8513_s26 + $0x140] sm:$0xff]  ;;  %v5415_v14 = vld [vmem:[%s8513_s26 + $0x148] sm:$0xff] }
  0x26   : > { %5894 = vmatmul.mubr.msk.f32.gmra.mrb[4].mxu0 %vm730_vm0, %v7049_v11 }
  0x27   : > { %5896 = vmatprep.mubr.msk.f32.mxu0 %vm730_vm0, %v7051_v12 }
  0x2a   : > { %5897 = vmatmul.mubr.msk.f32.gmra.mrb[6].mxu0 %vm730_vm0, %v7057_v13 }
  0x2b   : > { %5943 = vmatprep.mubr.msk.f32.mxu0 %vm868_vm1, %v5346_v15  ;;  %v5399_v15 = vld [vmem:[%s8513_s26 + $0x110] sm:$0xff] }
  0xf1   : > { %v5889_v17 = vpop.f32.mrb[0].mxu0 }
  0xf2   : > { %v827_v18 = vadd.f32 %v5889_v17, %v5328_v16  ;;  %v821_v19 = vpop.f32.mrb[1].mxu0  ;;  %v5400_v17 = vld [vmem:[%s8513_s26 + $0x118] sm:$0xff] }
  0xf3   : > { %v822_v20 = vadd.f32 %v5328_v16, %v821_v19  ;;  %v5401_v19 = vld [vmem:[%s8513_s26 + $0x120] sm:$0xff] }
  0xf5   : > { %v7072_v21 = vpack.c.bf16 %v827_v18, %v822_v20  ;;  %v5892_v22 = vpop.f32.mrb[2].mxu0  ;;  %v5417_v18 = vld [vmem:[%s8513_s26 + $0x158] sm:$0xff]  ;;  %v5418_v20 = vld [vmem:[%s8513_s26 + $0x160] sm:$0xff] }
  0xf6   : > { %v837_v23 = vadd.f32 %v5892_v22, %v5328_v16  ;;  %v831_v24 = vpop.f32.mrb[3].mxu0  ;;  %v5402_v22 = vld [vmem:[%s8513_s26 + $0x128] sm:$0xff] }
  0xf7   : > { %v832_v25 = vadd.f32 %v5328_v16, %v831_v24  ;;  %6444 = vmatprep.subr.bf16.mxu1 %v7072_v21  ;;  %6460 = vmatprep.subr.bf16.mxu0 %v7072_v21  ;;  %v5403_v24 = vld [vmem:[%s8513_s26 + $0x130] sm:$0xff] }
  0xf8   : > { %6446 = vmatpush3.bf16.msra.mxu1 %v7072_v21  ;;  %6462 = vmatpush3.bf16.msra.mxu0 %v7072_v21 }
  0xf9   : > { %v7078_v26 = vpack.c.bf16 %v837_v23, %v832_v25  ;;  %v5895_v27 = vpop.f32.mrb[4].mxu0  ;;  %v5419_v23 = vld [vmem:[%s8513_s26 + $0x168] sm:$0xff]  ;;  %v5420_v25 = vld [vmem:[%s8513_s26 + $0x170] sm:$0xff] }
  0xfa   : > { %v847_v28 = vadd.f32 %v5895_v27, %v5328_v16  ;;  %v841_v29 = vpop.f32.mrb[5].mxu0  ;;  %v5404_v27 = vld [vmem:[%s8513_s26 + $0x138] sm:$0xff] }
  0xfb   : > { %v842_v30 = vadd.f32 %v5328_v16, %v841_v29  ;;  %6448 = vmatprep.subr.bf16.mxu1 %v7078_v26  ;;  %6464 = vmatprep.subr.bf16.mxu0 %v7078_v26  ;;  %v5431_v29 = vld [vmem:[%s8513_s26 + $0x180] sm:$0xff] }
  0xfc   : > { %6450 = vmatpush3.bf16.msra.mxu1 %v7078_v26  ;;  %6466 = vmatpush3.bf16.msra.mxu0 %v7078_v26 }
  0xfd   : > { %v7084_v31 = vpack.c.bf16 %v847_v28, %v842_v30  ;;  %v5898_v32 = vpop.f32.mrb[6].mxu0  ;;  %v5421_v28 = vld [vmem:[%s8513_s26 + $0x178] sm:$0xff]  ;;  %v5448_v30 = vld [vmem:[%s8513_s26 + $0x1c0] sm:$0xff] }
  0xfe   : > { %v857_v33 = vadd.f32 %v5898_v32, %v5328_v16  ;;  %v851_v34 = vpop.f32.mrb[7].mxu0  ;;  %v5432_v32 = vld [vmem:[%s8513_s26 + $0x188] sm:$0xff] }
  0xff   : > { %v852_v35 = vadd.f32 %v5328_v16, %v851_v34  ;;  %6452 = vmatprep.subr.bf16.mxu1 %v7084_v31  ;;  %6468 = vmatprep.subr.bf16.mxu0 %v7084_v31  ;;  %v5416_v16 = vld [vmem:[%s8513_s26 + $0x150] sm:$0xff] }
 0x100   : > { %6454 = vmatpush3.bf16.msra.mxu1 %v7084_v31  ;;  %6470 = vmatpush3.bf16.msra.mxu0 %v7084_v31  ;;  %v5433_v34 = vld [vmem:[%s8513_s26 + $0x190] sm:$0xff] }
 0x101   : > { %v7090_v36 = vpack.c.bf16 %v857_v33, %v852_v35  ;;  %v5449_v33 = vld [vmem:[%s8513_s26 + $0x1c8] sm:$0xff]  ;;  %v5450_v35 = vld [vmem:[%s8513_s26 + $0x1d0] sm:$0xff] }
 0x103   : > { %6456 = vmatprep.subr.bf16.mxu1 %v7090_v36  ;;  %6472 = vmatprep.subr.bf16.mxu0 %v7090_v36 }
 0x104   : > { %6458 = vmatpush3.bf16.msra.mxu1 %v7090_v36  ;;  %6474 = vmatpush3.bf16.msra.mxu0 %v7090_v36 }
 0x105   : > { %6476 = vmatprep.subr.bf16.mxu1 %v7072_v21  ;;  %6492 = vmatprep.subr.bf16.mxu0 %v7072_v21 }
 0x107   : > { %5916 = vmatmul.mubr.msk.f32.vlgmr.msra.gmra.mrb[0].mxu1 %vm868_vm1, %v861_v37  ;;  %5944 = vmatmul.mubr.msk.f32.vlgmr.msra.gmra.mrb[8].mxu0 %vm868_vm1, %v5347_v38  ;;  %v5434_v37 = vld [vmem:[%s8513_s26 + $0x198] sm:$0xff] }
 0x108   : > { %6478 = vmatpush3.bf16.msra.mxu1 %v7072_v21  ;;  %6494 = vmatpush3.bf16.msra.mxu0 %v7072_v21  ;;  %v5451_v38 = vld [vmem:[%s8513_s26 + $0x1d8] sm:$0xff] }
 0x109   : > { %6480 = vmatprep.subr.bf16.mxu1 %v7078_v26  ;;  %6496 = vmatprep.subr.bf16.mxu0 %v7078_v26 }
 0x10a   : > { %5918 = vmatprep.mubr.msk.f32.mxu1 %vm868_vm1, %v862_v39  ;;  %5946 = vmatprep.mubr.msk.f32.mxu0 %vm868_vm1, %v5348_v40  ;;  %v5435_v39 = vld [vmem:[%s8513_s26 + $0x1a0] sm:$0xff]  ;;  %v5436_v40 = vld [vmem:[%s8513_s26 + $0x1a8] sm:$0xff] }
 0x10b   : > { %5919 = vmatmul.mubr.msk.f32.gmra.mrb[2].mxu1 %vm868_vm1, %v863_v41  ;;  %5947 = vmatmul.mubr.msk.f32.gmra.mrb[10].mxu0 %vm868_vm1, %v5349_v42  ;;  %v5453_v41 = vld [vmem:[%s8513_s26 + $0x1e8] sm:$0xff]  ;;  %v5437_v42 = vld [vmem:[%s8513_s26 + $0x1b0] sm:$0xff] }
 0x10c   : > { %6482 = vmatpush3.bf16.msra.mxu1 %v7078_v26  ;;  %6498 = vmatpush3.bf16.msra.mxu0 %v7078_v26 }
 0x10d   : > { %6484 = vmatprep.subr.bf16.mxu1 %v7084_v31  ;;  %6500 = vmatprep.subr.bf16.mxu0 %v7084_v31 }
 0x10e   : > { %5921 = vmatprep.mubr.msk.f32.mxu1 %vm868_vm1, %v864_v43  ;;  %5949 = vmatprep.mubr.msk.f32.mxu0 %vm868_vm1, %v5350_v44  ;;  %v2474_v43 = vld [vmem:[%s8481_s8] sm:$0xff]  ;;  %v2475_v44 = vld [vmem:[%s8481_s8 + $0x8] sm:$0xff] }
 0x10f   : > { %5922 = vmatmul.mubr.msk.f32.gmra.mrb[4].mxu1 %vm868_vm1, %v865_v45  ;;  %5950 = vmatmul.mubr.msk.f32.gmra.mrb[12].mxu0 %vm868_vm1, %v5351_v46  ;;  %v5438_v45 = vld [vmem:[%s8513_s26 + $0x1b8] sm:$0xff] }
 0x110   : > { %6486 = vmatpush3.bf16.msra.mxu1 %v7084_v31  ;;  %6502 = vmatpush3.bf16.msra.mxu0 %v7084_v31  ;;  %v5455_v46 = vld [vmem:[%s8513_s26 + $0x1f8] sm:$0xff] }
 0x111   : > { %6488 = vmatprep.subr.bf16.mxu1 %v7090_v36  ;;  %6504 = vmatprep.subr.bf16.mxu0 %v7090_v36 }
 0x112   : > { %5924 = vmatprep.mubr.msk.f32.mxu1 %vm868_vm1, %v866_v47  ;;  %5952 = vmatprep.mubr.msk.f32.mxu0 %vm868_vm1, %v5352_v48  ;;  %v5465_v47 = vld [vmem:[%s8513_s26 + $0x200] sm:$0xff]  ;;  %v6619_v48 = vpack.c.bf16 %v2475_v44, %v2474_v43 }
 0x113   : > { %5925 = vmatmul.mubr.msk.f32.gmra.mrb[6].mxu1 %vm868_vm1, %v867_v49  ;;  %5953 = vmatmul.mubr.msk.f32.gmra.mrb[14].mxu0 %vm868_vm1, %v5353_v50  ;;  %v2477_v49 = vld [vmem:[%s8481_s8 + $0x18] sm:$0xff]  ;;  %v5466_v50 = vld [vmem:[%s8513_s26 + $0x208] sm:$0xff] }
 0x114   : > { %6490 = vmatpush3.bf16.msra.mxu1 %v7090_v36  ;;  %6506 = vmatpush3.bf16.msra.mxu0 %v7090_v36 }
 0x115   : > { %6508 = vmatprep.subr.bf16.mxu1 %v7072_v21  ;;  %6524 = vmatprep.subr.bf16.mxu0 %v7072_v21 }
 0x116   : > { %5971 = vmatprep.mubr.msk.f32.mxu1 %vm868_vm1, %v5363_v51  ;;  %5999 = vmatprep.mubr.msk.f32.mxu0 %vm868_vm1, %v5380_v52  ;;  %v5467_v51 = vld [vmem:[%s8513_s26 + $0x210] sm:$0xff] }
 0x117   : > { %5972 = vmatmul.mubr.msk.f32.vlgmr.msra.gmra.mrb[8].mxu1 %vm868_vm1, %v5364_v53  ;;  %6000 = vmatmul.mubr.msk.f32.vlgmr.msra.gmra.mrb[16].mxu0 %vm868_vm1, %v5381_v54  ;;  %v5469_v53 = vld [vmem:[%s8513_s26 + $0x220] sm:$0xff]  ;;  %v5470_v54 = vld [vmem:[%s8513_s26 + $0x228] sm:$0xff] }
 0x118   : > { %6510 = vmatpush3.bf16.msra.mxu1 %v7072_v21  ;;  %6526 = vmatpush3.bf16.msra.mxu0 %v7072_v21 }
 0x119   : > { %6512 = vmatprep.subr.bf16.mxu1 %v7078_v26  ;;  %6528 = vmatprep.subr.bf16.mxu0 %v7078_v26 }
 0x11a   : > { %5974 = vmatprep.mubr.msk.f32.mxu1 %vm868_vm1, %v5365_v55  ;;  %6002 = vmatprep.mubr.msk.f32.mxu0 %vm868_vm1, %v5382_v56  ;;  %v5471_v55 = vld [vmem:[%s8513_s26 + $0x230] sm:$0xff]  ;;  %v5472_v56 = vld [vmem:[%s8513_s26 + $0x238] sm:$0xff] }
 0x11b   : > { %5975 = vmatmul.mubr.msk.f32.gmra.mrb[10].mxu1 %vm868_vm1, %v5366_v57  ;;  %6003 = vmatmul.mubr.msk.f32.gmra.mrb[18].mxu0 %vm868_vm1, %v5383_v58  ;;  %v2352_v58 = vld [vmem:[%s8515_s3 + $0x30] sm:$0xff] }
 0x11c   : > { %6514 = vmatpush3.bf16.msra.mxu1 %v7078_v26  ;;  %6530 = vmatpush3.bf16.msra.mxu0 %v7078_v26 }
 0x11d   : > { %6516 = vmatprep.subr.bf16.mxu1 %v7084_v31  ;;  %6532 = vmatprep.subr.bf16.mxu0 %v7084_v31 }
 0x11e   : > { %5977 = vmatprep.mubr.msk.f32.mxu1 %vm868_vm1, %v5367_v59  ;;  %6005 = vmatprep.mubr.msk.f32.mxu0 %vm868_vm1, %v5384_v60  ;;  %v2353_v59 = vld [vmem:[%s8515_s3 + $0x38] sm:$0xff] }
 0x11f   : > { %5978 = vmatmul.mubr.msk.f32.gmra.mrb[12].mxu1 %vm868_vm1, %v5368_v61  ;;  %6006 = vmatmul.mubr.msk.f32.gmra.mrb[20].mxu0 %vm868_vm1, %v5385_v62  ;;  %v6599_v60 = vpack.c.bf16 %v2353_v59, %v2352_v58  ;;  %v2354_v61 = vld [vmem:[%s8515_s3 + $0x40] sm:$0xff]  ;;  %v2355_v62 = vld [vmem:[%s8515_s3 + $0x48] sm:$0xff] }
 0x120   : > { %6518 = vmatpush3.bf16.msra.mxu1 %v7084_v31  ;;  %6534 = vmatpush3.bf16.msra.mxu0 %v7084_v31 }
 0x121   : > { %6520 = vmatprep.subr.bf16.mxu1 %v7090_v36  ;;  %6536 = vmatprep.subr.bf16.mxu0 %v7090_v36 }
 0x122   : > { %5980 = vmatprep.mubr.msk.f32.mxu1 %vm868_vm1, %v5369_v63  ;;  %6008 = vmatprep.mubr.msk.f32.mxu0 %vm868_vm1, %v5386_v0  ;;  %v6603_v63 = vpack.c.bf16 %v2355_v62, %v2354_v61  ;;  %v2356_v0 = vld [vmem:[%s8515_s3 + $0x50] sm:$0xff] }
 0x123   : > { %5981 = vmatmul.mubr.msk.f32.gmra.mrb[14].mxu1 %vm868_vm1, %v5370_v1  ;;  %6009 = vmatmul.mubr.msk.f32.gmra.mrb[22].mxu0 %vm868_vm1, %v5387_v2  ;;  %v2357_v1 = vld [vmem:[%s8515_s3 + $0x58] sm:$0xff] }
 0x124   : > { %6522 = vmatpush3.bf16.msra.mxu1 %v7090_v36  ;;  %6538 = vmatpush3.bf16.msra.mxu0 %v7090_v36  ;;  %v6607_v2 = vpack.c.bf16 %v2357_v1, %v2356_v0 }
 0x125   : > { %6540 = vmatprep.subr.bf16.mxu1 %v7072_v21  ;;  %6556 = vmatprep.subr.bf16.mxu0 %v7072_v21 }
 0x126   : > { %6027 = vmatprep.mubr.msk.f32.mxu1 %vm868_vm1, %v5397_v3  ;;  %6055 = vmatprep.mubr.msk.f32.mxu0 %vm868_vm1, %v5414_v4  ;;  %v2358_v3 = vld [vmem:[%s8515_s3 + $0x60] sm:$0xff]  ;;  %v2359_v4 = vld [vmem:[%s8515_s3 + $0x68] sm:$0xff] }
 0x127   : > { %6028 = vmatmul.mubr.msk.f32.vlgmr.msra.gmra.mrb[16].mxu1 %vm868_vm1, %v5398_v5  ;;  %6056 = vmatmul.mubr.msk.f32.vlgmr.msra.gmra.mrb[24].mxu0 %vm868_vm1, %v5415_v14  ;;  %v6611_v5 = vpack.c.bf16 %v2359_v4, %v2358_v3  ;;  %v2360_v14 = vld [vmem:[%s8515_s3 + $0x70] sm:$0xff] }
 0x128   : > { %6542 = vmatpush3.bf16.msra.mxu1 %v7072_v21  ;;  %6558 = vmatpush3.bf16.msra.mxu0 %v7072_v21 }
 0x129   : > { %6544 = vmatprep.subr.bf16.mxu1 %v7078_v26  ;;  %6560 = vmatprep.subr.bf16.mxu0 %v7078_v26 }
 0x12a   : > { %6030 = vmatprep.mubr.msk.f32.mxu1 %vm868_vm1, %v5399_v15  ;;  %6058 = vmatprep.mubr.msk.f32.mxu0 %vm868_vm1, %v5416_v16  ;;  %v2361_v15 = vld [vmem:[%s8515_s3 + $0x78] sm:$0xff] }
 0x12b   : > { %6031 = vmatmul.mubr.msk.f32.gmra.mrb[18].mxu1 %vm868_vm1, %v5400_v17  ;;  %6059 = vmatmul.mubr.msk.f32.gmra.mrb[26].mxu0 %vm868_vm1, %v5417_v18  ;;  %v6615_v16 = vpack.c.bf16 %v2361_v15, %v2360_v14  ;;  %v5345_v17 = vld [vmem:[%s8516_s6] ss:$0 sm:$0xff]  ;;  %v5362_v18 = vld [vmem:[%s8516_s6 + $0x1] ss:$0 sm:$0xff] }
 0x12c   : > { %6546 = vmatpush3.bf16.msra.mxu1 %v7078_v26  ;;  %6562 = vmatpush3.bf16.msra.mxu0 %v7078_v26 }
 0x12d   : > { %6548 = vmatprep.subr.bf16.mxu1 %v7084_v31  ;;  %6564 = vmatprep.subr.bf16.mxu0 %v7084_v31 }
 0x12e   : > { %6033 = vmatprep.mubr.msk.f32.mxu1 %vm868_vm1, %v5401_v19  ;;  %6061 = vmatprep.mubr.msk.f32.mxu0 %vm868_vm1, %v5418_v20 }
 0x12f   : > { %6034 = vmatmul.mubr.msk.f32.gmra.mrb[20].mxu1 %vm868_vm1, %v5402_v22  ;;  %6062 = vmatmul.mubr.msk.f32.gmra.mrb[28].mxu0 %vm868_vm1, %v5419_v23 }
 0x130   : > { %6550 = vmatpush3.bf16.msra.mxu1 %v7084_v31  ;;  %6566 = vmatpush3.bf16.msra.mxu0 %v7084_v31 }
 0x131   : > { %6552 = vmatprep.subr.bf16.mxu1 %v7090_v36  ;;  %6568 = vmatprep.subr.bf16.mxu0 %v7090_v36 }
 0x132   : > { %6036 = vmatprep.mubr.msk.f32.mxu1 %vm868_vm1, %v5403_v24  ;;  %6064 = vmatprep.mubr.msk.f32.mxu0 %vm868_vm1, %v5420_v25 }
 0x133   : > { %6037 = vmatmul.mubr.msk.f32.gmra.mrb[22].mxu1 %vm868_vm1, %v5404_v27  ;;  %6065 = vmatmul.mubr.msk.f32.gmra.mrb[30].mxu0 %vm868_vm1, %v5421_v28 }
 0x134   : > { %6554 = vmatpush3.bf16.msra.mxu1 %v7090_v36  ;;  %6570 = vmatpush3.bf16.msra.mxu0 %v7090_v36 }
 0x135   : > { %6572 = vmatprep.subr.bf16.mxu1 %v7072_v21  ;;  %6083 = vmatprep.mubr.msk.f32.mxu1 %vm868_vm1, %v5431_v29 }
 0x136   : > { %6111 = vmatprep.mubr.msk.f32.mxu0 %vm868_vm1, %v5448_v30 }
 0x137   : > { %6084 = vmatmul.mubr.msk.f32.vlgmr.msra.gmra.mrb[24].mxu1 %vm868_vm1, %v5432_v32  ;;  %6112 = vmatmul.mubr.msk.f32.vlgmr.msra.gmra.mrb[32].mxu0 %vm868_vm1, %v5449_v33 }
 0x138   : > { %6574 = vmatpush3.bf16.msra.mxu1 %v7072_v21  ;;  %6086 = vmatprep.mubr.msk.f32.mxu1 %vm868_vm1, %v5433_v34  ;;  %v5452_v21 = vld [vmem:[%s8513_s26 + $0x1e0] sm:$0xff] }
 0x139   : > { %6576 = vmatprep.subr.bf16.mxu1 %v7078_v26  ;;  %6114 = vmatprep.mubr.msk.f32.mxu0 %vm868_vm1, %v5450_v35 }
 0x13b   : > { %6087 = vmatmul.mubr.msk.f32.gmra.mrb[26].mxu1 %vm868_vm1, %v5434_v37  ;;  %6115 = vmatmul.mubr.msk.f32.gmra.mrb[34].mxu0 %vm868_vm1, %v5451_v38 }
 0x13c   : > { %6578 = vmatpush3.bf16.msra.mxu1 %v7078_v26  ;;  %6089 = vmatprep.mubr.msk.f32.mxu1 %vm868_vm1, %v5435_v39  ;;  %v5454_v26 = vld [vmem:[%s8513_s26 + $0x1f0] sm:$0xff] }
 0x13d   : > { %6580 = vmatprep.subr.bf16.mxu1 %v7084_v31  ;;  %6117 = vmatprep.mubr.msk.f32.mxu0 %vm868_vm1, %v5452_v21 }
 0x13f   : > { %6090 = vmatmul.mubr.msk.f32.gmra.mrb[28].mxu1 %vm868_vm1, %v5436_v40  ;;  %6118 = vmatmul.mubr.msk.f32.gmra.mrb[36].mxu0 %vm868_vm1, %v5453_v41 }
 0x140   : > { %6582 = vmatpush3.bf16.msra.mxu1 %v7084_v31  ;;  %6092 = vmatprep.mubr.msk.f32.mxu1 %vm868_vm1, %v5437_v42  ;;  %v2476_v31 = vld [vmem:[%s8481_s8 + $0x10] sm:$0xff] }
 0x141   : > { %6584 = vmatprep.subr.bf16.mxu1 %v7090_v36  ;;  %6120 = vmatprep.mubr.msk.f32.mxu0 %vm868_vm1, %v5454_v26  ;;  %v6623_v52 = vpack.c.bf16 %v2477_v49, %v2476_v31 }
 0x143   : > { %6093 = vmatmul.mubr.msk.f32.gmra.mrb[30].mxu1 %vm868_vm1, %v5438_v45  ;;  %6121 = vmatmul.mubr.msk.f32.gmra.mrb[38].mxu0 %vm868_vm1, %v5455_v46 }
 0x144   : > { %6586 = vmatpush3.bf16.msra.mxu1 %v7090_v36  ;;  %6139 = vmatprep.mubr.msk.f32.mxu1 %vm868_vm1, %v5465_v47  ;;  %v5468_v36 = vld [vmem:[%s8513_s26 + $0x218] sm:$0xff] }
 0x145   : > { %6620 = vmatprep.subr.bf16.mxu1 %v6619_v48 }
 0x147   : > { %6140 = vmatmul.mubr.msk.f32.vlgmr.msra.gmra.mrb[32].mxu1 %vm868_vm1, %v5466_v50 }
 0x148   : > { %6142 = vmatprep.mubr.msk.f32.mxu1 %vm868_vm1, %v5467_v51  ;;  %6622 = vmatpush3.bf16.msra.mxu1 %v6619_v48 }
 0x149   : > { %6624 = vmatprep.subr.bf16.mxu1 %v6623_v52 }
 0x14b   : > { %6143 = vmatmul.mubr.msk.f32.gmra.mrb[34].mxu1 %vm868_vm1, %v5468_v36 }
 0x14c   : > { %6145 = vmatprep.mubr.msk.f32.mxu1 %vm868_vm1, %v5469_v53  ;;  %6626 = vmatpush3.bf16.msra.mxu1 %v6623_v52 }
 0x14f   : > { %6146 = vmatmul.mubr.msk.f32.gmra.mrb[36].mxu1 %vm868_vm1, %v5470_v54 }
 0x150   : > { %6148 = vmatprep.mubr.msk.f32.mxu1 %vm868_vm1, %v5471_v55 }
 0x153   : > { %6149 = vmatmul.mubr.msk.f32.gmra.mrb[38].mxu1 %vm868_vm1, %v5472_v56 }
 0x154   : > { %6203 = vmatprep.mubr.msk.f32.mxu1 %vm730_vm0, %v7029_v6  ;;  %v2346_v6 = vld [vmem:[%s8515_s3] sm:$0xff] }
 0x157   : > { %6204 = vmatmul.mubr.msk.f32.vlgmr.msra.gmra.mrb[40].mxu1 %vm730_vm0, %v7033_v7  ;;  %v2347_v7 = vld [vmem:[%s8515_s3 + $0x8] sm:$0xff] }
 0x158   : > { %6206 = vmatprep.mubr.msk.f32.mxu1 %vm730_vm0, %v7035_v8  ;;  %v6587_v8 = vpack.c.bf16 %v2347_v7, %v2346_v6  ;;  %v5379_v6 = vld [vmem:[%s8516_s6 + $0x2] ss:$0 sm:$0xff]  ;;  %v5396_v7 = vld [vmem:[%s8516_s6 + $0x3] ss:$0 sm:$0xff] }
 0x15a   : > { %6588 = vmatprep.subr.bf16.mxu0 %v6587_v8 }
 0x15b   : > { %6207 = vmatmul.mubr.msk.f32.gmra.mrb[42].mxu1 %vm730_vm0, %v7041_v9  ;;  %6590 = vmatpush3.bf16.msra.mxu0 %v6587_v8  ;;  %v2348_v9 = vld [vmem:[%s8515_s3 + $0x10] sm:$0xff] }
 0x15c   : > { %6209 = vmatprep.mubr.msk.f32.mxu1 %vm730_vm0, %v7043_v10  ;;  %v2349_v10 = vld [vmem:[%s8515_s3 + $0x18] sm:$0xff] }
 0x15f   : > { %6210 = vmatmul.mubr.msk.f32.gmra.mrb[44].mxu1 %vm730_vm0, %v7049_v11  ;;  %v6591_v11 = vpack.c.bf16 %v2349_v10, %v2348_v9 }
 0x160   : > { %6212 = vmatprep.mubr.msk.f32.mxu1 %vm730_vm0, %v7051_v12  ;;  %v2350_v12 = vld [vmem:[%s8515_s3 + $0x20] sm:$0xff] }
 0x161   : > { %6592 = vmatprep.subr.bf16.mxu0 %v6591_v11 }
 0x162   : > { %6594 = vmatpush3.bf16.msra.mxu0 %v6591_v11 }
 0x163   : > { %6213 = vmatmul.mubr.msk.f32.gmra.mrb[46].mxu1 %vm730_vm0, %v7057_v13  ;;  %v2351_v13 = vld [vmem:[%s8515_s3 + $0x28] sm:$0xff] }
 0x164   : > { %v6595_v57 = vpack.c.bf16 %v2351_v13, %v2350_v12 }
 0x166   : > { %6596 = vmatprep.subr.bf16.mxu0 %v6595_v57 }
 0x167   : > { %6598 = vmatpush3.bf16.msra.mxu0 %v6595_v57 }
 0x168   : > { %6600 = vmatprep.subr.bf16.mxu0 %v6599_v60 }
 0x16b   : > { %6602 = vmatpush3.bf16.msra.mxu0 %v6599_v60 }
 0x16c   : > { %6604 = vmatprep.subr.bf16.mxu0 %v6603_v63 }
 0x16f   : > { %6606 = vmatpush3.bf16.msra.mxu0 %v6603_v63 }
 0x170   : > { %6608 = vmatprep.subr.bf16.mxu0 %v6607_v2 }
 0x173   : > { %6610 = vmatpush3.bf16.msra.mxu0 %v6607_v2 }
 0x174   : > { %6612 = vmatprep.subr.bf16.mxu0 %v6611_v5 }
 0x177   : > { %6614 = vmatpush3.bf16.msra.mxu0 %v6611_v5 }
 0x178   : > { %6616 = vmatprep.subr.bf16.mxu0 %v6615_v16 }
 0x17b   : > { %6618 = vmatpush3.bf16.msra.mxu0 %v6615_v16 }
 0x1da   : > { %v5917_v19 = vpop.f32.mrb[0].mxu1  ;;  %v5945_v20 = vpop.f32.mrb[8].mxu0 }
 0x1db   : > { %v1004_v22 = vmul.f32 %v5917_v19, %v5345_v17  ;;  %v1163_v23 = vmul.f32 %v5945_v20, %v5362_v18  ;;  %v959_v24 = vpop.f32.mrb[1].mxu1  ;;  %v1118_v25 = vpop.f32.mrb[9].mxu0 }
 0x1dc   : > { %v1003_v27 = vmul.f32 %v5345_v17, %v959_v24  ;;  %v1162_v28 = vmul.f32 %v5362_v18, %v1118_v25 }
 0x1dd   : > { %v1171_v29 = vadd.f32 %v1163_v23, %v1004_v22 }
 0x1de   : > { %v1170_v30 = vadd.f32 %v1162_v28, %v1003_v27  ;;  %v5920_v32 = vpop.f32.mrb[2].mxu1  ;;  %v5948_v33 = vpop.f32.mrb[10].mxu0 }
 0x1df   : > { %v1006_v34 = vmul.f32 %v5920_v32, %v5345_v17  ;;  %v1165_v35 = vmul.f32 %v5948_v33, %v5362_v18  ;;  %v969_v37 = vpop.f32.mrb[3].mxu1  ;;  %v1128_v38 = vpop.f32.mrb[11].mxu0 }
 0x1e0   : > { %v1005_v39 = vmul.f32 %v5345_v17, %v969_v37  ;;  %v1164_v21 = vmul.f32 %v5362_v18, %v1128_v38 }
 0x1e1   : > { %v1173_v40 = vadd.f32 %v1165_v35, %v1006_v34 }
 0x1e2   : > { %v1172_v41 = vadd.f32 %v1164_v21, %v1005_v39  ;;  %v5923_v42 = vpop.f32.mrb[4].mxu1  ;;  %v5951_v26 = vpop.f32.mrb[12].mxu0 }
 0x1e3   : > { %v1008_v43 = vmul.f32 %v5923_v42, %v5345_v17  ;;  %v1167_v44 = vmul.f32 %v5951_v26, %v5362_v18  ;;  %v979_v45 = vpop.f32.mrb[5].mxu1  ;;  %v1138_v46 = vpop.f32.mrb[13].mxu0 }
 0x1e4   : > { %v1007_v47 = vmul.f32 %v5345_v17, %v979_v45  ;;  %v1166_v48 = vmul.f32 %v5362_v18, %v1138_v46 }
 0x1e5   : > { %v1175_v31 = vadd.f32 %v1167_v44, %v1008_v43  ;;  %v5413_v43 = vld [vmem:[%s8516_s6 + $0x4] ss:$0 sm:$0xff]  ;;  %v5430_v44 = vld [vmem:[%s8516_s6 + $0x5] ss:$0 sm:$0xff] }
 0x1e6   : > { %v1174_v49 = vadd.f32 %v1166_v48, %v1007_v47  ;;  %v5926_v50 = vpop.f32.mrb[6].mxu1  ;;  %v5954_v51 = vpop.f32.mrb[14].mxu0 }
 0x1e7   : > { %v1010_v52 = vmul.f32 %v5926_v50, %v5345_v17  ;;  %v1169_v36 = vmul.f32 %v5954_v51, %v5362_v18  ;;  %v989_v53 = vpop.f32.mrb[7].mxu1  ;;  %v1148_v54 = vpop.f32.mrb[15].mxu0 }
 0x1e8   : > { %v1009_v55 = vmul.f32 %v5345_v17, %v989_v53  ;;  %v1168_v56 = vmul.f32 %v5362_v18, %v1148_v54 }
 0x1e9   : > { %v1177_v8 = vadd.f32 %v1169_v36, %v1010_v52 }
 0x1ea   : > { %v1176_v9 = vadd.f32 %v1168_v56, %v1009_v55  ;;  %v5973_v10 = vpop.f32.mrb[8].mxu1  ;;  %v6001_v11 = vpop.f32.mrb[16].mxu0 }
 0x1eb   : > { %v1322_v12 = vmul.f32 %v5973_v10, %v5379_v6  ;;  %v1277_v13 = vpop.f32.mrb[9].mxu1  ;;  %v1481_v57 = vmul.f32 %v6001_v11, %v5396_v7  ;;  %v1436_v58 = vpop.f32.mrb[17].mxu0 }
 0x1ec   : > { %v1321_v59 = vmul.f32 %v5379_v6, %v1277_v13  ;;  %v1480_v60 = vmul.f32 %v5396_v7, %v1436_v58 }
 0x1ed   : > { %v1330_v61 = vadd.f32 %v1322_v12, %v1171_v29 }
 0x1ee   : > { %v1329_v62 = vadd.f32 %v1321_v59, %v1170_v30  ;;  %v5976_v63 = vpop.f32.mrb[10].mxu1  ;;  %v6004_v0 = vpop.f32.mrb[18].mxu0 }
 0x1ef   : > { %v1489_v1 = vadd.f32 %v1481_v57, %v1330_v61  ;;  %v1324_v2 = vmul.f32 %v5976_v63, %v5379_v6  ;;  %v1287_v3 = vpop.f32.mrb[11].mxu1  ;;  %v1483_v4 = vmul.f32 %v6004_v0, %v5396_v7  ;;  %v1446_v5 = vpop.f32.mrb[19].mxu0 }
 0x1f0   : > { %v1488_v14 = vadd.f32 %v1480_v60, %v1329_v62  ;;  %v1323_v15 = vmul.f32 %v5379_v6, %v1287_v3  ;;  %v1482_v16 = vmul.f32 %v5396_v7, %v1446_v5 }
 0x1f1   : > { %v1332_v17 = vadd.f32 %v1324_v2, %v1173_v40 }
 0x1f2   : > { %v1331_v18 = vadd.f32 %v1323_v15, %v1172_v41  ;;  %v5979_v19 = vpop.f32.mrb[12].mxu1  ;;  %v6007_v20 = vpop.f32.mrb[20].mxu0 }
 0x1f3   : > { %v1491_v22 = vadd.f32 %v1483_v4, %v1332_v17  ;;  %v1326_v23 = vmul.f32 %v5979_v19, %v5379_v6  ;;  %v1297_v24 = vpop.f32.mrb[13].mxu1  ;;  %v1485_v25 = vmul.f32 %v6007_v20, %v5396_v7  ;;  %v1456_v27 = vpop.f32.mrb[21].mxu0 }
 0x1f4   : > { %v1490_v28 = vadd.f32 %v1482_v16, %v1331_v18  ;;  %v1325_v29 = vmul.f32 %v5379_v6, %v1297_v24  ;;  %v1484_v30 = vmul.f32 %v5396_v7, %v1456_v27 }
 0x1f5   : > { %v1334_v32 = vadd.f32 %v1326_v23, %v1175_v31 }
 0x1f6   : > { %v1333_v33 = vadd.f32 %v1325_v29, %v1174_v49  ;;  %v5982_v34 = vpop.f32.mrb[14].mxu1  ;;  %v6010_v35 = vpop.f32.mrb[22].mxu0  ;;  %v5447_v29 = vld [vmem:[%s8516_s6 + $0x6] ss:$0 sm:$0xff] }
 0x1f7   : > { %v1493_v37 = vadd.f32 %v1485_v25, %v1334_v32  ;;  %v1328_v38 = vmul.f32 %v5982_v34, %v5379_v6  ;;  %v1307_v39 = vpop.f32.mrb[15].mxu1  ;;  %v1487_v21 = vmul.f32 %v6010_v35, %v5396_v7  ;;  %v1466_v40 = vpop.f32.mrb[23].mxu0 }
 0x1f8   : > { %v1492_v41 = vadd.f32 %v1484_v30, %v1333_v33  ;;  %v1327_v42 = vmul.f32 %v5379_v6, %v1307_v39  ;;  %v1486_v26 = vmul.f32 %v5396_v7, %v1466_v40  ;;  %v5464_v30 = vld [vmem:[%s8516_s6 + $0x7] ss:$0 sm:$0xff] }
 0x1f9   : > { %v1336_v45 = vadd.f32 %v1328_v38, %v1177_v8 }
 0x1fa   : > { %v1335_v46 = vadd.f32 %v1327_v42, %v1176_v9  ;;  %v6029_v47 = vpop.f32.mrb[16].mxu1  ;;  %v6057_v48 = vpop.f32.mrb[24].mxu0 }
 0x1fb   : > { %v1495_v31 = vadd.f32 %v1487_v21, %v1336_v45  ;;  %v1640_v49 = vmul.f32 %v6029_v47, %v5413_v43  ;;  %v1595_v50 = vpop.f32.mrb[17].mxu1  ;;  %v1799_v51 = vmul.f32 %v6057_v48, %v5430_v44  ;;  %v1754_v52 = vpop.f32.mrb[25].mxu0 }
 0x1fc   : > { %v1494_v36 = vadd.f32 %v1486_v26, %v1335_v46  ;;  %v1639_v53 = vmul.f32 %v5413_v43, %v1595_v50  ;;  %v1798_v54 = vmul.f32 %v5430_v44, %v1754_v52 }
 0x1fd   : > { %v1648_v55 = vadd.f32 %v1640_v49, %v1489_v1 }
 0x1fe   : > { %v1647_v56 = vadd.f32 %v1639_v53, %v1488_v14  ;;  %v6032_v6 = vpop.f32.mrb[18].mxu1  ;;  %v6060_v7 = vpop.f32.mrb[26].mxu0 }
 0x1ff   : > { %v1807_v10 = vadd.f32 %v1799_v51, %v1648_v55  ;;  %v1642_v11 = vmul.f32 %v6032_v6, %v5413_v43  ;;  %v1605_v12 = vpop.f32.mrb[19].mxu1  ;;  %v1801_v13 = vmul.f32 %v6060_v7, %v5430_v44  ;;  %v1764_v8 = vpop.f32.mrb[27].mxu0 }
 0x200   : > { %v1806_v9 = vadd.f32 %v1798_v54, %v1647_v56  ;;  %v1641_v57 = vmul.f32 %v5413_v43, %v1605_v12  ;;  %v1800_v58 = vmul.f32 %v5430_v44, %v1764_v8 }
 0x201   : > { %v1650_v59 = vadd.f32 %v1642_v11, %v1491_v22 }
 0x202   : > { %v1649_v60 = vadd.f32 %v1641_v57, %v1490_v28  ;;  %v6035_v61 = vpop.f32.mrb[20].mxu1  ;;  %v6063_v62 = vpop.f32.mrb[28].mxu0 }
 0x203   : > { %v1809_v63 = vadd.f32 %v1801_v13, %v1650_v59  ;;  %v1644_v0 = vmul.f32 %v6035_v61, %v5413_v43  ;;  %v1615_v2 = vpop.f32.mrb[21].mxu1  ;;  %v1803_v3 = vmul.f32 %v6063_v62, %v5430_v44  ;;  %v1774_v1 = vpop.f32.mrb[29].mxu0 }
 0x204   : > { %v1808_v4 = vadd.f32 %v1800_v58, %v1649_v60  ;;  %v1643_v5 = vmul.f32 %v5413_v43, %v1615_v2  ;;  %v1802_v14 = vmul.f32 %v5430_v44, %v1774_v1 }
 0x205   : > { %v1652_v15 = vadd.f32 %v1644_v0, %v1493_v37 }
 0x206   : > { %v1651_v16 = vadd.f32 %v1643_v5, %v1492_v41  ;;  %v6038_v17 = vpop.f32.mrb[22].mxu1  ;;  %v6066_v18 = vpop.f32.mrb[30].mxu0  ;;  %v5481_v5 = vld [vmem:[%s8516_s6 + $0x8] ss:$0 sm:$0xff] }
 0x207   : > { %v1811_v19 = vadd.f32 %v1803_v3, %v1652_v15  ;;  %v1646_v20 = vmul.f32 %v6038_v17, %v5413_v43  ;;  %v1625_v23 = vpop.f32.mrb[23].mxu1  ;;  %v1805_v24 = vmul.f32 %v6066_v18, %v5430_v44  ;;  %v1784_v22 = vpop.f32.mrb[31].mxu0 }
 0x208   : > { %v1810_v25 = vadd.f32 %v1802_v14, %v1651_v16  ;;  %v1645_v27 = vmul.f32 %v5413_v43, %v1625_v23  ;;  %v1804_v28 = vmul.f32 %v5430_v44, %v1784_v22  ;;  %v5482_v23 = vld [vmem:[%s8517_s29] ss:$0 sm:$0xff] }
 0x209   : > { %v1654_v32 = vadd.f32 %v1646_v20, %v1495_v31 }
 0x20a   : > { %v1653_v33 = vadd.f32 %v1645_v27, %v1494_v36  ;;  %v6085_v34 = vpop.f32.mrb[24].mxu1  ;;  %v6113_v35 = vpop.f32.mrb[32].mxu0 }
 0x20b   : > { %v1813_v37 = vadd.f32 %v1805_v24, %v1654_v32  ;;  %v1958_v38 = vmul.f32 %v6085_v34, %v5447_v29  ;;  %v1913_v39 = vpop.f32.mrb[25].mxu1  ;;  %v2117_v21 = vmul.f32 %v6113_v35, %v5464_v30  ;;  %v2072_v40 = vpop.f32.mrb[33].mxu0 }
 0x20c   : > { %v1812_v41 = vadd.f32 %v1804_v28, %v1653_v33  ;;  %v1957_v42 = vmul.f32 %v5447_v29, %v1913_v39  ;;  %v2116_v26 = vmul.f32 %v5464_v30, %v2072_v40 }
 0x20d   : > { %v1966_v43 = vadd.f32 %v1958_v38, %v1807_v10 }
 0x20e   : > { %v1965_v44 = vadd.f32 %v1957_v42, %v1806_v9  ;;  %v6088_v45 = vpop.f32.mrb[26].mxu1  ;;  %v6116_v46 = vpop.f32.mrb[34].mxu0 }
 0x20f   : > { %v2125_v47 = vadd.f32 %v2117_v21, %v1966_v43  ;;  %v1960_v48 = vmul.f32 %v6088_v45, %v5447_v29  ;;  %v1923_v49 = vpop.f32.mrb[27].mxu1  ;;  %v2119_v50 = vmul.f32 %v6116_v46, %v5464_v30  ;;  %v2082_v31 = vpop.f32.mrb[35].mxu0 }
 0x210   : > { %v2124_v51 = vadd.f32 %v2116_v26, %v1965_v44  ;;  %v1959_v52 = vmul.f32 %v5447_v29, %v1923_v49  ;;  %v2118_v36 = vmul.f32 %v5464_v30, %v2082_v31 }
 0x211   : > { %v1968_v53 = vadd.f32 %v1960_v48, %v1809_v63 }
 0x212   : > { %v1967_v54 = vadd.f32 %v1959_v52, %v1808_v4  ;;  %v6091_v55 = vpop.f32.mrb[28].mxu1  ;;  %v6119_v56 = vpop.f32.mrb[36].mxu0 }
 0x213   : > { %v2127_v6 = vadd.f32 %v2119_v50, %v1968_v53  ;;  %v1962_v7 = vmul.f32 %v6091_v55, %v5447_v29  ;;  %v1933_v11 = vpop.f32.mrb[29].mxu1  ;;  %v2121_v12 = vmul.f32 %v6119_v56, %v5464_v30  ;;  %v2092_v10 = vpop.f32.mrb[37].mxu0 }
 0x214   : > { %v2126_v13 = vadd.f32 %v2118_v36, %v1967_v54  ;;  %v1961_v8 = vmul.f32 %v5447_v29, %v1933_v11  ;;  %v2120_v9 = vmul.f32 %v5464_v30, %v2092_v10 }
 0x215   : > { %v1970_v57 = vadd.f32 %v1962_v7, %v1811_v19 }
 0x216   : > { %v1969_v58 = vadd.f32 %v1961_v8, %v1810_v25  ;;  %v6094_v59 = vpop.f32.mrb[30].mxu1  ;;  %v6122_v60 = vpop.f32.mrb[38].mxu0 }
 0x217   : > { %v2129_v61 = vadd.f32 %v2121_v12, %v1970_v57  ;;  %v1964_v62 = vmul.f32 %v6094_v59, %v5447_v29  ;;  %v1943_v0 = vpop.f32.mrb[31].mxu1  ;;  %v2123_v2 = vmul.f32 %v6122_v60, %v5464_v30  ;;  %v2102_v63 = vpop.f32.mrb[39].mxu0 }
 0x218   : > { %v2128_v3 = vadd.f32 %v2120_v9, %v1969_v58  ;;  %v1963_v1 = vmul.f32 %v5447_v29, %v1943_v0  ;;  %v2122_v4 = vmul.f32 %v5464_v30, %v2102_v63 }
 0x219   : > { %v1972_v14 = vadd.f32 %v1964_v62, %v1813_v37 }
 0x21a   : > { %v1971_v15 = vadd.f32 %v1963_v1, %v1812_v41  ;;  %v6141_v16 = vpop.f32.mrb[32].mxu1 }
 0x21b   : > { %v2131_v17 = vadd.f32 %v2123_v2, %v1972_v14  ;;  %v2276_v18 = vmul.f32 %v6141_v16, %v5481_v5  ;;  %v2231_v19 = vpop.f32.mrb[33].mxu1 }
 0x21c   : > { %v2130_v20 = vadd.f32 %v2122_v4, %v1971_v15  ;;  %v2275_v24 = vmul.f32 %v5481_v5, %v2231_v19 }
 0x21d   : > { %v2284_v22 = vadd.f32 %v2276_v18, %v2125_v47 }
 0x21e   : > { %v2283_v25 = vadd.f32 %v2275_v24, %v2124_v51  ;;  %v6144_v27 = vpop.f32.mrb[34].mxu1 }
 0x21f   : > { %v2299_v28 = vadd.f32 %v5482_v23, %v2284_v22  ;;  %v2278_v29 = vmul.f32 %v6144_v27, %v5481_v5  ;;  %v2241_v30 = vpop.f32.mrb[35].mxu1 }
 0x220   : > { %v2298_v32 = vadd.f32 %v5482_v23, %v2283_v25  ;;  %v2277_v33 = vmul.f32 %v5481_v5, %v2241_v30 }
 0x221   : > { %v2315_v34 = vmul.f32 0.70710677, %v2299_v28  ;;  %v2286_v35 = vadd.f32 %v2278_v29, %v2127_v6 }
 0x222   : > { %v2314_v37 = vmul.f32 0.70710677, %v2298_v32  ;;  %v2285_v38 = vadd.f32 %v2277_v33, %v2126_v13  ;;  %v6147_v39 = vpop.f32.mrb[36].mxu1  ;;  %v2307_v13 = vmul.f32 0.5, %v2299_v28 }
 0x223   : > { %6791 = verf.f32 %v2315_v34  ;;  %v2301_v21 = vadd.f32 %v5482_v23, %v2286_v35  ;;  %v2280_v40 = vmul.f32 %v6147_v39, %v5481_v5  ;;  %v2251_v41 = vpop.f32.mrb[37].mxu1 }
 0x224   : > { %6793 = verf.f32 %v2314_v37  ;;  %v7538_v42 = vadd.f32 %v5482_v23, %v2285_v38  ;;  %v2279_v26 = vmul.f32 %v5481_v5, %v2251_v41 }
 0x225   : > { %v2317_v43 = vmul.f32 0.70710677, %v2301_v21  ;;  %v2288_v44 = vadd.f32 %v2280_v40, %v2129_v61  ;;  %v2309_v19 = vmul.f32 0.5, %v2301_v21 }
 0x226   : > { %v2316_v45 = vmul.f32 0.70710677, %v7538_v42  ;;  %v2287_v46 = vadd.f32 %v2279_v26, %v2128_v3  ;;  %v6150_v47 = vpop.f32.mrb[38].mxu1  ;;  %v2308_v35 = vmul.f32 0.5, %v7538_v42 }
 0x227   : > { %6795 = verf.f32 %v2317_v43  ;;  %v7541_v48 = vadd.f32 %v5482_v23, %v2288_v44  ;;  %v2282_v49 = vmul.f32 %v6150_v47, %v5481_v5  ;;  %v2261_v50 = vpop.f32.mrb[39].mxu1 }
 0x228   : > { %6797 = verf.f32 %v2316_v45  ;;  %v7543_v31 = vadd.f32 %v5482_v23, %v2287_v46  ;;  %v2281_v51 = vmul.f32 %v5481_v5, %v2261_v50  ;;  %v2306_v5 = vmul.f32 0.5, %v2298_v32 }
 0x229   : > { %v2319_v52 = vmul.f32 0.70710677, %v7541_v48  ;;  %v2290_v36 = vadd.f32 %v2282_v49, %v2131_v17  ;;  %v2311_v38 = vmul.f32 0.5, %v7541_v48 }
 0x22a   : > { %v2318_v53 = vmul.f32 0.70710677, %v7543_v31  ;;  %v2289_v54 = vadd.f32 %v2281_v51, %v2130_v20  ;;  %v7547_v55 = vpop.f32.mrb[40].mxu1 }
 0x22b   : > { %6799 = verf.f32 %v2319_v52  ;;  %v7549_v56 = vadd.f32 %v5482_v23, %v2290_v36  ;;  %v2584_v6 = vmul.f32 %v7547_v55, %v7547_v55  ;;  %2693 = vrot.lane.b32.xlu0 %v7547_v55, %s6871_s0  ;;  %v7555_v7 = vpop.f32.mrb[41].mxu1 }
 0x22c   : > { %6801 = verf.f32 %v2318_v53  ;;  %v7557_v11 = vadd.f32 %v5482_v23, %v2289_v54  ;;  %v2583_v12 = vmul.f32 %v7555_v7, %v7555_v7  ;;  %v2310_v53 = vmul.f32 0.5, %v7543_v31 }
 0x22d   : > { %v6792_v10 = vpop.eup %6791  ;;  %v2321_v8 = vmul.f32 0.70710677, %v7549_v56  ;;  %v2592_v9 = vsel %vm730_vm0, %v2584_v6, 0.0  ;;  %v2631_v57 = vsel %vm2629_vm2, %v2584_v6, 0.0 }
 0x22e   : > { %v6794_v58 = vpop.eup %6793  ;;  %v2331_v59 = vadd.f32 1.0, %v6792_v10  ;;  %v2320_v60 = vmul.f32 0.70710677, %v7557_v11  ;;  %v2591_v61 = vsel %vm730_vm0, %v2583_v12, 0.0  ;;  %v2630_v62 = vsel %vm2629_vm2, %v2583_v12, 0.0  ;;  %v7567_v0 = vpop.f32.mrb[42].mxu1 }
 0x22f   : > { %6803 = verf.f32 %v2321_v8  ;;  %v2593_v2 = vadd.f32 %v2592_v9, %v2591_v61  ;;  %v2632_v63 = vadd.f32 %v2631_v57, %v2630_v62  ;;  %v2586_v3 = vmul.f32 %v7567_v0, %v7567_v0  ;;  %2691 = vrot.lane.b32.xlu0 %v7555_v7, %s6871_s0  ;;  %2697 = vrot.lane.b32.xlu1 %v7567_v0, %s6871_s0  ;;  %v7575_v1 = vpop.f32.mrb[43].mxu1 }
 0x230   : > { %6805 = verf.f32 %v2320_v60  ;;  %v2585_v4 = vmul.f32 %v7575_v1, %v7575_v1  ;;  %v2330_v14 = vadd.f32 1.0, %v6794_v58  ;;  %v2339_v16 = vmul.f32 %v2331_v59, %v2307_v13 }
 0x231   : > { %v6796_v15 = vpop.eup %6795  ;;  %v2596_v17 = vsel %vm730_vm0, %v2586_v3, 0.0  ;;  %v2635_v18 = vsel %vm2629_vm2, %v2586_v3, 0.0  ;;  %v2312_v54 = vmul.f32 0.5, %v7557_v11 }
 0x232   : > { %v6798_v20 = vpop.eup %6797  ;;  %v2594_v23 = vsel %vm730_vm0, %v2585_v4, 0.0  ;;  %v2633_v24 = vsel %vm2629_vm2, %v2585_v4, 0.0  ;;  %v7583_v22 = vpop.f32.mrb[44].mxu1  ;;  %v2338_v25 = vmul.f32 %v2330_v14, %v2306_v5  ;;  %v2333_v27 = vadd.f32 1.0, %v6796_v15  ;;  %v2668_v5 = vld [vmem:[%s8482_s9] sm:$0xff]  ;;  %v2669_v14 = vld [vmem:[%s8482_s9 + $0x8] sm:$0xff] }
 0x233   : > { %v2595_v28 = vadd.f32 %v2594_v23, %v2593_v2  ;;  %v2634_v29 = vadd.f32 %v2633_v24, %v2632_v63  ;;  %v2588_v30 = vmul.f32 %v7583_v22, %v7583_v22  ;;  %2695 = vrot.lane.b32.xlu1 %v7575_v1, %s6871_s0  ;;  %v7589_v32 = vpop.f32.mrb[45].mxu1  ;;  %v2332_v33 = vadd.f32 1.0, %v6798_v20  ;;  %v2670_v15 = vld [vmem:[%s8482_s9 + $0x10] sm:$0xff]  ;;  %v2672_v23 = vld [vmem:[%s8482_s9 + $0x20] sm:$0xff]  ;;  %v2673_v24 = vld [vmem:[%s8482_s9 + $0x28] sm:$0xff] }
 0x234   : > { %6183 = vmatprep.mubr.f32.mxu0 %v2338_v25  ;;  %v2587_v34 = vmul.f32 %v7589_v32, %v7589_v32  ;;  %v2341_v37 = vmul.f32 %v2333_v27, %v2309_v19  ;;  %2699 = vrot.lane.b32.xlu0 %v7589_v32, %s6871_s0  ;;  %v2313_v4 = vmul.f32 0.5, %v7549_v56  ;;  %v6627_v19 = vpack.c.bf16 %v2669_v14, %v2668_v5  ;;  %v2671_v56 = vld [vmem:[%s8482_s9 + $0x18] sm:$0xff] }
 0x235   : > { %v6800_v39 = vpop.eup %6799  ;;  %v2600_v21 = vsel %vm730_vm0, %v2588_v30, 0.0  ;;  %v2639_v40 = vsel %vm2629_vm2, %v2588_v30, 0.0  ;;  %v2597_v41 = vadd.f32 %v2596_v17, %v2595_v28  ;;  %v2636_v26 = vadd.f32 %v2635_v18, %v2634_v29  ;;  %6184 = vmatmul.mubr.f32.vlgmr.msra.gmra.mrb[40].mxu0 %v2339_v16 }
 0x236   : > { %v6802_v43 = vpop.eup %6801  ;;  %v2598_v44 = vsel %vm730_vm0, %v2587_v34, 0.0  ;;  %v2637_v45 = vsel %vm2629_vm2, %v2587_v34, 0.0  ;;  %v7601_v42 = vpop.f32.mrb[46].mxu1  ;;  %v2340_v46 = vmul.f32 %v2332_v33, %v2308_v35  ;;  %v2335_v47 = vadd.f32 1.0, %v6800_v39  ;;  %6628 = vmatprep.subr.bf16.mxu1 %v6627_v19 }
 0x237   : > { %v2599_v48 = vadd.f32 %v2598_v44, %v2597_v41  ;;  %v2638_v49 = vadd.f32 %v2637_v45, %v2636_v26  ;;  %v2590_v50 = vmul.f32 %v7601_v42, %v7601_v42  ;;  %v7605_v51 = vpop.f32.mrb[47].mxu1  ;;  %v2334_v52 = vadd.f32 1.0, %v6802_v43  ;;  %2701 = vrot.lane.b32.xlu1 %v7583_v22, %s6871_s0  ;;  %6630 = vmatpush3.bf16.msra.mxu1 %v6627_v19 }
 0x238   : > { %6186 = vmatprep.mubr.f32.mxu0 %v2340_v46  ;;  %v2589_v36 = vmul.f32 %v7605_v51, %v7605_v51  ;;  %2703 = vrot.lane.b32.xlu0 %v7605_v51, %s6871_s0  ;;  %v2343_v8 = vmul.f32 %v2335_v47, %v2311_v38  ;;  %v6631_v20 = vpack.c.bf16 %v2671_v56, %v2670_v15 }
 0x239   : > { %v6804_v6 = vpop.eup %6803  ;;  %v2604_v12 = vsel %vm730_vm0, %v2590_v50, 0.0  ;;  %v2601_v10 = vadd.f32 %v2600_v21, %v2599_v48  ;;  %v2640_v13 = vadd.f32 %v2639_v40, %v2638_v49  ;;  %6187 = vmatmul.mubr.f32.gmra.mrb[42].mxu0 %v2341_v37  ;;  %v2643_v57 = vsel %vm2629_vm2, %v2590_v50, 0.0 }
 0x23a   : > { %v6806_v9 = vpop.eup %6805  ;;  %v2602_v58 = vsel %vm730_vm0, %v2589_v36, 0.0  ;;  %v2641_v59 = vsel %vm2629_vm2, %v2589_v36, 0.0  ;;  %v2342_v31 = vmul.f32 %v2334_v52, %v2310_v53  ;;  %v2337_v62 = vadd.f32 1.0, %v6804_v6  ;;  %6632 = vmatprep.subr.bf16.mxu1 %v6631_v20  ;;  %v2674_v52 = vld [vmem:[%s8482_s9 + $0x30] sm:$0xff]  ;;  %v2675_v36 = vld [vmem:[%s8482_s9 + $0x38] sm:$0xff] }
 0x23b   : > { %v2603_v60 = vadd.f32 %v2602_v58, %v2601_v10  ;;  %v2642_v11 = vadd.f32 %v2641_v59, %v2640_v13  ;;  %v2336_v61 = vadd.f32 1.0, %v6806_v9  ;;  %2705 = vrot.lane.b32.xlu1 %v7601_v42, %s6871_s0  ;;  %v6635_v30 = vpack.c.bf16 %v2673_v24, %v2672_v23  ;;  %6634 = vmatpush3.bf16.msra.mxu1 %v6631_v20 }
 0x23c   : > { %6189 = vmatprep.mubr.f32.mxu0 %v2342_v31  ;;  %v2345_v18 = vmul.f32 %v2337_v62, %v2313_v4  ;;  %v6639_v53 = vpack.c.bf16 %v2675_v36, %v2674_v52 }
 0x23d   : > { %v2605_v2 = vadd.f32 %v2604_v12, %v2603_v60  ;;  %v2644_v63 = vadd.f32 %v2643_v57, %v2642_v11  ;;  %6190 = vmatmul.mubr.f32.gmra.mrb[44].mxu0 %v2343_v8  ;;  %v2344_v3 = vmul.f32 %v2336_v61, %v2312_v54  ;;  %6636 = vmatprep.subr.bf16.mxu1 %v6635_v30 }
 0x23f   : > { %v2606_v16 = vrot.slane %v2605_v2, 4  ;;  %v2645_v17 = vrot.slane %v2644_v63, 4  ;;  %6192 = vmatprep.mubr.f32.mxu0 %v2344_v3  ;;  %6638 = vmatpush3.bf16.msra.mxu1 %v6635_v30 }
 0x240   : > { %6640 = vmatprep.subr.bf16.mxu1 %v6639_v53 }
 0x241   : > { %v2607_v25 = vadd.f32 %v2606_v16, %v2605_v2  ;;  %v2646_v27 = vadd.f32 %v2645_v17, %v2644_v63  ;;  %6193 = vmatmul.mubr.f32.gmra.mrb[46].mxu0 %v2345_v18 }
 0x243   : > { %v2608_v28 = vrot.slane %v2607_v25, 2  ;;  %v2647_v29 = vrot.slane %v2646_v27, 2  ;;  %6642 = vmatpush3.bf16.msra.mxu1 %v6639_v53 }
 0x245   : > { %v2609_v33 = vadd.f32 %v2608_v28, %v2607_v25  ;;  %v2648_v34 = vadd.f32 %v2647_v29, %v2646_v27  ;;  %v6872_v25 = vmov 0  }
 0x247   : > { %v2610_v35 = vrot.slane %v2609_v33, 1  ;;  %v2649_v37 = vrot.slane %v2648_v34, 1 }
 0x249   : > { %v2611_v38 = vadd.f32 %v2610_v35, %v2609_v33  ;;  %v2650_v39 = vadd.f32 %v2649_v37, %v2648_v34  ;;  %v3173_v33 = vld [vmem:[%s8486_s13] sm:$0xff]  ;;  %v3175_v34 = vld [vmem:[%s8486_s13 + $0x10] sm:$0xff]  ;;  %v3174_v35 = vld [vmem:[%s8486_s13 + $0x8] sm:$0xff] }
 0x24a   : > { %v3176_v37 = vld [vmem:[%s8486_s13 + $0x18] sm:$0xff] }
 0x24b   : > { %6807 = vrsqrt.f32 %v2611_v38  ;;  %vm2614_vm3 = vcmp.eq.f32.partialorder %v2611_v38, inf  ;;  %v2617_v26 = vand.u32 2147483648, %v2611_v38  ;;  %vm2616_vm4 = vcmp.eq.f32.partialorder %v2611_v38, 0.0 }
 0x24c   : > { %6809 = vrsqrt.f32 %v2650_v39  ;;  %vm2653_vm5 = vcmp.eq.f32.partialorder %v2650_v39, inf  ;;  %v2656_v45 = vand.u32 2147483648, %v2650_v39  ;;  %vm2655_vm6 = vcmp.eq.f32.partialorder %v2650_v39, 0.0 }
 0x255   : > { %v6808_v21 = vpop.eup %6807 }
 0x256   : > { %v6810_v40 = vpop.eup %6809  ;;  %v2613_v41 = vmul.f32 %v6808_v21, %v2611_v38 }
 0x257   : > { %v2652_v43 = vmul.f32 %v6810_v40, %v2650_v39 }
 0x258   : > { %v2615_v44 = vsel %vm2614_vm3, %v2611_v38, %v2613_v41 }
 0x259   : > { %v2618_v46 = vsel %vm2616_vm4, %v2617_v26, %v2615_v44  ;;  %v2654_v47 = vsel %vm2653_vm5, %v2650_v39, %v2652_v43 }
 0x25a   : > { %v2619_v48 = vmax.f32 %v2618_v46, 1e-12  ;;  %v2657_v49 = vsel %vm2655_vm6, %v2656_v45, %v2654_v47 }
 0x25b   : > { %v2658_v50 = vmax.f32 %v2657_v49, 1e-12 }
 0x25c   : > { %6811 = vrcp.f32 %v2619_v48 }
 0x25d   : > { %6813 = vrcp.f32 %v2658_v50 }
 0x266   : > { %v6812_v54 = vpop.eup %6811 }
 0x267   : > { %v6814_v6 = vpop.eup %6813  ;;  %v7647_v12 = vmul.f32 %v6812_v54, %v7555_v7  ;;  %v7650_v10 = vmul.f32 %v6812_v54, %v7547_v55  ;;  %v7653_v13 = vmul.f32 %v6812_v54, %v7575_v1  ;;  %v7656_v8 = vmul.f32 %v6812_v54, %v7567_v0 }
 0x268   : > { %v2662_v9 = vmul.f32 %v6814_v6, %v7575_v1  ;;  %v2663_v57 = vmul.f32 %v6814_v6, %v7567_v0  ;;  %v2660_v58 = vmul.f32 %v6814_v6, %v7555_v7  ;;  %v2661_v59 = vmul.f32 %v6814_v6, %v7547_v55 }
 0x269   : > { %v2666_v31 = vmul.f32 %v6814_v6, %v7605_v51  ;;  %v2667_v60 = vmul.f32 %v6814_v6, %v7601_v42  ;;  %v2664_v11 = vmul.f32 %v6814_v6, %v7589_v32  ;;  %v2665_v61 = vmul.f32 %v6814_v6, %v7583_v22 }
 0x26a   : > { %v6774_v62 = vpack.i.bf16 %v2663_v57, %v2662_v9  ;;  %v6769_v2 = vpack.i.bf16 %v2661_v59, %v2660_v58  ;;  %v7667_v63 = vmul.f32 %v6812_v54, %v7589_v32  ;;  %v7670_v3 = vmul.f32 %v6812_v54, %v7583_v22 }
 0x26b   : > { %v6784_v4 = vpack.i.bf16 %v2667_v60, %v2666_v31  ;;  %v6779_v5 = vpack.i.bf16 %v2665_v61, %v2664_v11  ;;  %v7673_v14 = vmul.f32 %v6812_v54, %v7605_v51  ;;  %v7676_v15 = vmul.f32 %v6812_v54, %v7601_v42 }
 0x26c   : > { %6775 = vrot.lane.b32.xlu1 %v6774_v62, %s6871_s0  ;;  %6770 = vrot.lane.b32.xlu0 %v6769_v2, %s6871_s0 }
 0x270   : > { %6785 = vrot.lane.b32.xlu1 %v6784_v4, %s6871_s0  ;;  %6780 = vrot.lane.b32.xlu0 %v6779_v5, %s6871_s0  ;;  %s6874_s0 = smov 64  }
 0x299   : > { %3012 = vxpose.xlu1.b32.start [1/8] (short) (narrow) %v7647_v12, 32 }
 0x29d   : > { %3013 = vxpose.xlu1.b32.cont [2/8] (short) (narrow) %v7650_v10, 32  ;;  %v2694_v16 = vpop.permute.xlu0 %2693 }
 0x2a1   : > { %3014 = vxpose.xlu1.b32.cont [3/8] (short) (narrow) %v7653_v13, 32  ;;  %v2692_v17 = vpop.permute.xlu0 %2691  ;;  %v2698_v18 = vpop.permute.xlu1 %2697 }
 0x2a2   : > { %2715 = vxpose.xlu0.b32.start [1/8] (short) (narrow) %v2692_v17, 32  ;;  %v3202_v17 = vld [vmem:[%s8492_s19 + $0x8] sm:$0xff] }
 0x2a3   : > { %vm3206_vm7 = vcmp.gt.f32.partialorder %v3202_v17, 0.5 }
 0x2a5   : > { %3015 = vxpose.xlu1.b32.cont [4/8] (short) (narrow) %v7656_v8, 32  ;;  %v2696_v19 = vpop.permute.xlu1 %2695 }
 0x2a6   : > { %2716 = vxpose.xlu0.b32.cont [2/8] (short) (narrow) %v2694_v16, 32  ;;  %v2700_v56 = vpop.permute.xlu0 %2699 }
 0x2a9   : > { %3016 = vxpose.xlu1.b32.cont [5/8] (short) (narrow) %v7667_v63, 32  ;;  %v2702_v20 = vpop.permute.xlu1 %2701 }
 0x2aa   : > { %2717 = vxpose.xlu0.b32.cont [3/8] (short) (narrow) %v2696_v19, 32  ;;  %v2704_v23 = vpop.permute.xlu0 %2703  ;;  %v3201_v19 = vld [vmem:[%s8492_s19] sm:$0xff] }
 0x2ab   : > { %vm3205_vm8 = vcmp.gt.f32.partialorder %v3201_v19, 0.5 }
 0x2ad   : > { %3017 = vxpose.xlu1.b32.cont [6/8] (short) (narrow) %v7670_v3, 32  ;;  %v2706_v24 = vpop.permute.xlu1 %2705 }
 0x2ae   : > { %2718 = vxpose.xlu0.b32.cont [4/8] (short) (narrow) %v2698_v18, 32 }
 0x2b1   : > { %3018 = vxpose.xlu1.b32.cont [7/8] (short) (narrow) %v7673_v14, 32 }
 0x2b2   : > { %2719 = vxpose.xlu0.b32.cont [5/8] (short) (narrow) %v2700_v56, 32 }
 0x2b5   : > { %3019 = vxpose.xlu1.b32.end [8/8] (short) (narrow) %v7676_v15, 32 }
 0x2b6   : > { %2720 = vxpose.xlu0.b32.cont [6/8] (short) (narrow) %v2702_v20, 32 }
 0x2ba   : > { %2721 = vxpose.xlu0.b32.cont [7/8] (short) (narrow) %v2704_v23, 32 }
 0x2be   : > { %2722 = vxpose.xlu0.b32.end [8/8] (short) (narrow) %v2706_v24, 32 }
 0x2d3   : > { %6790 = vset.pattern.permute.xlu1 %v6872_v25 }
 0x2d4   : > { %3184 = vperm.xlu1 %6790, %v3174_v35   ;;  %v3203_v35 = vld [vmem:[%s8492_s19 + $0x10] sm:$0xff] }
 0x2d5   : > { %vm3207_vm10 = vcmp.gt.f32.partialorder %v3203_v35, 0.5  ;;  %v2847_v35 = vld [vmem:[%s8484_s11 + $0x18] sm:$0xff] }
 0x2d8   : > { %3194 = vperm.xlu1 %6790, %v3176_v37  }
 0x2de   : > { %v6771_v27 = vpop.permute.xlu0 %6770  ;;  %v6776_v45 = vpop.permute.xlu1 %6775 }
 0x2df   : > { %v6773_v28 = vunpack.i.h.bf16 %v6771_v27  ;;  %v6772_v29 = vunpack.i.l.bf16 %v6771_v27  ;;  %v6778_v49 = vunpack.i.h.bf16 %v6776_v45  ;;  %v6777_v50 = vunpack.i.l.bf16 %v6776_v45 }
 0x2e1   : > { %v6659_v30 = vpack.c.bf16 %v6773_v28, %v6772_v29  ;;  %v6663_v6 = vpack.c.bf16 %v6778_v49, %v6777_v50 }
 0x2e2   : > { %v6781_v46 = vpop.permute.xlu0 %6780  ;;  %v6786_v47 = vpop.permute.xlu1 %6785 }
 0x2e3   : > { %6660 = vmatprep.subr.bf16.mxu1 %v6659_v30  ;;  %v6783_v53 = vunpack.i.h.bf16 %v6781_v46  ;;  %v6782_v54 = vunpack.i.l.bf16 %v6781_v46  ;;  %v6788_v57 = vunpack.i.h.bf16 %v6786_v47  ;;  %v6787_v58 = vunpack.i.l.bf16 %v6786_v47 }
 0x2e5   : > { %v6667_v59 = vpack.c.bf16 %v6783_v53, %v6782_v54  ;;  %v6671_v11 = vpack.c.bf16 %v6788_v57, %v6787_v58 }
 0x2e7   : > { %6789 = vset.pattern.permute.xlu0 %v6872_v25  ;;  %v3204_v25 = vld [vmem:[%s8492_s19 + $0x18] sm:$0xff] }
 0x2e8   : > { %3179 = vperm.xlu0 %6789, %v3173_v33   ;;  %vm3208_vm9 = vcmp.gt.f32.partialorder %v3204_v25, 0.5 }
 0x2ec   : > { %3189 = vperm.xlu0 %6789, %v3175_v34  }
 0x2f0   : > { %2861 = vrot.lane.b32.xlu0 %v7547_v55, %s6873_s2 }
 0x2f4   : > { %2867 = vrot.lane.b32.xlu0 %v7589_v32, %s6873_s2 }
 0x2f8   : > { %2871 = vrot.lane.b32.xlu0 %v7605_v51, %s6873_s2 }
 0x308   : > { %v7708_v38 = vpop.f32.mrb[40].mxu0 }
 0x309   : > { %v7710_v39 = vpop.f32.mrb[41].mxu0 }
 0x30c   : > { %v7712_v21 = vpop.f32.mrb[42].mxu0 }
 0x30d   : > { %v7714_v40 = vpop.f32.mrb[43].mxu0 }
 0x310   : > { %v7716_v41 = vpop.f32.mrb[44].mxu0 }
 0x311   : > { %v7718_v26 = vpop.f32.mrb[45].mxu0 }
 0x314   : > { %v7720_v43 = vpop.f32.mrb[46].mxu0 }
 0x315   : > { %v7722_v44 = vpop.f32.mrb[47].mxu0 }
 0x319   : > { %v3028_v36 = vpop.trf.xlu1 }
 0x31d   : > { %v3029_v31 = vpop.trf.xlu1 }
 0x321   : > { %v3030_v61 = vpop.trf.xlu1 }
 0x322   : > { %v2731_v48 = vpop.trf.xlu0 }
 0x323   : > { %6231 = vmatprep.mubr.msk.f32.mxu1 %vm868_vm1, %v2731_v48 }
 0x325   : > { %v3031_v62 = vpop.trf.xlu1 }
 0x326   : > { %v2732_v52 = vpop.trf.xlu0 }
 0x327   : > { %6232 = vmatmul.mubr.msk.f32.vlgmr.msra.gmra.mrb[48].mxu1 %vm868_vm1, %v2732_v52 }
 0x328   : > { %6662 = vmatpush3.bf16.msra.mxu1 %v6659_v30 }
 0x329   : > { %6664 = vmatprep.subr.bf16.mxu1 %v6663_v6 }
 0x32a   : > { %v2733_v9 = vpop.trf.xlu0 }
 0x32b   : > { %6234 = vmatprep.mubr.msk.f32.mxu1 %vm868_vm1, %v2733_v9 }
 0x32c   : > { %6666 = vmatpush3.bf16.msra.mxu1 %v6663_v6 }
 0x32d   : > { %6668 = vmatprep.subr.bf16.mxu1 %v6667_v59 }
 0x32e   : > { %v2734_v60 = vpop.trf.xlu0 }
 0x32f   : > { %6235 = vmatmul.mubr.msk.f32.gmra.mrb[50].mxu1 %vm868_vm1, %v2734_v60 }
 0x330   : > { %6670 = vmatpush3.bf16.msra.mxu1 %v6667_v59  ;;  %6275 = vmatprep.mubr.msk.f32.mxu1 %vm868_vm1, %v3028_v36 }
 0x331   : > { %6672 = vmatprep.subr.bf16.mxu1 %v6671_v11 }
 0x334   : > { %6674 = vmatpush3.bf16.msra.mxu1 %v6671_v11 }
 0x337   : > { %6276 = vmatmul.mubr.msk.f32.vlgmr.msra.gmra.mrb[52].mxu1 %vm868_vm1, %v3029_v31 }
 0x338   : > { %6278 = vmatprep.mubr.msk.f32.mxu1 %vm868_vm1, %v3030_v61 }
 0x33b   : > { %6279 = vmatmul.mubr.msk.f32.gmra.mrb[54].mxu1 %vm868_vm1, %v3031_v62 }
 0x353   : > { %v3185_v18 = vpop.permute.xlu1 %3184 }
 0x357   : > { %v3195_v29 = vpop.permute.xlu1 %3194 }
 0x367   : > { %v3180_v56 = vpop.permute.xlu0 %3179 }
 0x36b   : > { %v3190_v37 = vpop.permute.xlu0 %3189 }
 0x36f   : > { %v2862_v53 = vpop.permute.xlu0 %2861 }
 0x373   : > { %v7768_v54 = vpop.permute.xlu0 %2867 }
 0x377   : > { %v7770_v6 = vpop.permute.xlu0 %2871 }
 0x3fa   : > { %v7732_v2 = vpop.f32.mrb[48].mxu1 }
 0x3fb   : > { %v7734_v4 = vpop.f32.mrb[49].mxu1 }
 0x402   : > { %v7736_v5 = vpop.f32.mrb[50].mxu1 }
 0x403   : > { %v7738_v16 = vpop.f32.mrb[51].mxu1 }
 0x40a   : > { %v6277_v20 = vpop.f32.mrb[52].mxu1 }
 0x40b   : > { %v3198_v23 = vmul.f32 %v6277_v20, %v3185_v18  ;;  %v3154_v24 = vpop.f32.mrb[53].mxu1 }
 0x40c   : > { %v3197_v27 = vmul.f32 %v3180_v56, %v3154_v24 }
 0x40d   : > { %v3210_v28 = vsel %vm3206_vm7, %v3198_v23, -1e+30 }
 0x40e   : > { %v6280_v30 = vpop.f32.mrb[54].mxu1  ;;  %v3216_v33 = vsel %vm730_vm0, %v3210_v28, -inf  ;;  %v3209_v34 = vsel %vm3205_vm8, %v3197_v27, -1e+30 }
 0x40f   : > { %v3200_v45 = vmul.f32 %v6280_v30, %v3195_v29  ;;  %v3164_v46 = vpop.f32.mrb[55].mxu1  ;;  %3217 = vmax.xlane.f32.xlu1 %v3216_v33  ;;  %v3213_v47 = vsel %vm730_vm0, %v3209_v34, -inf  ;;  %v2844_v29 = vld [vmem:[%s8484_s11] sm:$0xff]  ;;  %v2845_v30 = vld [vmem:[%s8484_s11 + $0x8] sm:$0xff] }
 0x410   : > { %v3199_v48 = vmul.f32 %v3190_v37, %v3164_v46  ;;  %3214 = vmax.xlane.f32.xlu0 %v3213_v47  ;;  %v6643_v33 = vpack.c.bf16 %v2845_v30, %v2844_v29  ;;  %v2850_v47 = vld [vmem:[%s8484_s11 + $0x30] sm:$0xff] }
 0x411   : > { %v3212_v49 = vsel %vm3208_vm9, %v3200_v45, -1e+30  ;;  %v2849_v45 = vld [vmem:[%s8484_s11 + $0x28] sm:$0xff] }
 0x412   : > { %v3222_v50 = vsel %vm730_vm0, %v3212_v49, -inf  ;;  %v3211_v52 = vsel %vm3207_vm10, %v3199_v48, -1e+30  ;;  %6644 = vmatprep.subr.bf16.mxu0 %v6643_v33 }
 0x413   : > { %v3219_v36 = vsel %vm730_vm0, %v3211_v52, -inf  ;;  %6646 = vmatpush3.bf16.msra.mxu0 %v6643_v33  ;;  %v5492_v33 = vld [vmem:[%s8483_s10] ss:$0 sm:$0xff] }
 0x414   : > { %3223 = vmax.xlane.f32.xlu0 %v3222_v50 }
 0x418   : > { %3220 = vmax.xlane.f32.xlu0 %v3219_v36 }
 0x420   : > { %2859 = vrot.lane.b32.xlu1 %v7555_v7, %s6873_s2 }
 0x424   : > { %2863 = vrot.lane.b32.xlu1 %v7575_v1, %s6873_s2 }
 0x428   : > { %2865 = vrot.lane.b32.xlu1 %v7567_v0, %s6873_s2 }
 0x42c   : > { %2869 = vrot.lane.b32.xlu1 %v7583_v22, %s6873_s2 }
 0x42e   : > { %3259 = vrot.lane.b32.xlu0 %v7547_v55, %s6874_s0 }
 0x430   : > { %2873 = vrot.lane.b32.xlu1 %v7601_v42, %s6873_s2  ;;  %s6880_s2 = smov 112  }
 0x49c   : > { %v3218_v9 = vpop.xlane.xlu1 %3217 }
 0x49d   : > { %v3226_v57 = vsub.f32 %v3210_v28, %v3218_v9  ;;  %v3215_v58 = vpop.xlane.xlu0 %3214 }
 0x49e   : > { %v3225_v59 = vsub.f32 %v3209_v34, %v3215_v58  ;;  %v2846_v34 = vld [vmem:[%s8484_s11 + $0x10] sm:$0xff] }
 0x49f   : > { %v3231_v31 = vmul.f32 1.442695, %v3226_v57  ;;  %v6647_v37 = vpack.c.bf16 %v2847_v35, %v2846_v34  ;;  %v2826_v34 = vadd.f32 %v5492_v33, %v7734_v4  ;;  %v3406_v4 = vld [vmem:[%s8490_s17] sm:$0xff] }
 0x4a0   : > { %v3229_v60 = vmul.f32 1.442695, %v3225_v59 }
 0x4a1   : > { %6815 = vpow2.f32 %v3231_v31  ;;  %v3224_v11 = vpop.xlane.xlu0 %3223  ;;  %6648 = vmatprep.subr.bf16.mxu0 %v6647_v37 }
 0x4a2   : > { %6817 = vpow2.f32 %v3229_v60  ;;  %v3228_v61 = vsub.f32 %v3212_v49, %v3224_v11  ;;  %6650 = vmatpush3.bf16.msra.mxu0 %v6647_v37  ;;  %v2831_v37 = vadd.f32 %v7732_v2, %v5492_v33  ;;  %v3408_v2 = vld [vmem:[%s8490_s17 + $0x10] sm:$0xff] }
 0x4a4   : > { %v3235_v62 = vmul.f32 1.442695, %v3228_v61 }
 0x4a5   : > { %v3221_v55 = vpop.xlane.xlu0 %3220 }
 0x4a6   : > { %6819 = vpow2.f32 %v3235_v62  ;;  %v3227_v17 = vsub.f32 %v3211_v52, %v3221_v55 }
 0x4a8   : > { %v3233_v18 = vmul.f32 1.442695, %v3227_v17 }
 0x4a9   : > { %v3260_v52 = vpop.permute.xlu0 %3259 }
 0x4aa   : > { %6821 = vpow2.f32 %v3233_v18 }
 0x4ab   : > { %v6816_v19 = vpop.eup %6815 }
 0x4ac   : > { %v6818_v56 = vpop.eup %6817  ;;  %v3240_v20 = vsel %vm730_vm0, %v6816_v19, 0.0 }
 0x4ad   : > { %3241 = vadd.xlane.f32.xlu1 %v3240_v20  ;;  %v3237_v23 = vsel %vm730_vm0, %v6818_v56, 0.0 }
 0x4ae   : > { %3238 = vadd.xlane.f32.xlu0 %v3237_v23  ;;  %v3546_v23 = vld [vmem:[%s8495_s22] sm:$0xff] }
 0x4b0   : > { %v7774_v24 = vpop.eup %6819 }
 0x4b1   : > { %v3246_v25 = vsel %vm730_vm0, %v7774_v24, 0.0 }
 0x4b2   : > { %3247 = vadd.xlane.f32.xlu0 %v3246_v25 }
 0x4b4   : > { %v7778_v27 = vpop.eup %6821 }
 0x4b5   : > { %v3243_v28 = vsel %vm730_vm0, %v7778_v27, 0.0 }
 0x4b6   : > { %3244 = vadd.xlane.f32.xlu0 %v3243_v28 }
 0x4be   : > { %3257 = vrot.lane.b32.xlu1 %v7555_v7, %s6874_s0  ;;  %v2848_v7 = vld [vmem:[%s8484_s11 + $0x20] sm:$0xff] }
 0x4bf   : > { %v6651_v46 = vpack.c.bf16 %v2849_v45, %v2848_v7  ;;  %v2836_v7 = vadd.f32 %v5492_v33, %v7738_v16  ;;  %v2841_v45 = vadd.f32 %v7736_v5, %v5492_v33  ;;  %v3409_v16 = vld [vmem:[%s8490_s17 + $0x18] sm:$0xff] }
 0x4c0   : > { %v6691_v5 = vpack.c.bf16 %v3409_v16, %v3408_v2 }
 0x4c1   : > { %6652 = vmatprep.subr.bf16.mxu0 %v6651_v46 }
 0x4c2   : > { %3261 = vrot.lane.b32.xlu1 %v7575_v1, %s6874_s0  ;;  %v2851_v1 = vld [vmem:[%s8484_s11 + $0x38] sm:$0xff]  ;;  %6654 = vmatpush3.bf16.msra.mxu0 %v6651_v46  ;;  %v3407_v46 = vld [vmem:[%s8490_s17 + $0x8] sm:$0xff] }
 0x4c3   : > { %v6655_v48 = vpack.c.bf16 %v2851_v1, %v2850_v47  ;;  %v6687_v47 = vpack.c.bf16 %v3407_v46, %v3406_v4 }
 0x4c5   : > { %6656 = vmatprep.subr.bf16.mxu0 %v6655_v48  ;;  %6688 = vmatprep.subr.bf16.mxu1 %v6687_v47 }
 0x4c6   : > { %3263 = vrot.lane.b32.xlu1 %v7567_v0, %s6874_s0  ;;  %6658 = vmatpush3.bf16.msra.mxu0 %v6655_v48  ;;  %v2860_v0 = vpop.permute.xlu1 %2859 }
 0x4c7   : > { %6690 = vmatpush3.bf16.msra.mxu1 %v6687_v47 }
 0x4c8   : > { %6692 = vmatprep.subr.bf16.mxu1 %v6691_v5 }
 0x4ca   : > { %3265 = vrot.lane.b32.xlu1 %v7589_v32, %s6874_s0  ;;  %v2864_v49 = vpop.permute.xlu1 %2863 }
 0x4cb   : > { %6694 = vmatpush3.bf16.msra.mxu1 %v6691_v5 }
 0x4ce   : > { %3267 = vrot.lane.b32.xlu1 %v7583_v22, %s6874_s0  ;;  %v2866_v50 = vpop.permute.xlu1 %2865 }
 0x4d2   : > { %3269 = vrot.lane.b32.xlu1 %v7605_v51, %s6874_s0  ;;  %v2870_v32 = vpop.permute.xlu1 %2869 }
 0x4d6   : > { %3271 = vrot.lane.b32.xlu1 %v7601_v42, %s6874_s0  ;;  %v2874_v22 = vpop.permute.xlu1 %2873  ;;  %s8520_s0 = sshll.u32 %s8523_s30, 6 }
 0x4d7   : > { %s8023_s25 = scalar_lea.vmem %s8496_s23, %s8520_s0 }
 0x4e3   : > { %2883 = vxpose.xlu0.b32.start [1/8] (short) (narrow) %v2860_v0, 32 }
 0x4e7   : > { %2884 = vxpose.xlu0.b32.cont [2/8] (short) (narrow) %v2862_v53, 32 }
 0x4eb   : > { %2885 = vxpose.xlu0.b32.cont [3/8] (short) (narrow) %v2864_v49, 32 }
 0x4ef   : > { %2886 = vxpose.xlu0.b32.cont [4/8] (short) (narrow) %v2866_v50, 32 }
 0x4f3   : > { %2887 = vxpose.xlu0.b32.cont [5/8] (short) (narrow) %v7768_v54, 32 }
 0x4f7   : > { %2888 = vxpose.xlu0.b32.cont [6/8] (short) (narrow) %v2870_v32, 32 }
 0x4fb   : > { %2889 = vxpose.xlu0.b32.cont [7/8] (short) (narrow) %v7770_v6, 32 }
 0x4ff   : > { %2890 = vxpose.xlu0.b32.end [8/8] (short) (narrow) %v2874_v22, 32 }
 0x53a   : > { %v3242_v51 = vpop.xlane.xlu1 %3241 }
 0x53b   : > { %6823 = vrcp.f32 %v3242_v51  ;;  %v3239_v36 = vpop.xlane.xlu0 %3238 }
 0x53c   : > { %6825 = vrcp.f32 %v3239_v36 }
 0x53e   : > { %v3258_v31 = vpop.permute.xlu1 %3257 }
 0x53f   : > { %v3248_v6 = vpop.xlane.xlu0 %3247 }
 0x542   : > { %v3262_v55 = vpop.permute.xlu1 %3261 }
 0x543   : > { %v3245_v59 = vpop.xlane.xlu0 %3244 }
 0x544   : > { %6827 = vrcp.f32 %v3245_v59 }
 0x545   : > { %v6824_v42 = vpop.eup %6823  ;;  %6829 = vrcp.f32 %v3248_v6 }
 0x546   : > { %v6826_v9 = vpop.eup %6825  ;;  %v3252_v53 = vmul.f32 %v6824_v42, %v6816_v19 }
 0x547   : > { %v3250_v57 = vmul.f32 %v6826_v9, %v6818_v56  ;;  %v3264_v56 = vpop.permute.xlu1 %3263 }
 0x549   : > { %v6675_v54 = vpack.c.bf16 %v3252_v53, %v3250_v57  ;;  %v3647_v53 = vld [vmem:[%s8493_s20 + $0x8] sm:$0xff]  ;;  %v3646_v57 = vld [vmem:[%s8493_s20] sm:$0xff] }
 0x54b   : > { %6677 = vmatprep.subr.msk.bf16.mxu0 %vm7824_vm11, %v6675_v54  ;;  %v3266_v28 = vpop.permute.xlu1 %3265 }
 0x54e   : > { %v6828_v60 = vpop.eup %6827 }
 0x54f   : > { %v6830_v11 = vpop.eup %6829  ;;  %v3254_v62 = vmul.f32 %v6828_v60, %v7778_v27  ;;  %v3268_v29 = vpop.permute.xlu1 %3267  ;;  %v3648_v60 = vld [vmem:[%s8493_s20 + $0x10] sm:$0xff] }
 0x550   : > { %v3256_v17 = vmul.f32 %v6830_v11, %v7774_v24  ;;  %v3547_v24 = vld [vmem:[%s8495_s22 + $0x8] sm:$0xff] }
 0x551   : > { %v6695_v25 = vpack.c.bf16 %v3547_v24, %v3546_v23 }
 0x552   : > { %v6681_v19 = vpack.c.bf16 %v3256_v17, %v3254_v62 }
 0x553   : > { %v3270_v30 = vpop.permute.xlu1 %3269 }
 0x557   : > { %v3272_v35 = vpop.permute.xlu1 %3271 }
 0x563   : > { %v2899_v61 = vpop.trf.xlu0 }
 0x564   : > { %6253 = vmatprep.mubr.msk.f32.mxu0 %vm868_vm1, %v2899_v61 }
 0x567   : > { %v2900_v18 = vpop.trf.xlu0 }
 0x568   : > { %6254 = vmatmul.mubr.msk.f32.vlgmr.msra.gmra.mrb[48].mxu0 %vm868_vm1, %v2900_v18 }
 0x569   : > { %6680 = vmatpush3.bf16.xpose.msk.msra.mxu0 %vm7824_vm11, %v6675_v54 }
 0x56a   : > { %6683 = vmatprep.subr.msk.bf16.mxu0 %vm7824_vm11, %v6681_v19 }
 0x56b   : > { %v2901_v20 = vpop.trf.xlu0 }
 0x56c   : > { %6256 = vmatprep.mubr.msk.f32.mxu0 %vm868_vm1, %v2901_v20 }
 0x56f   : > { %v2902_v27 = vpop.trf.xlu0 }
 0x570   : > { %6257 = vmatmul.mubr.msk.f32.gmra.mrb[50].mxu0 %vm868_vm1, %v2902_v27 }
 0x571   : > { %6686 = vmatpush3.bf16.xpose.msk.msra.mxu0 %vm7824_vm11, %v6681_v19  ;;  %6289 = vmatprep.mubr.msk.f32.mxu0 %vm730_vm0, %v3258_v31  ;;  %v3649_v31 = vld [vmem:[%s8493_s20 + $0x18] sm:$0xff] }
 0x572   : > { %6696 = vmatprep.subr.bf16.mxu0 %v6695_v25 }
 0x578   : > { %6290 = vmatmul.mubr.msk.f32.vlgmr.msra.gmra.mrb[52].mxu0 %vm730_vm0, %v3260_v52 }
 0x579   : > { %6292 = vmatprep.mubr.msk.f32.mxu0 %vm730_vm0, %v3262_v55  ;;  %6698 = vmatpush3.bf16.msra.mxu0 %v6695_v25 }
 0x57c   : > { %6293 = vmatmul.mubr.msk.f32.gmra.mrb[54].mxu0 %vm730_vm0, %v3264_v56 }
 0x57d   : > { %6295 = vmatprep.mubr.msk.f32.mxu0 %vm730_vm0, %v3266_v28 }
 0x580   : > { %6296 = vmatmul.mubr.msk.f32.gmra.mrb[56].mxu0 %vm730_vm0, %v3268_v29 }
 0x581   : > { %6298 = vmatprep.mubr.msk.f32.mxu0 %vm730_vm0, %v3270_v30 }
 0x584   : > { %6299 = vmatmul.mubr.msk.f32.gmra.mrb[58].mxu0 %vm730_vm0, %v3272_v35 }
 0x585   : > { %6325 = vmatprep.mubr.msk.f32.mxu0 %vm3548_vm12, %v2826_v34 }
 0x588   : > { %6326 = vmatmul.mubr.msk.f32.vlgmr.msra.gmra.mrb[60].mxu0 %vm3548_vm12, %v2831_v37 }
 0x589   : > { %6328 = vmatprep.mubr.msk.f32.mxu0 %vm3548_vm12, %v2836_v7 }
 0x58c   : > { %6329 = vmatmul.mubr.msk.f32.gmra.mrb[62].mxu0 %vm3548_vm12, %v2841_v45 }
 0x63b   : > { %v7879_v1 = vpop.f32.mrb[48].mxu0 }
 0x63c   : > { %v7881_v48 = vpop.f32.mrb[49].mxu0 }
 0x643   : > { %v7883_v0 = vpop.f32.mrb[50].mxu0 }
 0x644   : > { %v7885_v49 = vpop.f32.mrb[51].mxu0 }
 0x64b   : > { %v6291_v50 = vpop.f32.mrb[52].mxu0 }
 0x64c   : > { %v3367_v32 = vpop.f32.mrb[53].mxu0 }
 0x64d   : > { %6309 = vmatprep.mubr.msk.f32.mxu1 %vm730_vm0, %v3367_v32  ;;  %v3847_v32 = vld [vmem:[%s8494_s21 + $0x8] sm:$0xff] }
 0x64e   : > { %6310 = vmatmul.mubr.msk.f32.vlgmr.msra.gmra.mrb[56].mxu1 %vm730_vm0, %v6291_v50  ;;  %v3846_v50 = vld [vmem:[%s8494_s21] sm:$0xff] }
 0x64f   : > { %v6294_v22 = vpop.f32.mrb[54].mxu0 }
 0x650   : > { %v3377_v52 = vpop.f32.mrb[55].mxu0 }
 0x651   : > { %6312 = vmatprep.mubr.msk.f32.mxu1 %vm730_vm0, %v3377_v52 }
 0x652   : > { %6313 = vmatmul.mubr.msk.f32.gmra.mrb[58].mxu1 %vm730_vm0, %v6294_v22  ;;  %v6707_v22 = vpack.c.bf16 %v3847_v32, %v3846_v50 }
 0x653   : > { %v6297_v51 = vpop.f32.mrb[56].mxu0 }
 0x654   : > { %v3387_v36 = vpop.f32.mrb[57].mxu0  ;;  %6708 = vmatprep.subr.bf16.mxu0 %v6707_v22 }
 0x655   : > { %6315 = vmatprep.mubr.msk.f32.mxu1 %vm730_vm0, %v3387_v36  ;;  %6710 = vmatpush3.bf16.msra.mxu0 %v6707_v22  ;;  %v3848_v36 = vld [vmem:[%s8494_s21 + $0x10] sm:$0xff] }
 0x656   : > { %6316 = vmatmul.mubr.msk.f32.gmra.mrb[60].mxu1 %vm730_vm0, %v6297_v51 }
 0x657   : > { %v6300_v42 = vpop.f32.mrb[58].mxu0 }
 0x658   : > { %v3397_v9 = vpop.f32.mrb[59].mxu0 }
 0x659   : > { %6318 = vmatprep.mubr.msk.f32.mxu1 %vm730_vm0, %v3397_v9 }
 0x65a   : > { %6319 = vmatmul.mubr.msk.f32.gmra.mrb[62].mxu1 %vm730_vm0, %v6300_v42  ;;  %v3849_v42 = vld [vmem:[%s8494_s21 + $0x18] sm:$0xff] }
 0x65b   : > { %v6327_v58 = vpop.f32.mrb[60].mxu0  ;;  %6339 = vmatprep.mubr.msk.f32.mxu1 %vm730_vm0, %v7647_v12  ;;  %v6711_v9 = vpack.c.bf16 %v3849_v42, %v3848_v36 }
 0x65c   : > { %v3651_v54 = vmul.f32 %v6327_v58, %v3647_v53  ;;  %v3627_v6 = vpop.f32.mrb[61].mxu0  ;;  %v5518_v58 = vld [vmem:[%s8491_s18] ss:$0 sm:$0xff] }
 0x65d   : > { %v3650_v59 = vmul.f32 %v3646_v57, %v3627_v6  ;;  %v7987_v57 = vld [vmem:[%s8489_s16] ss:$0 sm:$0xff]  ;;  %6712 = vmatprep.subr.bf16.mxu0 %v6711_v9  ;;  %v3851_v6 = vld [vmem:[%s8494_s21 + $0x28] sm:$0xff] }
 0x65e   : > { %6714 = vmatpush3.bf16.msra.mxu0 %v6711_v9 }
 0x65f   : > { %v6699_v11 = vpack.c.bf16 %v3651_v54, %v3650_v59  ;;  %v6330_v61 = vpop.f32.mrb[62].mxu0  ;;  %v3850_v54 = vld [vmem:[%s8494_s21 + $0x20] sm:$0xff] }
 0x660   : > { %v3653_v62 = vmul.f32 %v6330_v61, %v3649_v31  ;;  %v3637_v55 = vpop.f32.mrb[63].mxu0  ;;  %v6715_v59 = vpack.c.bf16 %v3851_v6, %v3850_v54 }
 0x661   : > { %v3652_v17 = vmul.f32 %v3648_v60, %v3637_v55  ;;  %6700 = vmatprep.subr.bf16.mxu1 %v6699_v11  ;;  %v3852_v60 = vld [vmem:[%s8494_s21 + $0x30] sm:$0xff] }
 0x662   : > { %6702 = vmatpush3.bf16.msra.mxu1 %v6699_v11  ;;  %6716 = vmatprep.subr.bf16.mxu0 %v6715_v59  ;;  %v3853_v11 = vld [vmem:[%s8494_s21 + $0x38] sm:$0xff] }
 0x663   : > { %v6703_v18 = vpack.c.bf16 %v3653_v62, %v3652_v17  ;;  %6718 = vmatpush3.bf16.msra.mxu0 %v6715_v59  ;;  %v6719_v61 = vpack.c.bf16 %v3853_v11, %v3852_v60  ;;  %v3999_v60 = vld [vmem:[%s8488_s15] sm:$0xff]  ;;  %v4000_v11 = vld [vmem:[%s8488_s15 + $0x8] sm:$0xff] }
 0x665   : > { %6704 = vmatprep.subr.bf16.mxu1 %v6703_v18  ;;  %6720 = vmatprep.subr.bf16.mxu0 %v6719_v61 }
 0x666   : > { %6706 = vmatpush3.bf16.msra.mxu1 %v6703_v18 }
 0x667   : > { %6722 = vmatpush3.bf16.msra.mxu0 %v6719_v61  ;;  %v4001_v61 = vld [vmem:[%s8488_s15 + $0x10] sm:$0xff] }
 0x669   : > { %6340 = vmatmul.mubr.msk.f32.vlgmr.msra.gmra.mrb[64].mxu1 %vm730_vm0, %v7650_v10 }
 0x66a   : > { %6342 = vmatprep.mubr.msk.f32.mxu1 %vm730_vm0, %v7653_v13 }
 0x66d   : > { %6343 = vmatmul.mubr.msk.f32.gmra.mrb[66].mxu1 %vm730_vm0, %v7656_v8 }
 0x66e   : > { %6345 = vmatprep.mubr.msk.f32.mxu1 %vm730_vm0, %v7667_v63 }
 0x671   : > { %6346 = vmatmul.mubr.msk.f32.gmra.mrb[68].mxu1 %vm730_vm0, %v7670_v3 }
 0x672   : > { %6348 = vmatprep.mubr.msk.f32.mxu1 %vm730_vm0, %v7673_v14  ;;  %v5539_v14 = vld [vmem:[%s8487_s14] ss:$0 sm:$0xff] }
 0x675   : > { %6349 = vmatmul.mubr.msk.f32.gmra.mrb[70].mxu1 %vm730_vm0, %v7676_v15 }
 0x721   : > { %v7923_v12 = vpop.f32.mrb[56].mxu1 }
 0x722   : > { %v3507_v10 = vpop.f32.mrb[57].mxu1  ;;  %v3513_v62 = vadd.f32 %v7923_v12, %v5518_v58 }
 0x723   : > { %v3508_v31 = vadd.f32 %v5518_v58, %v3507_v10 }
 0x725   : > { %v7925_v19 = vpop.f32.mrb[58].mxu1 }
 0x726   : > { %v7927_v13 = vpop.f32.mrb[59].mxu1  ;;  %v3523_v17 = vadd.f32 %v7925_v19, %v5518_v58 }
 0x727   : > { %v3518_v55 = vadd.f32 %v5518_v58, %v7927_v13 }
 0x729   : > { %v7929_v8 = vpop.f32.mrb[60].mxu1 }
 0x72a   : > { %v7931_v56 = vpop.f32.mrb[61].mxu1  ;;  %v3533_v10 = vadd.f32 %v7929_v8, %v5518_v58 }
 0x72b   : > { %v3528_v18 = vadd.f32 %v5518_v58, %v7931_v56 }
 0x72d   : > { %v7933_v63 = vpop.f32.mrb[62].mxu1 }
 0x72e   : > { %v7935_v3 = vpop.f32.mrb[63].mxu1  ;;  %v3543_v12 = vadd.f32 %v7933_v63, %v5518_v58 }
 0x73c   : > { %v6341_v15 = vpop.f32.mrb[64].mxu1 }
 0x73d   : > { %v7940_v20 = vmul.f32 %v6341_v15, %v5539_v14  ;;  %v3744_v23 = vpop.f32.mrb[65].mxu1 }
 0x73e   : > { %v7942_v24 = vmul.f32 %v5539_v14, %v3744_v23 }
 0x73f   : > { %v3801_v25 = vsel %vm868_vm1, %v7940_v20, -inf }
 0x740   : > { %3802 = vmax.xlane.f32.xlu1 %v3801_v25  ;;  %v6344_v27 = vpop.f32.mrb[66].mxu1  ;;  %v3798_v33 = vsel %vm868_vm1, %v7942_v24, -inf }
 0x741   : > { %v7946_v28 = vmul.f32 %v6344_v27, %v5539_v14  ;;  %v3754_v29 = vpop.f32.mrb[67].mxu1 }
 0x742   : > { %v7948_v30 = vmul.f32 %v5539_v14, %v3754_v29 }
 0x743   : > { %v3807_v34 = vsel %vm868_vm1, %v7946_v28, -inf }
 0x744   : > { %3799 = vmax.xlane.f32.xlu1 %v3798_v33  ;;  %3808 = vmax.xlane.f32.xlu0 %v3807_v34  ;;  %v6347_v35 = vpop.f32.mrb[68].mxu1  ;;  %v3804_v45 = vsel %vm868_vm1, %v7948_v30, -inf }
 0x745   : > { %v3764_v37 = vpop.f32.mrb[69].mxu1  ;;  %v7954_v7 = vmul.f32 %v6347_v35, %v5539_v14 }
 0x746   : > { %v7958_v47 = vmul.f32 %v5539_v14, %v3764_v37 }
 0x747   : > { %v3813_v2 = vsel %vm868_vm1, %v7954_v7, -inf }
 0x748   : > { %3805 = vmax.xlane.f32.xlu1 %v3804_v45  ;;  %v6350_v4 = vpop.f32.mrb[70].mxu1  ;;  %v3810_v5 = vsel %vm868_vm1, %v7958_v47, -inf }
 0x749   : > { %v3774_v46 = vpop.f32.mrb[71].mxu1  ;;  %v7972_v52 = vmul.f32 %v6350_v4, %v5539_v14 }
 0x74a   : > { %v7962_v16 = vmul.f32 %v5539_v14, %v3774_v46  ;;  %v3538_v14 = vadd.f32 %v5518_v58, %v7935_v3 }
 0x74b   : > { %v3819_v53 = vsel %vm868_vm1, %v7972_v52, -inf }
 0x74c   : > { %3814 = vmax.xlane.f32.xlu1 %v3813_v2  ;;  %v3816_v51 = vsel %vm868_vm1, %v7962_v16, -inf }
 0x750   : > { %3811 = vmax.xlane.f32.xlu1 %v3810_v5 }
 0x754   : > { %3817 = vmax.xlane.f32.xlu1 %v3816_v51 }
 0x758   : > { %3820 = vmax.xlane.f32.xlu1 %v3819_v53 }
 0x75a   : > { %4357 = vrot.lane.b32.xlu0 %v7987_v57, %s6875_s1 }
 0x75e   : > { %4177 = vrot.lane.b32.xlu0 %v3508_v31, %s6875_s1 }
 0x762   : > { %4179 = vrot.lane.b32.xlu0 %v3513_v62, %s6875_s1  ;;  %v6723_v62 = vpack.c.bf16 %v4000_v11, %v3999_v60 }
 0x764   : > { %6724 = vmatprep.subr.bf16.mxu1 %v6723_v62 }
 0x765   : > { %6726 = vmatpush3.bf16.msra.mxu1 %v6723_v62 }
 0x766   : > { %4181 = vrot.lane.b32.xlu0 %v3518_v55, %s6875_s1  ;;  %v4002_v55 = vld [vmem:[%s8488_s15 + $0x18] sm:$0xff] }
 0x76a   : > { %4183 = vrot.lane.b32.xlu0 %v3523_v17, %s6875_s1  ;;  %v6727_v17 = vpack.c.bf16 %v4002_v55, %v4001_v61 }
 0x76c   : > { %6728 = vmatprep.subr.bf16.mxu1 %v6727_v17 }
 0x76d   : > { %6730 = vmatpush3.bf16.msra.mxu1 %v6727_v17 }
 0x76e   : > { %4185 = vrot.lane.b32.xlu0 %v3528_v18, %s6875_s1  ;;  %v4003_v18 = vld [vmem:[%s8488_s15 + $0x20] sm:$0xff] }
 0x772   : > { %4187 = vrot.lane.b32.xlu0 %v3533_v10, %s6875_s1  ;;  %v4004_v10 = vld [vmem:[%s8488_s15 + $0x28] sm:$0xff] }
 0x776   : > { %4189 = vrot.lane.b32.xlu0 %v3538_v14, %s6875_s1  ;;  %v6731_v14 = vpack.c.bf16 %v4004_v10, %v4003_v18 }
 0x778   : > { %6732 = vmatprep.subr.bf16.mxu1 %v6731_v14 }
 0x779   : > { %6734 = vmatpush3.bf16.msra.mxu1 %v6731_v14 }
 0x77a   : > { %4191 = vrot.lane.b32.xlu0 %v3543_v12, %s6875_s1  ;;  %s8521_s1 = sld [smem:[#allocation8_spill]] }
 0x7cd   : > { %v3803_v15 = vpop.xlane.xlu1 %3802 }
 0x7ce   : > { %v3823_v13 = vsub.f32 %v7940_v20, %v3803_v15 }
 0x7d0   : > { %v3832_v27 = vmul.f32 1.442695, %v3823_v13 }
 0x7d1   : > { %v3800_v23 = vpop.xlane.xlu1 %3799  ;;  %v3809_v25 = vpop.xlane.xlu0 %3808 }
 0x7d2   : > { %v3822_v19 = vsub.f32 %v7942_v24, %v3800_v23  ;;  %v3825_v56 = vsub.f32 %v7946_v28, %v3809_v25 }
 0x7d4   : > { %v3830_v29 = vmul.f32 1.442695, %v3822_v19  ;;  %v3836_v63 = vmul.f32 1.442695, %v3825_v56 }
 0x7d5   : > { %v8015_v8 = vpop.permute.xlu0 %4357  ;;  %v3806_v33 = vpop.xlane.xlu1 %3805 }
 0x7d6   : > { %6831 = vpow2.f32 %v3830_v29  ;;  %v3824_v3 = vsub.f32 %v7948_v30, %v3806_v33  ;;  %v4005_v33 = vld [vmem:[%s8488_s15 + $0x30] sm:$0xff] }
 0x7d7   : > { %6833 = vpow2.f32 %v3832_v27 }
 0x7d8   : > { %v3834_v20 = vmul.f32 1.442695, %v3824_v3  ;;  %v4006_v3 = vld [vmem:[%s8488_s15 + $0x38] sm:$0xff] }
 0x7d9   : > { %v4178_v24 = vpop.permute.xlu0 %4177  ;;  %v3815_v28 = vpop.xlane.xlu1 %3814 }
 0x7da   : > { %6835 = vpow2.f32 %v3834_v20  ;;  %4202 = vst.msk [vmem:[%s8023_s25] sm:$0xff] %vm4201_vm13, %v4178_v24  ;;  %v3827_v30 = vsub.f32 %v7954_v7, %v3815_v28 }
 0x7db   : > { %6837 = vpow2.f32 %v3836_v63  ;;  %v6735_v63 = vpack.c.bf16 %v4006_v3, %v4005_v33 }
 0x7dc   : > { %v3840_v45 = vmul.f32 1.442695, %v3827_v30 }
 0x7dd   : > { %v4180_v34 = vpop.permute.xlu0 %4179  ;;  %v3812_v35 = vpop.xlane.xlu1 %3811  ;;  %6736 = vmatprep.subr.bf16.mxu1 %v6735_v63 }
 0x7de   : > { %4203 = vst.msk [vmem:[%s8023_s25 + $0x8] sm:$0xff] %vm4201_vm13, %v4180_v34  ;;  %v3826_v37 = vsub.f32 %v7958_v47, %v3812_v35  ;;  %6738 = vmatpush3.bf16.msra.mxu1 %v6735_v63 }
 0x7e0   : > { %v8031_v4 = vpop.eup %6831  ;;  %v3838_v46 = vmul.f32 1.442695, %v3826_v37 }
 0x7e1   : > { %v8033_v2 = vpop.eup %6833  ;;  %6367 = vmatprep.mubr.msk.f32.mxu0 %vm868_vm1, %v8031_v4  ;;  %v4182_v5 = vpop.permute.xlu0 %4181 }
 0x7e2   : > { %v3818_v50 = vpop.xlane.xlu1 %3817  ;;  %6839 = vpow2.f32 %v3838_v46  ;;  %4204 = vst.msk [vmem:[%s8023_s25 + $0x10] sm:$0xff] %vm4201_vm13, %v4182_v5  ;;  %6368 = vmatmul.mubr.msk.f32.vlgmr.msra.gmra.mrb[64].mxu0 %vm868_vm1, %v8033_v2 }
 0x7e3   : > { %v3828_v7 = vsub.f32 %v7962_v16, %v3818_v50  ;;  %6841 = vpow2.f32 %v3840_v45 }
 0x7e4   : > { %v8042_v47 = vpop.eup %6835 }
 0x7e5   : > { %v3842_v32 = vmul.f32 1.442695, %v3828_v7  ;;  %v8044_v22 = vpop.eup %6837  ;;  %v4184_v51 = vpop.permute.xlu0 %4183  ;;  %6370 = vmatprep.mubr.msk.f32.mxu0 %vm868_vm1, %v8042_v47 }
 0x7e6   : > { %v3821_v36 = vpop.xlane.xlu1 %3820  ;;  %4205 = vst.msk [vmem:[%s8023_s25 + $0x18] sm:$0xff] %vm4201_vm13, %v4184_v51  ;;  %6371 = vmatmul.mubr.msk.f32.gmra.mrb[66].mxu0 %vm868_vm1, %v8044_v22 }
 0x7e7   : > { %6843 = vpow2.f32 %v3842_v32  ;;  %v3829_v16 = vsub.f32 %v7972_v52, %v3821_v36 }
 0x7e9   : > { %v3844_v42 = vmul.f32 1.442695, %v3829_v16  ;;  %v4186_v9 = vpop.permute.xlu0 %4185 }
 0x7ea   : > { %4206 = vst.msk [vmem:[%s8023_s25 + $0x20] sm:$0xff] %vm4201_vm13, %v4186_v9 }
 0x7eb   : > { %6845 = vpow2.f32 %v3844_v42 }
 0x7ec   : > { %v8055_v53 = vpop.eup %6839 }
 0x7ed   : > { %v8057_v58 = vpop.eup %6841  ;;  %v4188_v54 = vpop.permute.xlu0 %4187  ;;  %6373 = vmatprep.mubr.msk.f32.mxu0 %vm868_vm1, %v8055_v53 }
 0x7ee   : > { %4207 = vst.msk [vmem:[%s8023_s25 + $0x28] sm:$0xff] %vm4201_vm13, %v4188_v54  ;;  %6374 = vmatmul.mubr.msk.f32.gmra.mrb[68].mxu0 %vm868_vm1, %v8057_v58  ;;  %v6878_v54 = vmov 0.0  }
 0x7f1   : > { %v8065_v52 = vpop.eup %6843  ;;  %v4190_v6 = vpop.permute.xlu0 %4189 }
 0x7f2   : > { %6376 = vmatprep.mubr.msk.f32.mxu0 %vm868_vm1, %v8065_v52  ;;  %4208 = vst.msk [vmem:[%s8023_s25 + $0x30] sm:$0xff] %vm4201_vm13, %v4190_v6 }
 0x7f5   : > { %v6846_v59 = vpop.eup %6845  ;;  %v4192_v31 = vpop.permute.xlu0 %4191 }
 0x7f6   : > { %6377 = vmatmul.mubr.msk.f32.gmra.mrb[70].mxu0 %vm868_vm1, %v6846_v59  ;;  %4209 = vst.msk [vmem:[%s8023_s25 + $0x38] sm:$0xff] %vm4201_vm13, %v4192_v31 }
 0x7f7   : > { %6411 = vmatprep.mubr.msk.f32.mxu0 %vm6877_vm14, %v6878_v54 }
 0x8b5   : > { %v6369_v12 = vpop.f32.mrb[64].mxu0 }
 0x8b6   : > { %v3944_v15 = vpop.f32.mrb[65].mxu0 }
 0x8b7   : > { %6847 = vrcp.f32 %v3944_v15 }
 0x8b8   : > { %6849 = vrcp.f32 %v6369_v12 }
 0x8b9   : > { %v6372_v13 = vpop.f32.mrb[66].mxu0 }
 0x8ba   : > { %v3954_v23 = vpop.f32.mrb[67].mxu0 }
 0x8bb   : > { %6851 = vrcp.f32 %v3954_v23 }
 0x8bc   : > { %6853 = vrcp.f32 %v6372_v13 }
 0x8c1   : > { %v6848_v25 = vpop.eup %6847  ;;  %v6375_v19 = vpop.f32.mrb[68].mxu0 }
 0x8c2   : > { %v3964_v27 = vpop.f32.mrb[69].mxu0  ;;  %v3984_v56 = vmul.f32 %v6848_v25, %v8031_v4  ;;  %v6850_v29 = vpop.eup %6849  ;;  %v4295_v25 = vlaneseq }
 0x8c3   : > { %6855 = vrcp.f32 %v3964_v27  ;;  %v3986_v20 = vmul.f32 %v6850_v29, %v8033_v2 }
 0x8c4   : > { %4007 = vxpose.xlu1.b32.start [1/8] (short) (narrow) %v3984_v56, 64  ;;  %6857 = vrcp.f32 %v6375_v19  ;;  %v4296_v27 = vshrl.u32 %v4295_v25, 7 }
 0x8c5   : > { %v6852_v24 = vpop.eup %6851 }
 0x8c6   : > { %v3988_v34 = vmul.f32 %v6852_v24, %v8042_v47  ;;  %v6854_v35 = vpop.eup %6853 }
 0x8c7   : > { %v3990_v37 = vmul.f32 %v6854_v35, %v8044_v22 }
 0x8c8   : > { %4008 = vxpose.xlu1.b32.cont [2/8] (short) (narrow) %v3986_v20, 64 }
 0x8c9   : > { %v6378_v28 = vpop.f32.mrb[70].mxu0 }
 0x8ca   : > { %v3974_v30 = vpop.f32.mrb[71].mxu0 }
 0x8cb   : > { %6859 = vrcp.f32 %v3974_v30 }
 0x8cc   : > { %4009 = vxpose.xlu1.b32.cont [3/8] (short) (narrow) %v3988_v34, 64  ;;  %6861 = vrcp.f32 %v6378_v28  ;;  %v8134_v28 = vsub.s32 0, %v4296_v27 }
 0x8cd   : > { %v6856_v45 = vpop.eup %6855 }
 0x8ce   : > { %v3992_v4 = vmul.f32 %v6856_v45, %v8055_v53  ;;  %v6858_v46 = vpop.eup %6857 }
 0x8cf   : > { %v3994_v2 = vmul.f32 %v6858_v46, %v8057_v58  ;;  %v6876_v58 = vmov 0.0|0.0  }
 0x8d0   : > { %4010 = vxpose.xlu1.b32.cont [4/8] (short) (narrow) %v3990_v37, 64  ;;  %6739 = vmatprep.subr.bf16.mxu0 %v6876_v58 }
 0x8d1   : > { %6742 = vmatprep.subr.bf16.mxu1 %v6876_v58 }
 0x8d4   : > { %4011 = vxpose.xlu1.b32.cont [5/8] (short) (narrow) %v3992_v4, 64 }
 0x8d5   : > { %v6860_v5 = vpop.eup %6859 }
 0x8d6   : > { %v3996_v50 = vmul.f32 %v6860_v5, %v8065_v52  ;;  %v6862_v7 = vpop.eup %6861 }
 0x8d7   : > { %v3998_v47 = vmul.f32 %v6862_v7, %v6846_v59  ;;  %v5497_v59 = vld [vmem:[%s8485_s12] ss:$0 sm:$0xff] }
 0x8d8   : > { %4012 = vxpose.xlu1.b32.cont [6/8] (short) (narrow) %v3994_v2, 64  ;;  %v2994_v60 = vadd.f32 %v5497_v59, %v7881_v48  ;;  %v2999_v55 = vadd.f32 %v7879_v1, %v5497_v59  ;;  %v3004_v48 = vadd.f32 %v5497_v59, %v7885_v49  ;;  %v3009_v13 = vadd.f32 %v7883_v0, %v5497_v59 }
 0x8d9   : > { %v6879_v1 = vmov 1966171168  }
 0x8da   : > { %v4293_v23 = vunpack.c.l.s4 %v6879_v1 }
 0x8dc   : > { %4013 = vxpose.xlu1.b32.cont [7/8] (short) (narrow) %v3996_v50, 64  ;;  %v4294_v19 = vunpack.c.0.s8 %v4293_v23 }
 0x8de   : > { %v8128_v56 = vsub.s32 %v4294_v19, %v4296_v27 }
 0x8e0   : > { %4014 = vxpose.xlu1.b32.end [8/8] (short) (narrow) %v3998_v47, 64 }
 0x944   : > { %v4023_v32 = vpop.trf.xlu1 }
 0x945   : > { %6395 = vmatprep.mubr.msk.f32.mxu1 %vm868_vm1, %v4023_v32 }
 0x948   : > { %v4024_v22 = vpop.trf.xlu1 }
 0x949   : > { %6396 = vmatmul.mubr.msk.f32.vlgmr.msra.gmra.mrb[72].mxu1 %vm868_vm1, %v4024_v22 }
 0x94c   : > { %v4025_v51 = vpop.trf.xlu1 }
 0x94d   : > { %6398 = vmatprep.mubr.msk.f32.mxu1 %vm868_vm1, %v4025_v51 }
 0x950   : > { %v4026_v36 = vpop.trf.xlu1 }
 0x951   : > { %6399 = vmatmul.mubr.msk.f32.gmra.mrb[74].mxu1 %vm868_vm1, %v4026_v36 }
 0x954   : > { %v4027_v16 = vpop.trf.xlu1 }
 0x955   : > { %6401 = vmatprep.mubr.msk.f32.mxu1 %vm868_vm1, %v4027_v16 }
 0x958   : > { %v4028_v42 = vpop.trf.xlu1 }
 0x959   : > { %6402 = vmatmul.mubr.msk.f32.gmra.mrb[76].mxu1 %vm868_vm1, %v4028_v42 }
 0x95c   : > { %v4029_v9 = vpop.trf.xlu1 }
 0x95d   : > { %6404 = vmatprep.mubr.msk.f32.mxu1 %vm868_vm1, %v4029_v9 }
 0x960   : > { %v4030_v53 = vpop.trf.xlu1 }
 0x961   : > { %6405 = vmatmul.mubr.msk.f32.gmra.mrb[78].mxu1 %vm868_vm1, %v4030_v53 }
 0x962   : > { %6418 = vmatprep.mubr.msk.f32.mxu1 %vm6877_vm14, %v6878_v54 }
 0xa1c   : > { %v6397_v52 = vpop.f32.mrb[72].mxu1 }
 0xa1d   : > { %v4129_v6 = vpop.f32.mrb[73].mxu1 }
 0xa1e   : > { %v6740_v31 = vpack.c.bf16 %v6397_v52, %v4129_v6 }
 0xa20   : > { %6741 = vmatpush3.bf16.msra.mxu0 %v6740_v31 }
 0xa21   : > { %6745 = vmatprep.subr.bf16.mxu0 %v6876_v58 }
 0xa23   : > { %6412 = vmatmul.mubr.msk.f32.vlgmr.msra.gmra.mrb[72].mxu0 %vm3548_vm12, %v2994_v60 }
 0xa24   : > { %v6400_v11 = vpop.f32.mrb[74].mxu1  ;;  %6425 = vmatprep.mubr.msk.f32.mxu0 %vm6877_vm14, %v6878_v54 }
 0xa25   : > { %v4139_v61 = vpop.f32.mrb[75].mxu1 }
 0xa26   : > { %v6743_v62 = vpack.c.bf16 %v6400_v11, %v4139_v61 }
 0xa28   : > { %6744 = vmatpush3.bf16.msra.mxu1 %v6743_v62 }
 0xa29   : > { %6748 = vmatprep.subr.bf16.mxu1 %v6876_v58 }
 0xa2b   : > { %6419 = vmatmul.mubr.msk.f32.vlgmr.msra.gmra.mrb[80].mxu1 %vm3548_vm12, %v2999_v55 }
 0xa2c   : > { %v6403_v17 = vpop.f32.mrb[76].mxu1  ;;  %6432 = vmatprep.mubr.msk.f32.mxu1 %vm6877_vm14, %v6878_v54 }
 0xa2d   : > { %v4149_v18 = vpop.f32.mrb[77].mxu1 }
 0xa2e   : > { %v6746_v10 = vpack.c.bf16 %v6403_v17, %v4149_v18 }
 0xa30   : > { %6747 = vmatpush3.bf16.msra.mxu0 %v6746_v10 }
 0xa33   : > { %6426 = vmatmul.mubr.msk.f32.vlgmr.msra.gmra.mrb[74].mxu0 %vm3548_vm12, %v3004_v48 }
 0xa34   : > { %v6406_v14 = vpop.f32.mrb[78].mxu1 }
 0xa35   : > { %v4159_v12 = vpop.f32.mrb[79].mxu1 }
 0xa36   : > { %v6749_v15 = vpack.c.bf16 %v6406_v14, %v4159_v12 }
 0xa38   : > { %6750 = vmatpush3.bf16.msra.mxu1 %v6749_v15 }
 0xa3b   : > { %6433 = vmatmul.mubr.msk.f32.vlgmr.msra.gmra.mrb[82].mxu1 %vm3548_vm12, %v3009_v13 }
 0xaf6   : > { %v4279_v29 = vpop.f32.mrb[72].mxu0 }
 0xaf7   : > { %v4289_v49 = vadd.f32 %v7987_v57, %v4279_v29  ;;  %v4360_v33 = vadd.f32 %v8015_v8, %v4279_v29  ;;  %v6413_v3 = vpop.f32.mrb[73].mxu0 }
 0xaf9   : > { %v4291_v63 = vcombine.high %v4289_v49, %v4289_v49  ;;  %v4298_v20 = vrot.slane %v4289_v49, %v8128_v56  ;;  %v4369_v0 = vrot.slane %v4360_v33, %v8128_v56  ;;  %v4362_v24 = vcombine.high %v4360_v33, %v4360_v33 }
 0xafb   : > { %v4305_v30 = vrot.slane %v4291_v63, %v8128_v56  ;;  %v4306_v34 = vcombine.high %v4298_v20, %v4298_v20  ;;  %v4314_v35 = vrot.slane %v4298_v20, %v8128_v56  ;;  %v4377_v37 = vcombine.high %v4369_v0, %v4369_v0 }
 0xafc   : > { %v4385_v45 = vrot.slane %v4369_v0, %v8128_v56  ;;  %v8144_v50 = vrot.slane %v4362_v24, %v8128_v56 }
 0xafd   : > { %v4307_v4 = vcombine.high %v4305_v30, %v4305_v30  ;;  %v4321_v46 = vrot.slane %v4305_v30, %v8128_v56  ;;  %v4328_v2 = vrot.slane %v4306_v34, %v8128_v56  ;;  %v4336_v5 = vcombine.high %v4314_v35, %v4314_v35  ;;  %4349 = vst.msk [vmem:[%s8023_s25] sm:$0x1] %vm4348_vm15, %v4314_v35 }
 0xafe   : > { %v4544_v7 = vpop.f32.mrb[80].mxu1  ;;  %v4414_v47 = vrot.slane %v4385_v45, %v8134_v28  ;;  %v8148_v32 = vrot.slane %v4377_v37, %v8128_v56  ;;  %v4407_v58 = vcombine.high %v4385_v45, %v4385_v45  ;;  %v8175_v60 = vrot.slane %v8144_v50, %v8128_v56 }
 0xaff   : > { %v4335_v22 = vrot.slane %v4307_v4, %v8128_v56  ;;  %v4337_v51 = vcombine.high %v4321_v46, %v4321_v46  ;;  %v4338_v36 = vcombine.high %v4328_v2, %v4328_v2  ;;  %4350 = vst.msk [vmem:[%s8023_s25 + $0x8] sm:$0x1] %vm4348_vm15, %v4328_v2  ;;  %4351 = vst.msk [vmem:[%s8023_s25 + $0x10] sm:$0x1] %vm4348_vm15, %v4336_v5  ;;  %v6420_v42 = vpop.f32.mrb[81].mxu1 }
 0xb00   : > { %4353 = vst.msk [vmem:[%s8023_s25 + $0x20] sm:$0x1] %vm4348_vm15, %v4321_v46  ;;  %v4548_v16 = vadd.f32 %v7987_v57, %v4544_v7  ;;  %v4615_v9 = vadd.f32 %v4544_v7, %v8015_v8  ;;  %4443 = vrot.lane.b32.xlu1 %v4414_v47, %s6880_s2  ;;  %v4418_v53 = vrot.slane %v8148_v32, %v8134_v28 }
 0xb01   : > { %v4339_v54 = vcombine.high %v4335_v22, %v4335_v22  ;;  %4352 = vst.msk [vmem:[%s8023_s25 + $0x18] sm:$0x1] %vm4348_vm15, %v4338_v36  ;;  %4354 = vst.msk [vmem:[%s8023_s25 + $0x28] sm:$0x1] %vm4348_vm15, %v4335_v22  ;;  %v4422_v18 = vrot.slane %v4407_v58, %v8134_v28  ;;  %v4378_v15 = vcombine.high %v8144_v50, %v8144_v50 }
 0xb02   : > { %4355 = vst.msk [vmem:[%s8023_s25 + $0x30] sm:$0x1] %vm4348_vm15, %v4337_v51  ;;  %v4550_v52 = vcombine.high %v4548_v16, %v4548_v16  ;;  %v4557_v6 = vrot.slane %v4548_v16, %v8128_v56  ;;  %v4617_v59 = vcombine.high %v4615_v9, %v4615_v9  ;;  %v8170_v31 = vrot.slane %v4615_v9, %v8128_v56 }
 0xb03   : > { %4445 = vrot.lane.b32.xlu0 %v4418_v53, %s6880_s2  ;;  %4356 = vst.msk [vmem:[%s8023_s25 + $0x38] sm:$0x1] %vm4348_vm15, %v4339_v54  ;;  %v4430_v23 = vrot.slane %v8175_v60, %v8134_v28  ;;  %v4409_v25 = vcombine.high %v8148_v32, %v8148_v32  ;;  %v8221_v35 = vrot.slane %v4378_v15, %v8128_v56 }
 0xb04   : > { %v4564_v11 = vrot.slane %v4550_v52, %v8128_v56  ;;  %v4565_v61 = vcombine.high %v4557_v6, %v4557_v6  ;;  %v4573_v62 = vrot.slane %v4557_v6, %v8128_v56  ;;  %v8182_v55 = vrot.slane %v4617_v59, %v8128_v56 }
 0xb05   : > { %v4632_v17 = vcombine.high %v8170_v31, %v8170_v31  ;;  %v4426_v5 = vrot.slane %v4409_v25, %v8134_v28  ;;  %v4434_v16 = vrot.slane %v8221_v35, %v8134_v28  ;;  %v4408_v42 = vcombine.high %v8175_v60, %v8175_v60 }
 0xb06   : > { %v4566_v10 = vcombine.high %v4564_v11, %v4564_v11  ;;  %v4580_v48 = vrot.slane %v4564_v11, %v8128_v56  ;;  %v4587_v14 = vrot.slane %v4565_v61, %v8128_v56  ;;  %v4595_v12 = vcombine.high %v4573_v62, %v4573_v62  ;;  %4607 = vst.msk [vmem:[%s8023_s25 + $0x2] sm:$0x1] %vm4348_vm15, %v4573_v62  ;;  %v4799_v13 = vpop.f32.mrb[74].mxu0 }
 0xb07   : > { %4447 = vrot.lane.b32.xlu0 %v4422_v18, %s6880_s2  ;;  %v4654_v1 = vrot.slane %v4632_v17, %v8128_v56  ;;  %v4803_v49 = vadd.f32 %v7987_v57, %v4799_v13  ;;  %v6427_v33 = vpop.f32.mrb[75].mxu0  ;;  %v4633_v3 = vcombine.high %v8182_v55, %v8182_v55  ;;  %v4870_v63 = vadd.f32 %v4799_v13, %v8015_v8 }
 0xb08   : > { %v4594_v19 = vrot.slane %v4566_v10, %v8128_v56  ;;  %v4596_v27 = vcombine.high %v4580_v48, %v4580_v48  ;;  %v4597_v29 = vcombine.high %v4587_v14, %v4587_v14  ;;  %4608 = vst.msk [vmem:[%s8023_s25 + $0xa] sm:$0x1] %vm4348_vm15, %v4587_v14  ;;  %4609 = vst.msk [vmem:[%s8023_s25 + $0x12] sm:$0x1] %vm4348_vm15, %v4595_v12 }
 0xb09   : > { %4611 = vst.msk [vmem:[%s8023_s25 + $0x22] sm:$0x1] %vm4348_vm15, %v4580_v48  ;;  %v4673_v20 = vrot.slane %v4654_v1, %v8134_v28  ;;  %v4664_v0 = vcombine.high %v4654_v1, %v4654_v1  ;;  %v4805_v30 = vcombine.high %v4803_v49, %v4803_v49  ;;  %v4812_v34 = vrot.slane %v4803_v49, %v8128_v56 }
 0xb0a   : > { %v4598_v24 = vcombine.high %v4594_v19, %v4594_v19  ;;  %4610 = vst.msk [vmem:[%s8023_s25 + $0x1a] sm:$0x1] %vm4348_vm15, %v4597_v29  ;;  %4612 = vst.msk [vmem:[%s8023_s25 + $0x2a] sm:$0x1] %vm4348_vm15, %v4594_v19  ;;  %v8228_v46 = vrot.slane %v4870_v63, %v8128_v56  ;;  %v4661_v50 = vrot.slane %v4633_v3, %v8128_v56 }
 0xb0b   : > { %4613 = vst.msk [vmem:[%s8023_s25 + $0x32] sm:$0x1] %vm4348_vm15, %v4596_v27  ;;  %4700 = vrot.lane.b32.xlu1 %v4673_v20, %s6880_s2  ;;  %4451 = vrot.lane.b32.xlu0 %v4430_v23, %s6880_s2  ;;  %v4819_v37 = vrot.slane %v4805_v30, %v8128_v56  ;;  %v4820_v45 = vcombine.high %v4812_v34, %v4812_v34 }
 0xb0c   : > { %4614 = vst.msk [vmem:[%s8023_s25 + $0x3a] sm:$0x1] %vm4348_vm15, %v4598_v24  ;;  %v4828_v4 = vrot.slane %v4812_v34, %v8128_v56  ;;  %v4681_v2 = vrot.slane %v4664_v0, %v8134_v28  ;;  %v4872_v51 = vcombine.high %v4870_v63, %v4870_v63  ;;  %v4887_v6 = vcombine.high %v8228_v46, %v8228_v46 }
 0xb0d   : > { %v4821_v7 = vcombine.high %v4819_v37, %v4819_v37  ;;  %v4835_v47 = vrot.slane %v4819_v37, %v8128_v56  ;;  %v4842_v32 = vrot.slane %v4820_v45, %v8128_v56  ;;  %v4689_v60 = vrot.slane %v4661_v50, %v8134_v28 }
 0xb0e   : > { %v4850_v22 = vcombine.high %v4828_v4, %v4828_v4  ;;  %4862 = vst.msk [vmem:[%s8023_s25 + $0x4] sm:$0x1] %vm4348_vm15, %v4828_v4  ;;  %v5054_v36 = vpop.f32.mrb[82].mxu1  ;;  %v4665_v11 = vcombine.high %v4661_v50, %v4661_v50  ;;  %v4410_v17 = vcombine.high %v8221_v35, %v8221_v35  ;;  %v8271_v48 = vrot.slane %v4872_v51, %v8128_v56 }
 0xb0f   : > { %4704 = vrot.lane.b32.xlu1 %v4681_v2, %s6880_s2  ;;  %4449 = vrot.lane.b32.xlu0 %v4426_v5, %s6880_s2  ;;  %v4849_v9 = vrot.slane %v4821_v7, %v8128_v56  ;;  %v4851_v53 = vcombine.high %v4835_v47, %v4835_v47  ;;  %v4852_v58 = vcombine.high %v4842_v32, %v4842_v32  ;;  %v6434_v52 = vpop.f32.mrb[83].mxu1 }
 0xb10   : > { %4863 = vst.msk [vmem:[%s8023_s25 + $0xc] sm:$0x1] %vm4348_vm15, %v4842_v32  ;;  %4864 = vst.msk [vmem:[%s8023_s25 + $0x14] sm:$0x1] %vm4348_vm15, %v4850_v22  ;;  %v5058_v54 = vadd.f32 %v7987_v57, %v5054_v36  ;;  %v5125_v59 = vadd.f32 %v5054_v36, %v8015_v8  ;;  %v4438_v8 = vrot.slane %v4408_v42, %v8134_v28 }
 0xb11   : > { %4866 = vst.msk [vmem:[%s8023_s25 + $0x24] sm:$0x1] %vm4348_vm15, %v4835_v47  ;;  %v4853_v61 = vcombine.high %v4849_v9, %v4849_v9  ;;  %4865 = vst.msk [vmem:[%s8023_s25 + $0x1c] sm:$0x1] %vm4348_vm15, %v4852_v58  ;;  %v4697_v23 = vrot.slane %v4665_v11, %v8134_v28  ;;  %v4909_v25 = vrot.slane %v4887_v6, %v8128_v56 }
 0xb12   : > { %4867 = vst.msk [vmem:[%s8023_s25 + $0x2c] sm:$0x1] %vm4348_vm15, %v4849_v9  ;;  %4868 = vst.msk [vmem:[%s8023_s25 + $0x34] sm:$0x1] %vm4348_vm15, %v4851_v53  ;;  %v5060_v62 = vcombine.high %v5058_v54, %v5058_v54  ;;  %v5067_v57 = vrot.slane %v5058_v54, %v8128_v56  ;;  %v5127_v18 = vcombine.high %v5125_v59, %v5125_v59 }
 0xb13   : > { %v5134_v10 = vrot.slane %v5125_v59, %v8128_v56  ;;  %4708 = vrot.lane.b32.xlu1 %v4689_v60, %s6880_s2  ;;  %4453 = vrot.lane.b32.xlu0 %v4434_v16, %s6880_s2  ;;  %4869 = vst.msk [vmem:[%s8023_s25 + $0x3c] sm:$0x1] %vm4348_vm15, %v4853_v61  ;;  %v4640_v0 = vrot.slane %v8170_v31, %v8128_v56 }
 0xb14   : > { %v5074_v14 = vrot.slane %v5060_v62, %v8128_v56  ;;  %v5075_v12 = vcombine.high %v5067_v57, %v5067_v57  ;;  %v5083_v15 = vrot.slane %v5067_v57, %v8128_v56  ;;  %v8276_v13 = vrot.slane %v5127_v18, %v8128_v56 }
 0xb15   : > { %v8279_v1 = vrot.slane %v5134_v10, %v8128_v56  ;;  %v4888_v24 = vcombine.high %v8271_v48, %v8271_v48  ;;  %v4928_v30 = vrot.slane %v4909_v25, %v8134_v28  ;;  %v4919_v34 = vcombine.high %v4909_v25, %v4909_v25 }
 0xb16   : > { %v5076_v19 = vcombine.high %v5074_v14, %v5074_v14  ;;  %v5090_v27 = vrot.slane %v5074_v14, %v8128_v56  ;;  %v5097_v29 = vrot.slane %v5075_v12, %v8128_v56  ;;  %v5105_v49 = vcombine.high %v5083_v15, %v5083_v15  ;;  %5117 = vst.msk [vmem:[%s8023_s25 + $0x6] sm:$0x1] %vm4348_vm15, %v5083_v15 }
 0xb17   : > { %v8289_v33 = vrot.slane %v8276_v13, %v8128_v56  ;;  %4712 = vrot.lane.b32.xlu1 %v4697_v23, %s6880_s2  ;;  %4455 = vrot.lane.b32.xlu0 %v4438_v8, %s6880_s2  ;;  %v5172_v37 = vcombine.high %v8279_v1, %v8279_v1  ;;  %v4442_v45 = vrot.slane %v4410_v17, %v8134_v28 }
 0xb18   : > { %v5104_v3 = vrot.slane %v5076_v19, %v8128_v56  ;;  %v5106_v63 = vcombine.high %v5090_v27, %v5090_v27  ;;  %v5107_v20 = vcombine.high %v5097_v29, %v5097_v29  ;;  %5118 = vst.msk [vmem:[%s8023_s25 + $0xe] sm:$0x1] %vm4348_vm15, %v5097_v29  ;;  %5119 = vst.msk [vmem:[%s8023_s25 + $0x16] sm:$0x1] %vm4348_vm15, %v5105_v49 }
 0xb19   : > { %5121 = vst.msk [vmem:[%s8023_s25 + $0x26] sm:$0x1] %vm4348_vm15, %v5090_v27  ;;  %v4669_v31 = vrot.slane %v4640_v0, %v8134_v28  ;;  %v4936_v4 = vrot.slane %v4919_v34, %v8134_v28  ;;  %v4662_v2 = vcombine.high %v4640_v0, %v4640_v0  ;;  %v4916_v5 = vrot.slane %v4888_v24, %v8128_v56 }
 0xb1a   : > { %v5108_v35 = vcombine.high %v5104_v3, %v5104_v3  ;;  %5120 = vst.msk [vmem:[%s8023_s25 + $0x1e] sm:$0x1] %vm4348_vm15, %v5107_v20  ;;  %5122 = vst.msk [vmem:[%s8023_s25 + $0x2e] sm:$0x1] %vm4348_vm15, %v5104_v3  ;;  %v5179_v50 = vrot.slane %v8279_v1, %v8134_v28  ;;  %v5187_v7 = vrot.slane %v5172_v37, %v8134_v28 }
 0xb1b   : > { %5123 = vst.msk [vmem:[%s8023_s25 + $0x36] sm:$0x1] %vm4348_vm15, %v5106_v63  ;;  %4955 = vrot.lane.b32.xlu1 %v4928_v30, %s6880_s2  ;;  %4457 = vrot.lane.b32.xlu0 %v4442_v45, %s6880_s2  ;;  %v5195_v47 = vrot.slane %v8289_v33, %v8134_v28  ;;  %v5173_v32 = vcombine.high %v8289_v33, %v8289_v33 }
 0xb1c   : > { %5124 = vst.msk [vmem:[%s8023_s25 + $0x3e] sm:$0x1] %vm4348_vm15, %v5108_v35  ;;  %v5142_v51 = vcombine.high %v5134_v10, %v5134_v10  ;;  %v4944_v36 = vrot.slane %v4916_v5, %v8134_v28  ;;  %v4920_v16 = vcombine.high %v4916_v5, %v4916_v5  ;;  %v4677_v42 = vrot.slane %v4662_v2, %v8134_v28 }
 0xb1d   : > { %v5203_v22 = vrot.slane %v5173_v32, %v8134_v28  ;;  %v4647_v9 = vrot.slane %v8182_v55, %v8128_v56  ;;  %v5143_v6 = vcombine.high %v8276_v13, %v8276_v13  ;;  %v4895_v60 = vrot.slane %v8228_v46, %v8128_v56 }
 0xb1e   : > { %v5164_v53 = vrot.slane %v5142_v51, %v8128_v56  ;;  %v4952_v58 = vrot.slane %v4920_v16, %v8134_v28  ;;  %v4902_v10 = vrot.slane %v8271_v48, %v8128_v56 }
 0xb1f   : > { %4959 = vrot.lane.b32.xlu1 %v4936_v4, %s6880_s2  ;;  %4698 = vrot.lane.b32.xlu0 %v4669_v31, %s6880_s2  ;;  %v4685_v54 = vrot.slane %v4647_v9, %v8134_v28  ;;  %v4663_v52 = vcombine.high %v4647_v9, %v4647_v9  ;;  %v5171_v62 = vrot.slane %v5143_v6, %v8128_v56  ;;  %v5483_v31 = vld [vmem:[%s8521_s1] ss:$0 sm:$0xff] }
 0xb20   : > { %v5183_v55 = vrot.slane %v5164_v53, %v8134_v28  ;;  %v5174_v59 = vcombine.high %v5164_v53, %v5164_v53  ;;  %v4924_v57 = vrot.slane %v4895_v60, %v8134_v28  ;;  %v4917_v17 = vcombine.high %v4895_v60, %v4895_v60 }
 0xb21   : > { %v4693_v11 = vrot.slane %v4663_v52, %v8134_v28  ;;  %v5199_v18 = vrot.slane %v5171_v62, %v8134_v28  ;;  %v5175_v46 = vcombine.high %v5171_v62, %v5171_v62  ;;  %v4940_v12 = vrot.slane %v4902_v10, %v8134_v28 }
 0xb22   : > { %v5191_v61 = vrot.slane %v5174_v59, %v8134_v28  ;;  %v4932_v8 = vrot.slane %v4917_v17, %v8134_v28  ;;  %v4918_v15 = vcombine.high %v4902_v10, %v4902_v10  ;;  %v2441_v5 = vadd.f32 %v7708_v38, %v5483_v31 }
 0xb23   : > { %4963 = vrot.lane.b32.xlu1 %v4944_v36, %s6880_s2  ;;  %4702 = vrot.lane.b32.xlu0 %v4677_v42, %s6880_s2  ;;  %v5207_v14 = vrot.slane %v5175_v46, %v8134_v28  ;;  %v2461_v42 = vadd.f32 %v7716_v41, %v5483_v31  ;;  %v2456_v17 = vadd.f32 %v5483_v31, %v7718_v26 }
 0xb24   : > { %v4948_v56 = vrot.slane %v4918_v15, %v8134_v28  ;;  %v2466_v46 = vadd.f32 %v5483_v31, %v7722_v44 }
 0xb27   : > { %4967 = vrot.lane.b32.xlu1 %v4952_v58, %s6880_s2  ;;  %4706 = vrot.lane.b32.xlu0 %v4685_v54, %s6880_s2  ;;  %v2471_v58 = vadd.f32 %v7720_v43, %v5483_v31 }
 0xb2b   : > { %5210 = vrot.lane.b32.xlu1 %v5183_v55, %s6880_s2  ;;  %4710 = vrot.lane.b32.xlu0 %v4693_v11, %s6880_s2  ;;  %v2436_v55 = vadd.f32 %v5483_v31, %v7710_v39  ;;  %v2446_v11 = vadd.f32 %v5483_v31, %v7714_v40 }
 0xb2f   : > { %5214 = vrot.lane.b32.xlu1 %v5191_v61, %s6880_s2  ;;  %4953 = vrot.lane.b32.xlu0 %v4924_v57, %s6880_s2 }
 0xb33   : > { %5218 = vrot.lane.b32.xlu1 %v5199_v18, %s6880_s2  ;;  %4957 = vrot.lane.b32.xlu0 %v4932_v8, %s6880_s2 }
 0xb37   : > { %5222 = vrot.lane.b32.xlu1 %v5207_v14, %s6880_s2  ;;  %4961 = vrot.lane.b32.xlu0 %v4940_v12, %s6880_s2 }
 0xb3b   : > { %4965 = vrot.lane.b32.xlu0 %v4948_v56, %s6880_s2 }
 0xb3f   : > { %5208 = vrot.lane.b32.xlu0 %v5179_v50, %s6880_s2 }
 0xb43   : > { %5212 = vrot.lane.b32.xlu0 %v5187_v7, %s6880_s2 }
 0xb47   : > { %5216 = vrot.lane.b32.xlu0 %v5195_v47, %s6880_s2 }
 0xb4b   : > { %5220 = vrot.lane.b32.xlu0 %v5203_v22, %s6880_s2  ;;  %v2451_v22 = vadd.f32 %v7712_v21, %v5483_v31 }
 0xb72   : > { %v4444_v48 = vpop.permute.xlu1 %4443 }
 0xb73   : > { %4467 = vst.msk [vmem:[%s8023_s25 + $0x1] sm:$0x1] %vm4348_vm15, %v4444_v48 }
 0xb75   : > { %v4446_v13 = vpop.permute.xlu0 %4445 }
 0xb76   : > { %4468 = vst.msk [vmem:[%s8023_s25 + $0x9] sm:$0x1] %vm4348_vm15, %v4446_v13 }
 0xb79   : > { %v4448_v28 = vpop.permute.xlu0 %4447 }
 0xb7a   : > { %4469 = vst.msk [vmem:[%s8023_s25 + $0x11] sm:$0x1] %vm4348_vm15, %v4448_v28 }
 0xb7d   : > { %v4701_v1 = vpop.permute.xlu1 %4700  ;;  %v4452_v23 = vpop.permute.xlu0 %4451 }
 0xb7e   : > { %4723 = vst.msk [vmem:[%s8023_s25 + $0xb] sm:$0x1] %vm4348_vm15, %v4701_v1  ;;  %4471 = vst.msk [vmem:[%s8023_s25 + $0x21] sm:$0x1] %vm4348_vm15, %v4452_v23 }
 0xb81   : > { %v4705_v25 = vpop.permute.xlu1 %4704  ;;  %v4450_v19 = vpop.permute.xlu0 %4449 }
 0xb82   : > { %4725 = vst.msk [vmem:[%s8023_s25 + $0x1b] sm:$0x1] %vm4348_vm15, %v4705_v25  ;;  %4470 = vst.msk [vmem:[%s8023_s25 + $0x19] sm:$0x1] %vm4348_vm15, %v4450_v19 }
 0xb85   : > { %v4709_v27 = vpop.permute.xlu1 %4708  ;;  %v4454_v29 = vpop.permute.xlu0 %4453 }
 0xb86   : > { %4727 = vst.msk [vmem:[%s8023_s25 + $0x2b] sm:$0x1] %vm4348_vm15, %v4709_v27  ;;  %4472 = vst.msk [vmem:[%s8023_s25 + $0x29] sm:$0x1] %vm4348_vm15, %v4454_v29 }
 0xb89   : > { %v4713_v49 = vpop.permute.xlu1 %4712  ;;  %v4456_v33 = vpop.permute.xlu0 %4455 }
 0xb8a   : > { %4729 = vst.msk [vmem:[%s8023_s25 + $0x3b] sm:$0x1] %vm4348_vm15, %v4713_v49  ;;  %4473 = vst.msk [vmem:[%s8023_s25 + $0x31] sm:$0x1] %vm4348_vm15, %v4456_v33 }
 0xb8d   : > { %v4956_v3 = vpop.permute.xlu1 %4955  ;;  %v4458_v63 = vpop.permute.xlu0 %4457 }
 0xb8e   : > { %4978 = vst.msk [vmem:[%s8023_s25 + $0xd] sm:$0x1] %vm4348_vm15, %v4956_v3  ;;  %4474 = vst.msk [vmem:[%s8023_s25 + $0x39] sm:$0x1] %vm4348_vm15, %v4458_v63 }
 0xb91   : > { %v4960_v20 = vpop.permute.xlu1 %4959  ;;  %v4699_v0 = vpop.permute.xlu0 %4698 }
 0xb92   : > { %4980 = vst.msk [vmem:[%s8023_s25 + $0x1d] sm:$0x1] %vm4348_vm15, %v4960_v20  ;;  %4722 = vst.msk [vmem:[%s8023_s25 + $0x3] sm:$0x1] %vm4348_vm15, %v4699_v0 }
 0xb95   : > { %v4964_v24 = vpop.permute.xlu1 %4963  ;;  %v4703_v30 = vpop.permute.xlu0 %4702 }
 0xb96   : > { %4982 = vst.msk [vmem:[%s8023_s25 + $0x2d] sm:$0x1] %vm4348_vm15, %v4964_v24  ;;  %4724 = vst.msk [vmem:[%s8023_s25 + $0x13] sm:$0x1] %vm4348_vm15, %v4703_v30 }
 0xb99   : > { %v4968_v34 = vpop.permute.xlu1 %4967  ;;  %v4707_v35 = vpop.permute.xlu0 %4706 }
 0xb9a   : > { %4984 = vst.msk [vmem:[%s8023_s25 + $0x3d] sm:$0x1] %vm4348_vm15, %v4968_v34  ;;  %4726 = vst.msk [vmem:[%s8023_s25 + $0x23] sm:$0x1] %vm4348_vm15, %v4707_v35 }
 0xb9d   : > { %v5211_v37 = vpop.permute.xlu1 %5210  ;;  %v4711_v45 = vpop.permute.xlu0 %4710 }
 0xb9e   : > { %5233 = vst.msk [vmem:[%s8023_s25 + $0xf] sm:$0x1] %vm4348_vm15, %v5211_v37  ;;  %4728 = vst.msk [vmem:[%s8023_s25 + $0x33] sm:$0x1] %vm4348_vm15, %v4711_v45 }
 0xba1   : > { %v5215_v4 = vpop.permute.xlu1 %5214  ;;  %v4954_v2 = vpop.permute.xlu0 %4953 }
 0xba2   : > { %5235 = vst.msk [vmem:[%s8023_s25 + $0x1f] sm:$0x1] %vm4348_vm15, %v5215_v4  ;;  %4977 = vst.msk [vmem:[%s8023_s25 + $0x5] sm:$0x1] %vm4348_vm15, %v4954_v2 }
 0xba5   : > { %v5241_v50 = vld [vmem:[%s8023_s25 + $0x8] sm:$0xff]  ;;  %v5219_v7 = vpop.permute.xlu1 %5218  ;;  %v4958_v32 = vpop.permute.xlu0 %4957 }
 0xba6   : > { %v5249_v47 = vadd.f32 %v5241_v50, %v2441_v5  ;;  %5237 = vst.msk [vmem:[%s8023_s25 + $0x2f] sm:$0x1] %vm4348_vm15, %v5219_v7  ;;  %4979 = vst.msk [vmem:[%s8023_s25 + $0x15] sm:$0x1] %vm4348_vm15, %v4958_v32 }
 0xba8   : > { %5257 = vst.msk [vmem:[%s8023_s25 + $0x8] sm:$0xff] %vm730_vm0, %v5249_v47 }
 0xba9   : > { %v5243_v51 = vld [vmem:[%s8023_s25 + $0x18] sm:$0xff]  ;;  %v5223_v36 = vpop.permute.xlu1 %5222  ;;  %v4962_v16 = vpop.permute.xlu0 %4961 }
 0xbaa   : > { %v5251_v38 = vadd.f32 %v5243_v51, %v2451_v22  ;;  %5239 = vst.msk [vmem:[%s8023_s25 + $0x3f] sm:$0x1] %vm4348_vm15, %v5223_v36  ;;  %4981 = vst.msk [vmem:[%s8023_s25 + $0x25] sm:$0x1] %vm4348_vm15, %v4962_v16 }
 0xbac   : > { %5259 = vst.msk [vmem:[%s8023_s25 + $0x18] sm:$0xff] %vm730_vm0, %v5251_v38 }
 0xbad   : > { %v5245_v21 = vld [vmem:[%s8023_s25 + $0x28] sm:$0xff]  ;;  %v4966_v53 = vpop.permute.xlu0 %4965 }
 0xbae   : > { %v5253_v9 = vadd.f32 %v5245_v21, %v2461_v42  ;;  %4983 = vst.msk [vmem:[%s8023_s25 + $0x35] sm:$0x1] %vm4348_vm15, %v4966_v53 }
 0xbb0   : > { %5261 = vst.msk [vmem:[%s8023_s25 + $0x28] sm:$0xff] %vm730_vm0, %v5253_v9 }
 0xbb1   : > { %v5247_v54 = vld [vmem:[%s8023_s25 + $0x38] sm:$0xff]  ;;  %v5209_v6 = vpop.permute.xlu0 %5208 }
 0xbb2   : > { %v5255_v52 = vadd.f32 %v5247_v54, %v2471_v58  ;;  %5232 = vst.msk [vmem:[%s8023_s25 + $0x7] sm:$0x1] %vm4348_vm15, %v5209_v6 }
 0xbb4   : > { %5263 = vst.msk [vmem:[%s8023_s25 + $0x38] sm:$0xff] %vm730_vm0, %v5255_v52 }
 0xbb5   : > { %v5213_v41 = vpop.permute.xlu0 %5212 }
 0xbb6   : > { %5234 = vst.msk [vmem:[%s8023_s25 + $0x17] sm:$0x1] %vm4348_vm15, %v5213_v41 }
 0xbb9   : > { %v5240_v43 = vld [vmem:[%s8023_s25] sm:$0xff]  ;;  %v5217_v59 = vpop.permute.xlu0 %5216 }
 0xbba   : > { %v5248_v60 = vadd.f32 %v5240_v43, %v2436_v55  ;;  %5236 = vst.msk [vmem:[%s8023_s25 + $0x27] sm:$0x1] %vm4348_vm15, %v5217_v59 }
 0xbbc   : > { %5256 = vst.msk [vmem:[%s8023_s25] sm:$0xff] %vm730_vm0, %v5248_v60 }
 0xbbd   : > { %v5242_v61 = vld [vmem:[%s8023_s25 + $0x10] sm:$0xff]  ;;  %v5221_v62 = vpop.permute.xlu0 %5220 }
 0xbbe   : > { %v5250_v57 = vadd.f32 %v5242_v61, %v2446_v11  ;;  %5238 = vst.msk [vmem:[%s8023_s25 + $0x37] sm:$0x1] %vm4348_vm15, %v5221_v62 }
 0xbc0   : > { %5258 = vst.msk [vmem:[%s8023_s25 + $0x10] sm:$0xff] %vm730_vm0, %v5250_v57 }
 0xbc1   : > { %v5244_v39 = vld [vmem:[%s8023_s25 + $0x20] sm:$0xff] }
 0xbc2   : > { %v5252_v18 = vadd.f32 %v5244_v39, %v2456_v17 }
 0xbc4   : > { %5260 = vst.msk [vmem:[%s8023_s25 + $0x20] sm:$0xff] %vm730_vm0, %v5252_v18 }
 0xbc5   : > { %v5246_v10 = vld [vmem:[%s8023_s25 + $0x30] sm:$0xff] }
 0xbc6   : > { %v5254_v8 = vadd.f32 %v5246_v10, %v2466_v46 }
 0xbc8   : > { %5262 = vst.msk [vmem:[%s8023_s25 + $0x30] sm:$0xff] %vm730_vm0, %v5254_v8 }
 0xbc9 PF: > { %s33_s4 = sadd.s32 1, %s6869_s4  }
 0xbca   : > { %p30_p4 = scmp.ge.s32.totalorder %s33_s4, 4  }
 0xbcc   :  { %32 = sbr.rel (!%p30_p4) target bundleno = 9 (0x9), region = 150 }

</bundles_post_ra>
